<compile_context>
chip_gen: v5e
topology: v5e:2x2
jax: 0.10.0
libtpu: 0.0.40
codegen_flags: <defaults>
</compile_context>

<pallas_src>
import functools

import jax
import jax.numpy as jnp
from jax.experimental import pallas as pl
from jax.experimental.pallas import tpu as pltpu


# ---------------------------------------------------------------------------
# Fused kernel
# ---------------------------------------------------------------------------
def _conv3x3(p_ref, w_ref, H, W):
    """3x3 'valid' conv over a zero-padded (H+2, W+2, Cin) VMEM slab.

    Expressed as 9 shifted (H*W, Cin) x (Cin, Cout) MXU matmuls feeding a
    single f32 accumulation chain (no intermediate reshapes/casts, so the MXU
    result path can absorb the adds on v7x's MRB).  Only 3 slab loads (one
    per kh row); kw shifts are register-level slices.
    """
    acc = None
    for kh in range(3):
        rows = p_ref[kh:kh + H]                    # (H, W+2, Cin)
        for kw in range(3):
            patch = rows[:, kw:kw + W, :]          # (H, W, Cin)
            part = jax.lax.dot_general(
                patch, w_ref[kh, kw],
                dimension_numbers=(((2,), (0,)), ((), ())),
                preferred_element_type=jnp.float32)
            acc = part if acc is None else acc + part
    return acc                                     # (H, W, Cout) f32


def _resblock_kernel(*refs, has_skip):
    if has_skip:
        (x_ref, w1_ref, b1_ref, w2_ref, b2_ref, ws_ref, bs_ref,
         o_ref, p1_ref, p2_ref) = refs
    else:
        (x_ref, w1_ref, b1_ref, w2_ref, b2_ref,
         o_ref, p1_ref, p2_ref) = refs

    H = o_ref.shape[1]
    W = o_ref.shape[2]

    x = x_ref[0]                                   # (H, W, Cin), un-activated

    # ---- ConvBlock 1: relu -> zero-pad(1) -> 3x3 conv (+ b1) ---------------
    # relu-then-zero-pad == zero-pad-then-relu.  The padding exists only in
    # VMEM; the scratch is re-zeroed each step so this stays correct even if
    # the "parallel" grid axis is sharded across TensorCores (megacore).
    p1_ref[...] = jnp.zeros_like(p1_ref)
    p1_ref[1:H + 1, 1:W + 1, :] = jnp.maximum(x, 0.0).astype(p1_ref.dtype)
    y1 = _conv3x3(p1_ref, w1_ref, H, W) + b1_ref[...]

    # ---- ConvBlock 2: relu -> zero-pad(1) -> 3x3 conv (+ b2) ---------------
    p2_ref[...] = jnp.zeros_like(p2_ref)
    p2_ref[1:H + 1, 1:W + 1, :] = jnp.maximum(y1, 0.0)
    y2 = _conv3x3(p2_ref, w2_ref, H, W) + b2_ref[...]

    # ---- Skip path + residual add, fused (no extra HBM round trip) ---------
    if has_skip:
        res = jax.lax.dot_general(
            x, ws_ref[...],
            dimension_numbers=(((2,), (0,)), ((), ())),
            preferred_element_type=jnp.float32) + bs_ref[...]
    else:
        res = x.astype(jnp.float32)

    o_ref[...] = (y2 + res).astype(o_ref.dtype)[None]


# ---------------------------------------------------------------------------
# Wrapper
# ---------------------------------------------------------------------------
def resblock_forward(x, params):
    """x: (N, H, W, C_in) -> (N, H, W, C_out); one fused pallas_call."""
    N, H, W, Cin = x.shape
    Cout = params["w1"].shape[-1]
    has_skip = "ws" in params

    b1 = params["b1"].reshape(1, 1, Cout)
    b2 = params["b2"].reshape(1, 1, Cout)

    inputs = [x, params["w1"], b1, params["w2"], b2]
    in_specs = [
        pl.BlockSpec((1, H, W, Cin), lambda n: (n, 0, 0, 0)),
        # Constant block index -> weights/biases DMA'd once, kept resident.
        pl.BlockSpec((3, 3, Cin, Cout), lambda n: (0, 0, 0, 0)),
        pl.BlockSpec((1, 1, Cout), lambda n: (0, 0, 0)),
        pl.BlockSpec((3, 3, Cout, Cout), lambda n: (0, 0, 0, 0)),
        pl.BlockSpec((1, 1, Cout), lambda n: (0, 0, 0)),
    ]
    if has_skip:
        inputs += [params["ws"], params["bs"].reshape(1, 1, Cout)]
        in_specs += [
            pl.BlockSpec((Cin, Cout), lambda n: (0, 0)),
            pl.BlockSpec((1, 1, Cout), lambda n: (0, 0, 0)),
        ]

    kernel = functools.partial(_resblock_kernel, has_skip=has_skip)

    # TODO(synk): for large images (e.g. 256x256x256) add a halo-aware H-tile
    # grid axis (manual DMA of a (TH+4)-row slab) so blocks stay within v7x's
    # 64 MiB VMEM; not needed at the small shapes exercised here.
    # TODO(synk): optional bf16 matmul operands (f32 accumulation) and padding
    # C to a multiple of 128 for lane-dense stores at production channel counts.
    return pl.pallas_call(
        kernel,
        out_shape=jax.ShapeDtypeStruct((N, H, W, Cout), x.dtype),
        grid_spec=pltpu.PrefetchScalarGridSpec(
            num_scalar_prefetch=0,
            grid=(N,),
            in_specs=in_specs,
            out_specs=pl.BlockSpec((1, H, W, Cout), lambda n: (n, 0, 0, 0)),
            scratch_shapes=[
                pltpu.VMEM((H + 2, W + 2, Cin), jnp.float32),   # padded relu(x)
                pltpu.VMEM((H + 2, W + 2, Cout), jnp.float32),  # padded relu(y1)
            ],
        ),
        compiler_params=pltpu.CompilerParams(
            dimension_semantics=("parallel",)),
    )(*inputs)


resblock_forward_jit = jax.jit(resblock_forward)


# ---------------------------------------------------------------------------
# Params / reference
# ---------------------------------------------------------------------------
def init_params(key, C_in, C_out, dtype=jnp.float32):
    k1, k2, k3, k4, k5, k6 = jax.random.split(key, 6)
    scale1 = 1.0 / jnp.sqrt(9.0 * C_in)
    scale2 = 1.0 / jnp.sqrt(9.0 * C_out)
    scale_s = 1.0 / jnp.sqrt(1.0 * C_in)
    params = {
        "w1": (jax.random.normal(k1, (3, 3, C_in, C_out)) * scale1).astype(dtype),
        "b1": (jax.random.normal(k2, (C_out,)) * 0.1).astype(dtype),
        "w2": (jax.random.normal(k3, (3, 3, C_out, C_out)) * scale2).astype(dtype),
        "b2": (jax.random.normal(k4, (C_out,)) * 0.1).astype(dtype),
    }
    if C_in != C_out:
        params["ws"] = (jax.random.normal(k5, (C_in, C_out)) * scale_s).astype(dtype)
        params["bs"] = (jax.random.normal(k6, (C_out,)) * 0.1).astype(dtype)
    return params


def _reference_forward(x, params):
    """Pure-JAX reference (lax.conv) mirroring the PyTorch ResBlock defaults."""
    dn = ("NHWC", "HWIO", "NHWC")
    a1 = jnp.maximum(x, 0.0)
    y1 = jax.lax.conv_general_dilated(a1, params["w1"], (1, 1),
                                      [(1, 1), (1, 1)], dimension_numbers=dn)
    y1 = y1 + params["b1"].reshape(1, 1, 1, -1)
    a2 = jnp.maximum(y1, 0.0)
    y2 = jax.lax.conv_general_dilated(a2, params["w2"], (1, 1),
                                      [(1, 1), (1, 1)], dimension_numbers=dn)
    y2 = y2 + params["b2"].reshape(1, 1, 1, -1)
    if "ws" in params:
        sk = jnp.einsum("nhwc,co->nhwo", x, params["ws"]) + \
            params["bs"].reshape(1, 1, 1, -1)
    else:
        sk = x
    return y2 + sk


if __name__ == "__main__":
    N, H, W = 2, 16, 16
    C_in, C_out = 4, 8

    key = jax.random.PRNGKey(0)
    kx, kp = jax.random.split(key)
    x = jax.random.normal(kx, (N, H, W, C_in), dtype=jnp.float32)
    params = init_params(kp, C_in, C_out)

    out = resblock_forward_jit(x, params)
    out = jax.block_until_ready(out)

    ref = _reference_forward(x, params)
    assert out.shape == (N, H, W, C_out)
    assert jnp.allclose(out, ref, atol=1e-4, rtol=1e-4), "mismatch vs JAX reference"

    print("KERNEL_OK")
</pallas_src>

<mosaic_0001>
module attributes {stable_mosaic.version = 11 : i64} {
  func.func @_resblock_kernel(%arg0: i32, %arg1: memref<1x16x16x4xf32, #tpu.memory_space<vmem>>, %arg2: memref<3x3x4x8xf32, #tpu.memory_space<vmem>>, %arg3: memref<1x1x8xf32, #tpu.memory_space<vmem>>, %arg4: memref<3x3x8x8xf32, #tpu.memory_space<vmem>>, %arg5: memref<1x1x8xf32, #tpu.memory_space<vmem>>, %arg6: memref<4x8xf32, #tpu.memory_space<vmem>>, %arg7: memref<1x1x8xf32, #tpu.memory_space<vmem>>, %arg8: memref<1x16x16x8xf32, #tpu.memory_space<vmem>>, %arg9: memref<18x18x4xf32, #tpu.memory_space<vmem>>, %arg10: memref<18x18x8xf32, #tpu.memory_space<vmem>>) attributes {dimension_semantics = [#tpu.dimension_semantics<parallel>], iteration_bounds = array<i64: 2>, scalar_prefetch = 0 : i64, scratch_operands = 2 : i64, tpu.core_type = #tpu.core_type<tc>, window_params = [{transform_indices = @transform_0, window_bounds = array<i64: 1, 16, 16, 4>}, {pipeline_mode = #tpu.pipeline_mode<synchronous>, transform_indices = @transform_1, window_bounds = array<i64: 3, 3, 4, 8>}, {pipeline_mode = #tpu.pipeline_mode<synchronous>, transform_indices = @transform_2, window_bounds = array<i64: 1, 1, 8>}, {pipeline_mode = #tpu.pipeline_mode<synchronous>, transform_indices = @transform_3, window_bounds = array<i64: 3, 3, 8, 8>}, {pipeline_mode = #tpu.pipeline_mode<synchronous>, transform_indices = @transform_4, window_bounds = array<i64: 1, 1, 8>}, {pipeline_mode = #tpu.pipeline_mode<synchronous>, transform_indices = @transform_5, window_bounds = array<i64: 4, 8>}, {pipeline_mode = #tpu.pipeline_mode<synchronous>, transform_indices = @transform_6, window_bounds = array<i64: 1, 1, 8>}, {transform_indices = @transform_7, window_bounds = array<i64: 1, 16, 16, 8>}]} {
    %c0 = arith.constant 0 : index
    %c0_0 = arith.constant 0 : index
    %c0_1 = arith.constant 0 : index
    %c0_2 = arith.constant 0 : index
    %0 = vector.load %arg1[%c0, %c0_0, %c0_1, %c0_2] : memref<1x16x16x4xf32, #tpu.memory_space<vmem>>, vector<1x16x16x4xf32>
    %1 = vector.shape_cast %0 : vector<1x16x16x4xf32> to vector<16x16x4xf32>
    %cst = arith.constant 0.000000e+00 : f32
    %2 = vector.broadcast %cst : f32 to vector<18x18x4xf32>
    %c0_3 = arith.constant 0 : index
    %c0_4 = arith.constant 0 : index
    %c0_5 = arith.constant 0 : index
    %3 = vector.load %arg9[%c0_3, %c0_4, %c0_5] : memref<18x18x4xf32, #tpu.memory_space<vmem>>, vector<18x18x4xf32>
    tpu.vector_store %arg9[%c0_3, %c0_4, %c0_5], %2 {strides = array<i32>} : memref<18x18x4xf32, #tpu.memory_space<vmem>>, vector<18x18x4xf32>,
    %cst_6 = arith.constant 0.000000e+00 : f32
    %4 = vector.broadcast %cst_6 : f32 to vector<16x16x4xf32>
    %5 = arith.maximumf %1, %4 : vector<16x16x4xf32>
    %c1 = arith.constant 1 : index
    %c1_7 = arith.constant 1 : index
    %c0_8 = arith.constant 0 : index
    %6 = vector.load %arg9[%c1, %c1_7, %c0_8] : memref<18x18x4xf32, #tpu.memory_space<vmem>>, vector<16x16x4xf32>
    tpu.vector_store %arg9[%c1, %c1_7, %c0_8], %5 {strides = array<i32>} : memref<18x18x4xf32, #tpu.memory_space<vmem>>, vector<16x16x4xf32>,
    %c0_9 = arith.constant 0 : index
    %c0_10 = arith.constant 0 : index
    %c0_11 = arith.constant 0 : index
    %7 = vector.load %arg9[%c0_9, %c0_10, %c0_11] : memref<18x18x4xf32, #tpu.memory_space<vmem>>, vector<16x18x4xf32>
    %8 = vector.extract_strided_slice %7 {offsets = [0, 0, 0], sizes = [16, 16, 4], strides = [1, 1, 1]} : vector<16x18x4xf32> to vector<16x16x4xf32>
    %c0_12 = arith.constant 0 : index
    %c0_13 = arith.constant 0 : index
    %c0_14 = arith.constant 0 : index
    %c0_15 = arith.constant 0 : index
    %9 = vector.load %arg2[%c0_12, %c0_13, %c0_14, %c0_15] : memref<3x3x4x8xf32, #tpu.memory_space<vmem>>, vector<1x1x4x8xf32>
    %10 = vector.shape_cast %9 : vector<1x1x4x8xf32> to vector<4x8xf32>
    %cst_16 = arith.constant dense<0.000000e+00> : vector<16x16x8xf32>
    %11 = tpu.matmul %8, %10, %cst_16 {dimension_numbers = #tpu.dot_dimension_numbers<[2], [0], [0, 1], [1], [0, 0, 0, 1, 1, 1], [], []>} : vector<16x16x4xf32>, vector<4x8xf32>, vector<16x16x8xf32> -> vector<16x16x8xf32>
    %12 = vector.extract_strided_slice %7 {offsets = [0, 1, 0], sizes = [16, 16, 4], strides = [1, 1, 1]} : vector<16x18x4xf32> to vector<16x16x4xf32>
    %c0_17 = arith.constant 0 : index
    %c1_18 = arith.constant 1 : index
    %c0_19 = arith.constant 0 : index
    %c0_20 = arith.constant 0 : index
    %13 = vector.load %arg2[%c0_17, %c1_18, %c0_19, %c0_20] : memref<3x3x4x8xf32, #tpu.memory_space<vmem>>, vector<1x1x4x8xf32>
    %14 = vector.shape_cast %13 : vector<1x1x4x8xf32> to vector<4x8xf32>
    %cst_21 = arith.constant dense<0.000000e+00> : vector<16x16x8xf32>
    %15 = tpu.matmul %12, %14, %cst_21 {dimension_numbers = #tpu.dot_dimension_numbers<[2], [0], [0, 1], [1], [0, 0, 0, 1, 1, 1], [], []>} : vector<16x16x4xf32>, vector<4x8xf32>, vector<16x16x8xf32> -> vector<16x16x8xf32>
    %16 = arith.addf %11, %15 : vector<16x16x8xf32>
    %17 = vector.extract_strided_slice %7 {offsets = [0, 2, 0], sizes = [16, 16, 4], strides = [1, 1, 1]} : vector<16x18x4xf32> to vector<16x16x4xf32>
    %c0_22 = arith.constant 0 : index
    %c2 = arith.constant 2 : index
    %c0_23 = arith.constant 0 : index
    %c0_24 = arith.constant 0 : index
    %18 = vector.load %arg2[%c0_22, %c2, %c0_23, %c0_24] : memref<3x3x4x8xf32, #tpu.memory_space<vmem>>, vector<1x1x4x8xf32>
    %19 = vector.shape_cast %18 : vector<1x1x4x8xf32> to vector<4x8xf32>
    %cst_25 = arith.constant dense<0.000000e+00> : vector<16x16x8xf32>
    %20 = tpu.matmul %17, %19, %cst_25 {dimension_numbers = #tpu.dot_dimension_numbers<[2], [0], [0, 1], [1], [0, 0, 0, 1, 1, 1], [], []>} : vector<16x16x4xf32>, vector<4x8xf32>, vector<16x16x8xf32> -> vector<16x16x8xf32>
    %21 = arith.addf %16, %20 : vector<16x16x8xf32>
    %c1_26 = arith.constant 1 : index
    %c0_27 = arith.constant 0 : index
    %c0_28 = arith.constant 0 : index
    %22 = vector.load %arg9[%c1_26, %c0_27, %c0_28] : memref<18x18x4xf32, #tpu.memory_space<vmem>>, vector<16x18x4xf32>
    %23 = vector.extract_strided_slice %22 {offsets = [0, 0, 0], sizes = [16, 16, 4], strides = [1, 1, 1]} : vector<16x18x4xf32> to vector<16x16x4xf32>
    %c1_29 = arith.constant 1 : index
    %c0_30 = arith.constant 0 : index
    %c0_31 = arith.constant 0 : index
    %c0_32 = arith.constant 0 : index
    %24 = vector.load %arg2[%c1_29, %c0_30, %c0_31, %c0_32] : memref<3x3x4x8xf32, #tpu.memory_space<vmem>>, vector<1x1x4x8xf32>
    %25 = vector.shape_cast %24 : vector<1x1x4x8xf32> to vector<4x8xf32>
    %cst_33 = arith.constant dense<0.000000e+00> : vector<16x16x8xf32>
    %26 = tpu.matmul %23, %25, %cst_33 {dimension_numbers = #tpu.dot_dimension_numbers<[2], [0], [0, 1], [1], [0, 0, 0, 1, 1, 1], [], []>} : vector<16x16x4xf32>, vector<4x8xf32>, vector<16x16x8xf32> -> vector<16x16x8xf32>
    %27 = arith.addf %21, %26 : vector<16x16x8xf32>
    %28 = vector.extract_strided_slice %22 {offsets = [0, 1, 0], sizes = [16, 16, 4], strides = [1, 1, 1]} : vector<16x18x4xf32> to vector<16x16x4xf32>
    %c1_34 = arith.constant 1 : index
    %c1_35 = arith.constant 1 : index
    %c0_36 = arith.constant 0 : index
    %c0_37 = arith.constant 0 : index
    %29 = vector.load %arg2[%c1_34, %c1_35, %c0_36, %c0_37] : memref<3x3x4x8xf32, #tpu.memory_space<vmem>>, vector<1x1x4x8xf32>
    %30 = vector.shape_cast %29 : vector<1x1x4x8xf32> to vector<4x8xf32>
    %cst_38 = arith.constant dense<0.000000e+00> : vector<16x16x8xf32>
    %31 = tpu.matmul %28, %30, %cst_38 {dimension_numbers = #tpu.dot_dimension_numbers<[2], [0], [0, 1], [1], [0, 0, 0, 1, 1, 1], [], []>} : vector<16x16x4xf32>, vector<4x8xf32>, vector<16x16x8xf32> -> vector<16x16x8xf32>
    %32 = arith.addf %27, %31 : vector<16x16x8xf32>
    %33 = vector.extract_strided_slice %22 {offsets = [0, 2, 0], sizes = [16, 16, 4], strides = [1, 1, 1]} : vector<16x18x4xf32> to vector<16x16x4xf32>
    %c1_39 = arith.constant 1 : index
    %c2_40 = arith.constant 2 : index
    %c0_41 = arith.constant 0 : index
    %c0_42 = arith.constant 0 : index
    %34 = vector.load %arg2[%c1_39, %c2_40, %c0_41, %c0_42] : memref<3x3x4x8xf32, #tpu.memory_space<vmem>>, vector<1x1x4x8xf32>
    %35 = vector.shape_cast %34 : vector<1x1x4x8xf32> to vector<4x8xf32>
    %cst_43 = arith.constant dense<0.000000e+00> : vector<16x16x8xf32>
    %36 = tpu.matmul %33, %35, %cst_43 {dimension_numbers = #tpu.dot_dimension_numbers<[2], [0], [0, 1], [1], [0, 0, 0, 1, 1, 1], [], []>} : vector<16x16x4xf32>, vector<4x8xf32>, vector<16x16x8xf32> -> vector<16x16x8xf32>
    %37 = arith.addf %32, %36 : vector<16x16x8xf32>
    %c2_44 = arith.constant 2 : index
    %c0_45 = arith.constant 0 : index
    %c0_46 = arith.constant 0 : index
    %38 = vector.load %arg9[%c2_44, %c0_45, %c0_46] : memref<18x18x4xf32, #tpu.memory_space<vmem>>, vector<16x18x4xf32>
    %39 = vector.extract_strided_slice %38 {offsets = [0, 0, 0], sizes = [16, 16, 4], strides = [1, 1, 1]} : vector<16x18x4xf32> to vector<16x16x4xf32>
    %c2_47 = arith.constant 2 : index
    %c0_48 = arith.constant 0 : index
    %c0_49 = arith.constant 0 : index
    %c0_50 = arith.constant 0 : index
    %40 = vector.load %arg2[%c2_47, %c0_48, %c0_49, %c0_50] : memref<3x3x4x8xf32, #tpu.memory_space<vmem>>, vector<1x1x4x8xf32>
    %41 = vector.shape_cast %40 : vector<1x1x4x8xf32> to vector<4x8xf32>
    %cst_51 = arith.constant dense<0.000000e+00> : vector<16x16x8xf32>
    %42 = tpu.matmul %39, %41, %cst_51 {dimension_numbers = #tpu.dot_dimension_numbers<[2], [0], [0, 1], [1], [0, 0, 0, 1, 1, 1], [], []>} : vector<16x16x4xf32>, vector<4x8xf32>, vector<16x16x8xf32> -> vector<16x16x8xf32>
    %43 = arith.addf %37, %42 : vector<16x16x8xf32>
    %44 = vector.extract_strided_slice %38 {offsets = [0, 1, 0], sizes = [16, 16, 4], strides = [1, 1, 1]} : vector<16x18x4xf32> to vector<16x16x4xf32>
    %c2_52 = arith.constant 2 : index
    %c1_53 = arith.constant 1 : index
    %c0_54 = arith.constant 0 : index
    %c0_55 = arith.constant 0 : index
    %45 = vector.load %arg2[%c2_52, %c1_53, %c0_54, %c0_55] : memref<3x3x4x8xf32, #tpu.memory_space<vmem>>, vector<1x1x4x8xf32>
    %46 = vector.shape_cast %45 : vector<1x1x4x8xf32> to vector<4x8xf32>
    %cst_56 = arith.constant dense<0.000000e+00> : vector<16x16x8xf32>
    %47 = tpu.matmul %44, %46, %cst_56 {dimension_numbers = #tpu.dot_dimension_numbers<[2], [0], [0, 1], [1], [0, 0, 0, 1, 1, 1], [], []>} : vector<16x16x4xf32>, vector<4x8xf32>, vector<16x16x8xf32> -> vector<16x16x8xf32>
    %48 = arith.addf %43, %47 : vector<16x16x8xf32>
    %49 = vector.extract_strided_slice %38 {offsets = [0, 2, 0], sizes = [16, 16, 4], strides = [1, 1, 1]} : vector<16x18x4xf32> to vector<16x16x4xf32>
    %c2_57 = arith.constant 2 : index
    %c2_58 = arith.constant 2 : index
    %c0_59 = arith.constant 0 : index
    %c0_60 = arith.constant 0 : index
    %50 = vector.load %arg2[%c2_57, %c2_58, %c0_59, %c0_60] : memref<3x3x4x8xf32, #tpu.memory_space<vmem>>, vector<1x1x4x8xf32>
    %51 = vector.shape_cast %50 : vector<1x1x4x8xf32> to vector<4x8xf32>
    %cst_61 = arith.constant dense<0.000000e+00> : vector<16x16x8xf32>
    %52 = tpu.matmul %49, %51, %cst_61 {dimension_numbers = #tpu.dot_dimension_numbers<[2], [0], [0, 1], [1], [0, 0, 0, 1, 1, 1], [], []>} : vector<16x16x4xf32>, vector<4x8xf32>, vector<16x16x8xf32> -> vector<16x16x8xf32>
    %53 = arith.addf %48, %52 : vector<16x16x8xf32>
    %c0_62 = arith.constant 0 : index
    %c0_63 = arith.constant 0 : index
    %c0_64 = arith.constant 0 : index
    %54 = vector.load %arg3[%c0_62, %c0_63, %c0_64] : memref<1x1x8xf32, #tpu.memory_space<vmem>>, vector<1x1x8xf32>
    %55 = vector.broadcast %54 : vector<1x1x8xf32> to vector<16x16x8xf32>
    %56 = arith.addf %53, %55 : vector<16x16x8xf32>
    %cst_65 = arith.constant 0.000000e+00 : f32
    %57 = vector.broadcast %cst_65 : f32 to vector<18x18x8xf32>
    %c0_66 = arith.constant 0 : index
    %c0_67 = arith.constant 0 : index
    %c0_68 = arith.constant 0 : index
    %58 = vector.load %arg10[%c0_66, %c0_67, %c0_68] : memref<18x18x8xf32, #tpu.memory_space<vmem>>, vector<18x18x8xf32>
    tpu.vector_store %arg10[%c0_66, %c0_67, %c0_68], %57 {strides = array<i32>} : memref<18x18x8xf32, #tpu.memory_space<vmem>>, vector<18x18x8xf32>,
    %cst_69 = arith.constant 0.000000e+00 : f32
    %59 = vector.broadcast %cst_69 : f32 to vector<16x16x8xf32>
    %60 = arith.maximumf %56, %59 : vector<16x16x8xf32>
    %c1_70 = arith.constant 1 : index
    %c1_71 = arith.constant 1 : index
    %c0_72 = arith.constant 0 : index
    %61 = vector.load %arg10[%c1_70, %c1_71, %c0_72] : memref<18x18x8xf32, #tpu.memory_space<vmem>>, vector<16x16x8xf32>
    tpu.vector_store %arg10[%c1_70, %c1_71, %c0_72], %60 {strides = array<i32>} : memref<18x18x8xf32, #tpu.memory_space<vmem>>, vector<16x16x8xf32>,
    %c0_73 = arith.constant 0 : index
    %c0_74 = arith.constant 0 : index
    %c0_75 = arith.constant 0 : index
    %62 = vector.load %arg10[%c0_73, %c0_74, %c0_75] : memref<18x18x8xf32, #tpu.memory_space<vmem>>, vector<16x18x8xf32>
    %63 = vector.extract_strided_slice %62 {offsets = [0, 0, 0], sizes = [16, 16, 8], strides = [1, 1, 1]} : vector<16x18x8xf32> to vector<16x16x8xf32>
    %c0_76 = arith.constant 0 : index
    %c0_77 = arith.constant 0 : index
    %c0_78 = arith.constant 0 : index
    %c0_79 = arith.constant 0 : index
    %64 = vector.load %arg4[%c0_76, %c0_77, %c0_78, %c0_79] : memref<3x3x8x8xf32, #tpu.memory_space<vmem>>, vector<1x1x8x8xf32>
    %65 = vector.shape_cast %64 : vector<1x1x8x8xf32> to vector<8x8xf32>
    %cst_80 = arith.constant dense<0.000000e+00> : vector<16x16x8xf32>
    %66 = tpu.matmul %63, %65, %cst_80 {dimension_numbers = #tpu.dot_dimension_numbers<[2], [0], [0, 1], [1], [0, 0, 0, 1, 1, 1], [], []>} : vector<16x16x8xf32>, vector<8x8xf32>, vector<16x16x8xf32> -> vector<16x16x8xf32>
    %67 = vector.extract_strided_slice %62 {offsets = [0, 1, 0], sizes = [16, 16, 8], strides = [1, 1, 1]} : vector<16x18x8xf32> to vector<16x16x8xf32>
    %c0_81 = arith.constant 0 : index
    %c1_82 = arith.constant 1 : index
    %c0_83 = arith.constant 0 : index
    %c0_84 = arith.constant 0 : index
    %68 = vector.load %arg4[%c0_81, %c1_82, %c0_83, %c0_84] : memref<3x3x8x8xf32, #tpu.memory_space<vmem>>, vector<1x1x8x8xf32>
    %69 = vector.shape_cast %68 : vector<1x1x8x8xf32> to vector<8x8xf32>
    %cst_85 = arith.constant dense<0.000000e+00> : vector<16x16x8xf32>
    %70 = tpu.matmul %67, %69, %cst_85 {dimension_numbers = #tpu.dot_dimension_numbers<[2], [0], [0, 1], [1], [0, 0, 0, 1, 1, 1], [], []>} : vector<16x16x8xf32>, vector<8x8xf32>, vector<16x16x8xf32> -> vector<16x16x8xf32>
    %71 = arith.addf %66, %70 : vector<16x16x8xf32>
    %72 = vector.extract_strided_slice %62 {offsets = [0, 2, 0], sizes = [16, 16, 8], strides = [1, 1, 1]} : vector<16x18x8xf32> to vector<16x16x8xf32>
    %c0_86 = arith.constant 0 : index
    %c2_87 = arith.constant 2 : index
    %c0_88 = arith.constant 0 : index
    %c0_89 = arith.constant 0 : index
    %73 = vector.load %arg4[%c0_86, %c2_87, %c0_88, %c0_89] : memref<3x3x8x8xf32, #tpu.memory_space<vmem>>, vector<1x1x8x8xf32>
    %74 = vector.shape_cast %73 : vector<1x1x8x8xf32> to vector<8x8xf32>
    %cst_90 = arith.constant dense<0.000000e+00> : vector<16x16x8xf32>
    %75 = tpu.matmul %72, %74, %cst_90 {dimension_numbers = #tpu.dot_dimension_numbers<[2], [0], [0, 1], [1], [0, 0, 0, 1, 1, 1], [], []>} : vector<16x16x8xf32>, vector<8x8xf32>, vector<16x16x8xf32> -> vector<16x16x8xf32>
    %76 = arith.addf %71, %75 : vector<16x16x8xf32>
    %c1_91 = arith.constant 1 : index
    %c0_92 = arith.constant 0 : index
    %c0_93 = arith.constant 0 : index
    %77 = vector.load %arg10[%c1_91, %c0_92, %c0_93] : memref<18x18x8xf32, #tpu.memory_space<vmem>>, vector<16x18x8xf32>
    %78 = vector.extract_strided_slice %77 {offsets = [0, 0, 0], sizes = [16, 16, 8], strides = [1, 1, 1]} : vector<16x18x8xf32> to vector<16x16x8xf32>
    %c1_94 = arith.constant 1 : index
    %c0_95 = arith.constant 0 : index
    %c0_96 = arith.constant 0 : index
    %c0_97 = arith.constant 0 : index
    %79 = vector.load %arg4[%c1_94, %c0_95, %c0_96, %c0_97] : memref<3x3x8x8xf32, #tpu.memory_space<vmem>>, vector<1x1x8x8xf32>
    %80 = vector.shape_cast %79 : vector<1x1x8x8xf32> to vector<8x8xf32>
    %cst_98 = arith.constant dense<0.000000e+00> : vector<16x16x8xf32>
    %81 = tpu.matmul %78, %80, %cst_98 {dimension_numbers = #tpu.dot_dimension_numbers<[2], [0], [0, 1], [1], [0, 0, 0, 1, 1, 1], [], []>} : vector<16x16x8xf32>, vector<8x8xf32>, vector<16x16x8xf32> -> vector<16x16x8xf32>
    %82 = arith.addf %76, %81 : vector<16x16x8xf32>
    %83 = vector.extract_strided_slice %77 {offsets = [0, 1, 0], sizes = [16, 16, 8], strides = [1, 1, 1]} : vector<16x18x8xf32> to vector<16x16x8xf32>
    %c1_99 = arith.constant 1 : index
    %c1_100 = arith.constant 1 : index
    %c0_101 = arith.constant 0 : index
    %c0_102 = arith.constant 0 : index
    %84 = vector.load %arg4[%c1_99, %c1_100, %c0_101, %c0_102] : memref<3x3x8x8xf32, #tpu.memory_space<vmem>>, vector<1x1x8x8xf32>
    %85 = vector.shape_cast %84 : vector<1x1x8x8xf32> to vector<8x8xf32>
    %cst_103 = arith.constant dense<0.000000e+00> : vector<16x16x8xf32>
    %86 = tpu.matmul %83, %85, %cst_103 {dimension_numbers = #tpu.dot_dimension_numbers<[2], [0], [0, 1], [1], [0, 0, 0, 1, 1, 1], [], []>} : vector<16x16x8xf32>, vector<8x8xf32>, vector<16x16x8xf32> -> vector<16x16x8xf32>
    %87 = arith.addf %82, %86 : vector<16x16x8xf32>
    %88 = vector.extract_strided_slice %77 {offsets = [0, 2, 0], sizes = [16, 16, 8], strides = [1, 1, 1]} : vector<16x18x8xf32> to vector<16x16x8xf32>
    %c1_104 = arith.constant 1 : index
    %c2_105 = arith.constant 2 : index
    %c0_106 = arith.constant 0 : index
    %c0_107 = arith.constant 0 : index
    %89 = vector.load %arg4[%c1_104, %c2_105, %c0_106, %c0_107] : memref<3x3x8x8xf32, #tpu.memory_space<vmem>>, vector<1x1x8x8xf32>
    %90 = vector.shape_cast %89 : vector<1x1x8x8xf32> to vector<8x8xf32>
    %cst_108 = arith.constant dense<0.000000e+00> : vector<16x16x8xf32>
    %91 = tpu.matmul %88, %90, %cst_108 {dimension_numbers = #tpu.dot_dimension_numbers<[2], [0], [0, 1], [1], [0, 0, 0, 1, 1, 1], [], []>} : vector<16x16x8xf32>, vector<8x8xf32>, vector<16x16x8xf32> -> vector<16x16x8xf32>
    %92 = arith.addf %87, %91 : vector<16x16x8xf32>
    %c2_109 = arith.constant 2 : index
    %c0_110 = arith.constant 0 : index
    %c0_111 = arith.constant 0 : index
    %93 = vector.load %arg10[%c2_109, %c0_110, %c0_111] : memref<18x18x8xf32, #tpu.memory_space<vmem>>, vector<16x18x8xf32>
    %94 = vector.extract_strided_slice %93 {offsets = [0, 0, 0], sizes = [16, 16, 8], strides = [1, 1, 1]} : vector<16x18x8xf32> to vector<16x16x8xf32>
    %c2_112 = arith.constant 2 : index
    %c0_113 = arith.constant 0 : index
    %c0_114 = arith.constant 0 : index
    %c0_115 = arith.constant 0 : index
    %95 = vector.load %arg4[%c2_112, %c0_113, %c0_114, %c0_115] : memref<3x3x8x8xf32, #tpu.memory_space<vmem>>, vector<1x1x8x8xf32>
    %96 = vector.shape_cast %95 : vector<1x1x8x8xf32> to vector<8x8xf32>
    %cst_116 = arith.constant dense<0.000000e+00> : vector<16x16x8xf32>
    %97 = tpu.matmul %94, %96, %cst_116 {dimension_numbers = #tpu.dot_dimension_numbers<[2], [0], [0, 1], [1], [0, 0, 0, 1, 1, 1], [], []>} : vector<16x16x8xf32>, vector<8x8xf32>, vector<16x16x8xf32> -> vector<16x16x8xf32>
    %98 = arith.addf %92, %97 : vector<16x16x8xf32>
    %99 = vector.extract_strided_slice %93 {offsets = [0, 1, 0], sizes = [16, 16, 8], strides = [1, 1, 1]} : vector<16x18x8xf32> to vector<16x16x8xf32>
    %c2_117 = arith.constant 2 : index
    %c1_118 = arith.constant 1 : index
    %c0_119 = arith.constant 0 : index
    %c0_120 = arith.constant 0 : index
    %100 = vector.load %arg4[%c2_117, %c1_118, %c0_119, %c0_120] : memref<3x3x8x8xf32, #tpu.memory_space<vmem>>, vector<1x1x8x8xf32>
    %101 = vector.shape_cast %100 : vector<1x1x8x8xf32> to vector<8x8xf32>
    %cst_121 = arith.constant dense<0.000000e+00> : vector<16x16x8xf32>
    %102 = tpu.matmul %99, %101, %cst_121 {dimension_numbers = #tpu.dot_dimension_numbers<[2], [0], [0, 1], [1], [0, 0, 0, 1, 1, 1], [], []>} : vector<16x16x8xf32>, vector<8x8xf32>, vector<16x16x8xf32> -> vector<16x16x8xf32>
    %103 = arith.addf %98, %102 : vector<16x16x8xf32>
    %104 = vector.extract_strided_slice %93 {offsets = [0, 2, 0], sizes = [16, 16, 8], strides = [1, 1, 1]} : vector<16x18x8xf32> to vector<16x16x8xf32>
    %c2_122 = arith.constant 2 : index
    %c2_123 = arith.constant 2 : index
    %c0_124 = arith.constant 0 : index
    %c0_125 = arith.constant 0 : index
    %105 = vector.load %arg4[%c2_122, %c2_123, %c0_124, %c0_125] : memref<3x3x8x8xf32, #tpu.memory_space<vmem>>, vector<1x1x8x8xf32>
    %106 = vector.shape_cast %105 : vector<1x1x8x8xf32> to vector<8x8xf32>
    %cst_126 = arith.constant dense<0.000000e+00> : vector<16x16x8xf32>
    %107 = tpu.matmul %104, %106, %cst_126 {dimension_numbers = #tpu.dot_dimension_numbers<[2], [0], [0, 1], [1], [0, 0, 0, 1, 1, 1], [], []>} : vector<16x16x8xf32>, vector<8x8xf32>, vector<16x16x8xf32> -> vector<16x16x8xf32>
    %108 = arith.addf %103, %107 : vector<16x16x8xf32>
    %c0_127 = arith.constant 0 : index
    %c0_128 = arith.constant 0 : index
    %c0_129 = arith.constant 0 : index
    %109 = vector.load %arg5[%c0_127, %c0_128, %c0_129] : memref<1x1x8xf32, #tpu.memory_space<vmem>>, vector<1x1x8xf32>
    %110 = vector.broadcast %109 : vector<1x1x8xf32> to vector<16x16x8xf32>
    %111 = arith.addf %108, %110 : vector<16x16x8xf32>
    %c0_130 = arith.constant 0 : index
    %c0_131 = arith.constant 0 : index
    %112 = vector.load %arg6[%c0_130, %c0_131] : memref<4x8xf32, #tpu.memory_space<vmem>>, vector<4x8xf32>
    %cst_132 = arith.constant dense<0.000000e+00> : vector<16x16x8xf32>
    %113 = tpu.matmul %1, %112, %cst_132 {dimension_numbers = #tpu.dot_dimension_numbers<[2], [0], [0, 1], [1], [0, 0, 0, 1, 1, 1], [], []>} : vector<16x16x4xf32>, vector<4x8xf32>, vector<16x16x8xf32> -> vector<16x16x8xf32>
    %c0_133 = arith.constant 0 : index
    %c0_134 = arith.constant 0 : index
    %c0_135 = arith.constant 0 : index
    %114 = vector.load %arg7[%c0_133, %c0_134, %c0_135] : memref<1x1x8xf32, #tpu.memory_space<vmem>>, vector<1x1x8xf32>
    %115 = vector.broadcast %114 : vector<1x1x8xf32> to vector<16x16x8xf32>
    %116 = arith.addf %113, %115 : vector<16x16x8xf32>
    %117 = arith.addf %111, %116 : vector<16x16x8xf32>
    %118 = vector.shape_cast %117 : vector<16x16x8xf32> to vector<1x16x16x8xf32>
    %c0_136 = arith.constant 0 : index
    %c0_137 = arith.constant 0 : index
    %c0_138 = arith.constant 0 : index
    %c0_139 = arith.constant 0 : index
    %119 = vector.load %arg8[%c0_136, %c0_137, %c0_138, %c0_139] : memref<1x16x16x8xf32, #tpu.memory_space<vmem>>, vector<1x16x16x8xf32>
    tpu.vector_store %arg8[%c0_136, %c0_137, %c0_138, %c0_139], %118 {strides = array<i32>} : memref<1x16x16x8xf32, #tpu.memory_space<vmem>>, vector<1x16x16x8xf32>,
    return
  }
  func.func @transform_0(%arg0: i32) -> (i32, i32, i32, i32) {
    %c0_i32 = arith.constant 0 : i32
    %c0_i32_0 = arith.constant 0 : i32
    %c0_i32_1 = arith.constant 0 : i32
    %c0_i32_2 = arith.constant 0 : i32
    return %arg0, %c0_i32, %c0_i32_0, %c0_i32_1 : i32, i32, i32, i32
  }
  func.func @transform_1(%arg0: i32) -> (i32, i32, i32, i32) {
    %c0_i32 = arith.constant 0 : i32
    %c0_i32_0 = arith.constant 0 : i32
    %c0_i32_1 = arith.constant 0 : i32
    %c0_i32_2 = arith.constant 0 : i32
    %c0_i32_3 = arith.constant 0 : i32
    return %c0_i32, %c0_i32_0, %c0_i32_1, %c0_i32_2 : i32, i32, i32, i32
  }
  func.func @transform_2(%arg0: i32) -> (i32, i32, i32) {
    %c0_i32 = arith.constant 0 : i32
    %c0_i32_0 = arith.constant 0 : i32
    %c0_i32_1 = arith.constant 0 : i32
    %c0_i32_2 = arith.constant 0 : i32
    return %c0_i32, %c0_i32_0, %c0_i32_1 : i32, i32, i32
  }
  func.func @transform_3(%arg0: i32) -> (i32, i32, i32, i32) {
    %c0_i32 = arith.constant 0 : i32
    %c0_i32_0 = arith.constant 0 : i32
    %c0_i32_1 = arith.constant 0 : i32
    %c0_i32_2 = arith.constant 0 : i32
    %c0_i32_3 = arith.constant 0 : i32
    return %c0_i32, %c0_i32_0, %c0_i32_1, %c0_i32_2 : i32, i32, i32, i32
  }
  func.func @transform_4(%arg0: i32) -> (i32, i32, i32) {
    %c0_i32 = arith.constant 0 : i32
    %c0_i32_0 = arith.constant 0 : i32
    %c0_i32_1 = arith.constant 0 : i32
    %c0_i32_2 = arith.constant 0 : i32
    return %c0_i32, %c0_i32_0, %c0_i32_1 : i32, i32, i32
  }
  func.func @transform_5(%arg0: i32) -> (i32, i32) {
    %c0_i32 = arith.constant 0 : i32
    %c0_i32_0 = arith.constant 0 : i32
    %c0_i32_1 = arith.constant 0 : i32
    return %c0_i32, %c0_i32_0 : i32, i32
  }
  func.func @transform_6(%arg0: i32) -> (i32, i32, i32) {
    %c0_i32 = arith.constant 0 : i32
    %c0_i32_0 = arith.constant 0 : i32
    %c0_i32_1 = arith.constant 0 : i32
    %c0_i32_2 = arith.constant 0 : i32
    return %c0_i32, %c0_i32_0, %c0_i32_1 : i32, i32, i32
  }
  func.func @transform_7(%arg0: i32) -> (i32, i32, i32, i32) {
    %c0_i32 = arith.constant 0 : i32
    %c0_i32_0 = arith.constant 0 : i32
    %c0_i32_1 = arith.constant 0 : i32
    %c0_i32_2 = arith.constant 0 : i32
    return %arg0, %c0_i32, %c0_i32_0, %c0_i32_1 : i32, i32, i32, i32
  }
}

</mosaic_0001>

<bundles_post_ra>
// kernel: resblock_forward.1
= control target key start
LH: loop header
LB: loop body
LE: loop exit
PB: predicated region body
PF: predicated region fallthrough
CT: control target
= control target key end

     0   :  { %s6941_s24 = smov 0   ;;  %s10746_s0 = inlined_call_operand.vmem [shape: f32[2,16,16,4], index: 0, kind: input, shape index: {}]   ;;  %s10747_s1 = inlined_call_operand.vmem [shape: f32[3,3,4,8], index: 1, kind: input, shape index: {}]   ;;  %s10748_s2 = inlined_call_operand.vmem [shape: f32[1,1,8], index: 2, kind: input, shape index: {}]   ;;  %s10749_s3 = inlined_call_operand.vmem [shape: f32[3,3,8,8], index: 3, kind: input, shape index: {}]   ;;  %s10750_s4 = inlined_call_operand.vmem [shape: f32[1,1,8], index: 4, kind: input, shape index: {}]   ;;  %s10751_s5 = inlined_call_operand.vmem [shape: f32[4,8], index: 5, kind: input, shape index: {}]   ;;  %s10752_s6 = inlined_call_operand.vmem [shape: f32[1,1,8], index: 6, kind: input, shape index: {}]   ;;  %s10753_s7 = inlined_call_operand.vmem [shape: f32[2,16,16,8], index: 7, kind: output, shape index: {}]  }
   0x1 LB: > { %s6197_s25 = sadd.s32 4294967295, %s6898_s24   ;;  %p6201_p0 = scmp.ge.s32.totalorder %s6898_s24, 1  ;;  %s6898_s24 = sphi %s6941_s24, %s17_s24  }
   0x2   : > { %p237_p1 = scmp.lt.s32.totalorder %s6898_s24, 3 }
   0x4   : > { %p238_p2 = pnand %p6201_p0, %p237_p1 }
   0x6   : > { %241 = sbr.rel (%p238_p2) target bundleno = 1562 (0x61a), region = 48 }
   0xb   : > { %v6206_v0 = vld [vmem:[%s10747_s1 + $0x4] sm:$0xf]  ;;  %vm676_vm0 = vcmask 1043456   ;;  %vm311_vm1 = vcmask 31744   ;;  %v10754_v1 = vmov 0.0   ;;  %vm531_vm2 = vcmask 1046528  }
   0xc   : > { %6207 = vmatpush.msk.msra.mxu0 %vm676_vm0, %v6206_v0  ;;  %312 = vst.msk [vmem:[#allocation2] sm:$0xff] %vm311_vm1, %v10754_v1  ;;  %6844 = vmatpush.msk.msra.mxu3 %vm676_vm0, %v6206_v0  ;;  %vm314_vm3 = vcmask 25600   ;;  %p269_p3 = scmp.lt.s32.totalorder %s6197_s25, 1  ;;  %v480_v7 = vld [vmem:[%s10747_s1] sm:$0xf]  ;;  %vm975_vm4 = vcmask 1045504  }
   0xd   : > { %313 = vst.msk [vmem:[#allocation2 + $0x8] sm:$0xff] %vm311_vm1, %v10754_v1  ;;  %v7039_v8 = vld [vmem:[%s10747_s1 + $0x8] sm:$0xf]  ;;  %6240 = vmatpush.msk.msra.mxu1 %vm676_vm0, %v480_v7  ;;  %v6341_v12 = vld [vmem:[%s10747_s1 + $0x10] sm:$0xf]  ;;  %vm3101_vm5 = vcmask 64512  }
   0xe   : > { %316 = vst.msk [vmem:[#allocation2 + $0x18] sm:$0xff] %vm311_vm1, %v10754_v1  ;;  %6845 = vmatpush.msk.msrb.mxu3 %vm676_vm0, %v480_v7  ;;  %6274 = vmatpush.msk.msra.mxu2 %vm676_vm0, %v7039_v8  ;;  %s11273_s25 = smov (!%p269_p3, %s6197_s25), 1  ;;  %vm3104_vm6 = vcmask 58368  }
   0xf   : > { %317 = vst.msk [vmem:[#allocation2 + $0x20] sm:$0xff] %vm311_vm1, %v10754_v1  ;;  %s6842_s9 = sshll.u32 %s11273_s25, 8  ;;  %6342 = vmatpush.msk.msrb.mxu0 %vm676_vm0, %v6341_v12 }
  0x10   : > { %319 = vst.msk [vmem:[#allocation2 + $0x30] sm:$0xff] %vm311_vm1, %v10754_v1  ;;  %s7083_s14 = scalar_lea.vmem %s10746_s0, %s6842_s9  ;;  %s10452_s17 = scalar_lea.vmem %s10753_s7, %s6842_s9 }
  0x11   : > { %320 = vst.msk [vmem:[#allocation2 + $0x38] sm:$0xff] %vm311_vm1, %v10754_v1  ;;  %v301_v18 = vld [vmem:[%s7083_s14 + $0xb0] sm:$0xff]  ;;  %v302_v19 = vld [vmem:[%s7083_s14 + $0xb8] sm:$0xff]  ;;  %v279_v20 = vld [vmem:[%s7083_s14] sm:$0xff] }
  0x12   : > { %322 = vst.msk [vmem:[#allocation2 + $0x48] sm:$0xff] %vm311_vm1, %v10754_v1  ;;  %v389_v21 = vmax.f32 %v301_v18, 0.0  ;;  %v280_v22 = vld [vmem:[%s7083_s14 + $0x8] sm:$0xff]  ;;  %v390_v23 = vmax.f32 %v302_v19, 0.0  ;;  %v303_v24 = vld [vmem:[%s7083_s14 + $0xc0] sm:$0xff]  ;;  %v367_v25 = vmax.f32 %v279_v20, 0.0 }
  0x13   : > { %v432_v2 = vld [vmem:[#allocation2] sm:$0xff]  ;;  %323 = vst.msk [vmem:[#allocation2 + $0x50] sm:$0xff] %vm311_vm1, %v10754_v1  ;;  %v304_v26 = vld [vmem:[%s7083_s14 + $0xc8] sm:$0xff]  ;;  %v368_v27 = vmax.f32 %v280_v22, 0.0  ;;  %v281_v28 = vld [vmem:[%s7083_s14 + $0x10] sm:$0xff]  ;;  %v391_v29 = vmax.f32 %v303_v24, 0.0 }
  0x14   : > { %v6970_v3 = vld [vmem:[#allocation2 + $0x8] sm:$0xff]  ;;  %v532_v4 = vrot.slane %v432_v2, 1  ;;  %325 = vst.msk [vmem:[#allocation2 + $0x60] sm:$0xff] %vm311_vm1, %v10754_v1  ;;  %v976_v9 = vrot.slane %v432_v2, 2  ;;  %6241 = vmatmul.msk.f32.vlgmr.msra.gmra.mxu1 %vm311_vm1, %v432_v2  ;;  %v282_v30 = vld [vmem:[%s7083_s14 + $0x18] sm:$0xff]  ;;  %v392_v31 = vmax.f32 %v304_v26, 0.0 }
  0x15   : > { %v533_v5 = vrot.slane %v6970_v3, 1  ;;  %326 = vst.msk [vmem:[#allocation2 + $0x68] sm:$0xff] %vm311_vm1, %v10754_v1  ;;  %v977_v10 = vrot.slane %v6970_v3, 2  ;;  %v305_v32 = vld [vmem:[%s7083_s14 + $0xd0] sm:$0xff]  ;;  %v369_v33 = vmax.f32 %v281_v28, 0.0  ;;  %v306_v34 = vld [vmem:[%s7083_s14 + $0xd8] sm:$0xff] }
  0x16   : > { %328 = vst.msk [vmem:[#allocation2 + $0x78] sm:$0xff] %vm311_vm1, %v10754_v1  ;;  %v370_v35 = vmax.f32 %v282_v30, 0.0  ;;  %v393_v36 = vmax.f32 %v305_v32, 0.0  ;;  %v394_v37 = vmax.f32 %v306_v34, 0.0  ;;  %v283_v38 = vld [vmem:[%s7083_s14 + $0x20] sm:$0xff]  ;;  %v284_v39 = vld [vmem:[%s7083_s14 + $0x28] sm:$0xff] }
  0x17   : > { %v534_v6 = vsel %vm531_vm2, %v532_v4, %v533_v5  ;;  %329 = vst.msk [vmem:[#allocation2 + $0x80] sm:$0xff] %vm311_vm1, %v10754_v1  ;;  %v978_v11 = vsel %vm975_vm4, %v976_v9, %v977_v10  ;;  %v371_v41 = vmax.f32 %v283_v38, 0.0  ;;  %v372_v42 = vmax.f32 %v284_v39, 0.0  ;;  %v307_v58 = vld [vmem:[%s7083_s14 + $0xe0] sm:$0xff]  ;;  %v308_v60 = vld [vmem:[%s7083_s14 + $0xe8] sm:$0xff] }
  0x18   : > { %6208 = vmatmul.msk.f32.vlgmr.msra.gmra.mxu0 %vm311_vm1, %v534_v6  ;;  %331 = vst.msk [vmem:[#allocation2 + $0x90] sm:$0xff] %vm311_vm1, %v10754_v1  ;;  %6275 = vmatmul.msk.f32.vlgmr.msra.gmra.mxu2 %vm311_vm1, %v978_v11  ;;  %v395_v62 = vmax.f32 %v307_v58, 0.0  ;;  %v286_v11 = vld [vmem:[%s7083_s14 + $0x38] sm:$0xff] }
  0x19   : > { %332 = vst.msk [vmem:[#allocation2 + $0x98] sm:$0xff] %vm311_vm1, %v10754_v1 }
  0x1a   : > { %334 = vst.msk [vmem:[#allocation2 + $0xa8] sm:$0xff] %vm311_vm1, %v10754_v1 }
  0x1b   : > { %335 = vst.msk [vmem:[#allocation2 + $0xb0] sm:$0xff] %vm311_vm1, %v10754_v1 }
  0x1c   : > { %337 = vst.msk [vmem:[#allocation2 + $0xc0] sm:$0xff] %vm311_vm1, %v10754_v1  ;;  %6242 = vmatmul.msk.f32.gmra.mxu1 %vm311_vm1, %v6970_v3  ;;  %v396_v3 = vmax.f32 %v308_v60, 0.0 }
  0x1d   : > { %338 = vst.msk [vmem:[#allocation2 + $0xc8] sm:$0xff] %vm311_vm1, %v10754_v1 }
  0x1e   : > { %340 = vst.msk [vmem:[#allocation2 + $0xd8] sm:$0xff] %vm311_vm1, %v10754_v1 }
  0x1f   : > { %341 = vst.msk [vmem:[#allocation2 + $0xe0] sm:$0xff] %vm311_vm1, %v10754_v1 }
  0x20   : > { %343 = vst.msk [vmem:[#allocation2 + $0xf0] sm:$0xff] %vm311_vm1, %v10754_v1 }
  0x21   : > { %344 = vst.msk [vmem:[#allocation2 + $0xf8] sm:$0xff] %vm311_vm1, %v10754_v1 }
  0x22   : > { %346 = vst.msk [vmem:[#allocation2 + $0x108] sm:$0xff] %vm311_vm1, %v10754_v1 }
  0x23   : > { %347 = vst.msk [vmem:[#allocation2 + $0x110] sm:$0xff] %vm311_vm1, %v10754_v1 }
  0x24   : > { %349 = vst.msk [vmem:[#allocation2 + $0x120] sm:$0xff] %vm311_vm1, %v10754_v1 }
  0x25   : > { %350 = vst.msk [vmem:[#allocation2 + $0x128] sm:$0xff] %vm311_vm1, %v10754_v1 }
  0x26   : > { %352 = vst.msk [vmem:[#allocation2 + $0x138] sm:$0xff] %vm311_vm1, %v10754_v1 }
  0x27   : > { %353 = vst.msk [vmem:[#allocation2 + $0x140] sm:$0xff] %vm311_vm1, %v10754_v1 }
  0x28   : > { %355 = vst.msk [vmem:[#allocation2 + $0x150] sm:$0xff] %vm311_vm1, %v10754_v1 }
  0x29   : > { %356 = vst.msk [vmem:[#allocation2 + $0x158] sm:$0xff] %vm311_vm1, %v10754_v1 }
  0x2a   : > { %358 = vst.msk [vmem:[#allocation2 + $0x168] sm:$0xff] %vm311_vm1, %v10754_v1 }
  0x2b   : > { %359 = vst.msk [vmem:[#allocation2 + $0x170] sm:$0xff] %vm311_vm1, %v10754_v1 }
  0x2c   : > { %361 = vst.msk [vmem:[#allocation2 + $0x180] sm:$0xff] %vm311_vm1, %v10754_v1 }
  0x2d   : > { %362 = vst.msk [vmem:[#allocation2 + $0x188] sm:$0xff] %vm311_vm1, %v10754_v1 }
  0x2e   : > { %364 = vst.msk [vmem:[#allocation2 + $0x198] sm:$0xff] %vm311_vm1, %v10754_v1 }
  0x2f   : > { %365 = vst.msk [vmem:[#allocation2 + $0x1a0] sm:$0xff] %vm311_vm1, %v10754_v1 }
  0x30   : > { %315 = vst.msk [vmem:[#allocation2 + $0x10] sm:$0x3] %vm314_vm3, %v10754_v1 }
  0x31   : > { %318 = vst.msk [vmem:[#allocation2 + $0x28] sm:$0x3] %vm314_vm3, %v10754_v1 }
  0x32   : > { %321 = vst.msk [vmem:[#allocation2 + $0x40] sm:$0x3] %vm314_vm3, %v10754_v1 }
  0x33   : > { %324 = vst.msk [vmem:[#allocation2 + $0x58] sm:$0x3] %vm314_vm3, %v10754_v1 }
  0x34   : > { %327 = vst.msk [vmem:[#allocation2 + $0x70] sm:$0x3] %vm314_vm3, %v10754_v1 }
  0x35   : > { %330 = vst.msk [vmem:[#allocation2 + $0x88] sm:$0x3] %vm314_vm3, %v10754_v1 }
  0x36   : > { %333 = vst.msk [vmem:[#allocation2 + $0xa0] sm:$0x3] %vm314_vm3, %v10754_v1 }
  0x37   : > { %v434_v13 = vld [vmem:[#allocation2 + $0x10] sm:$0x3]  ;;  %336 = vst.msk [vmem:[#allocation2 + $0xb8] sm:$0x3] %vm314_vm3, %v10754_v1 }
  0x38   : > { %v535_v14 = vrot.slane %v434_v13, 1  ;;  %339 = vst.msk [vmem:[#allocation2 + $0xd0] sm:$0x3] %vm314_vm3, %v10754_v1  ;;  %v979_v15 = vrot.slane %v434_v13, 2 }
  0x39   : > { %342 = vst.msk [vmem:[#allocation2 + $0xe8] sm:$0x3] %vm314_vm3, %v10754_v1 }
  0x3a   : > { %v536_v16 = vsel %vm531_vm2, %v533_v5, %v535_v14  ;;  %345 = vst.msk [vmem:[#allocation2 + $0x100] sm:$0x3] %vm314_vm3, %v10754_v1  ;;  %v980_v17 = vsel %vm975_vm4, %v977_v10, %v979_v15  ;;  %v285_v10 = vld [vmem:[%s7083_s14 + $0x30] sm:$0xff]  ;;  %v374_v15 = vmax.f32 %v286_v11, 0.0  ;;  %v290_v11 = vld [vmem:[%s7083_s14 + $0x58] sm:$0xff] }
  0x3b   : > { %6209 = vmatmul.msk.f32.gmra.mxu0 %vm311_vm1, %v536_v16  ;;  %348 = vst.msk [vmem:[#allocation2 + $0x118] sm:$0x3] %vm314_vm3, %v10754_v1  ;;  %6276 = vmatmul.msk.f32.gmra.mxu2 %vm311_vm1, %v980_v17  ;;  %v373_v14 = vmax.f32 %v285_v10, 0.0  ;;  %v289_v10 = vld [vmem:[%s7083_s14 + $0x50] sm:$0xff] }
  0x3c   : > { %351 = vst.msk [vmem:[#allocation2 + $0x130] sm:$0x3] %vm314_vm3, %v10754_v1 }
  0x3d   : > { %354 = vst.msk [vmem:[#allocation2 + $0x148] sm:$0x3] %vm314_vm3, %v10754_v1 }
  0x3e   : > { %357 = vst.msk [vmem:[#allocation2 + $0x160] sm:$0x3] %vm314_vm3, %v10754_v1 }
  0x3f   : > { %360 = vst.msk [vmem:[#allocation2 + $0x178] sm:$0x3] %vm314_vm3, %v10754_v1 }
  0x40   : > { %363 = vst.msk [vmem:[#allocation2 + $0x190] sm:$0x3] %vm314_vm3, %v10754_v1 }
  0x41   : > { %366 = vst.msk [vmem:[#allocation2 + $0x1a8] sm:$0x3] %vm314_vm3, %v10754_v1 }
  0x42   : > { %422 = vst.msk [vmem:[#allocation2 + $0x121] sm:$0xff] %vm311_vm1, %v389_v21 }
  0x43   : > { %423 = vst.msk [vmem:[#allocation2 + $0x129] sm:$0xff] %vm311_vm1, %v390_v23 }
  0x44   : > { %400 = vst.msk [vmem:[#allocation2 + $0x19] sm:$0xff] %vm311_vm1, %v367_v25 }
  0x45   : > { %401 = vst.msk [vmem:[#allocation2 + $0x21] sm:$0xff] %vm311_vm1, %v368_v27 }
  0x46   : > { %424 = vst.msk [vmem:[#allocation2 + $0x139] sm:$0xff] %vm311_vm1, %v391_v29 }
  0x47   : > { %425 = vst.msk [vmem:[#allocation2 + $0x141] sm:$0xff] %vm311_vm1, %v392_v31 }
  0x48   : > { %402 = vst.msk [vmem:[#allocation2 + $0x31] sm:$0xff] %vm311_vm1, %v369_v33 }
  0x49   : > { %v7130_v40 = vld [vmem:[#allocation2 + $0x120] sm:$0xff]  ;;  %403 = vst.msk [vmem:[#allocation2 + $0x39] sm:$0xff] %vm311_vm1, %v370_v35 }
  0x4a   : > { %v7133_v43 = vld [vmem:[#allocation2 + $0x128] sm:$0xff]  ;;  %v592_v44 = vrot.slane %v7130_v40, 1  ;;  %426 = vst.msk [vmem:[#allocation2 + $0x151] sm:$0xff] %vm311_vm1, %v393_v36  ;;  %v7144_v49 = vld [vmem:[#allocation2 + $0x130] sm:$0x3]  ;;  %v287_v35 = vld [vmem:[%s7083_s14 + $0x40] sm:$0xff] }
  0x4b   : > { %v593_v45 = vrot.slane %v7133_v43, 1  ;;  %v7138_v46 = vld [vmem:[#allocation2 + $0x18] sm:$0xff]  ;;  %427 = vst.msk [vmem:[#allocation2 + $0x159] sm:$0xff] %vm311_vm1, %v394_v37  ;;  %v595_v56 = vrot.slane %v7144_v49, 1  ;;  %v288_v36 = vld [vmem:[%s7083_s14 + $0x48] sm:$0xff]  ;;  %v375_v39 = vmax.f32 %v287_v35, 0.0 }
  0x4c   : > { %v7141_v47 = vld [vmem:[#allocation2 + $0x20] sm:$0xff]  ;;  %v537_v48 = vrot.slane %v7138_v46, 1  ;;  %v981_v50 = vrot.slane %v7138_v46, 2  ;;  %6243 = vmatmul.msk.f32.gmra.mxu1 %vm311_vm1, %v7138_v46  ;;  %404 = vst.msk [vmem:[#allocation2 + $0x49] sm:$0xff] %vm311_vm1, %v371_v41  ;;  %v437_v53 = vld [vmem:[#allocation2 + $0x28] sm:$0x3] }
  0x4d   : > { %v594_v51 = vsel %vm531_vm2, %v592_v44, %v593_v45  ;;  %v7152_v52 = vrot.slane %v7141_v47, 1  ;;  %405 = vst.msk [vmem:[#allocation2 + $0x51] sm:$0xff] %vm311_vm1, %v372_v42  ;;  %v7157_v54 = vrot.slane %v7141_v47, 2  ;;  %v540_v59 = vrot.slane %v437_v53, 1  ;;  %v7177_v0 = vld [vmem:[#allocation2 + $0x138] sm:$0xff] }
  0x4e   : > { %6232 = vmatmul.msk.f32.vlgmr.msra.gmra.mxu3 %vm311_vm1, %v594_v51  ;;  %v984_v61 = vrot.slane %v437_v53, 2  ;;  %v596_v63 = vsel %vm531_vm2, %v593_v45, %v595_v56  ;;  %v7179_v2 = vld [vmem:[#allocation2 + $0x140] sm:$0xff]  ;;  %428 = vst.msk [vmem:[#allocation2 + $0x169] sm:$0xff] %vm311_vm1, %v395_v62  ;;  %v7210_v19 = vld [vmem:[#allocation2 + $0x148] sm:$0x3]  ;;  %v376_v41 = vmax.f32 %v288_v36, 0.0 }
  0x4f   : > { %v7161_v55 = vsel %vm531_vm2, %v537_v48, %v7152_v52  ;;  %6846 = vmatpush.msk.msra.mxu3 %vm676_vm0, %v7039_v8  ;;  %v7170_v57 = vsel %vm975_vm4, %v981_v50, %v7157_v54  ;;  %v541_v4 = vsel %vm531_vm2, %v7152_v52, %v540_v59  ;;  %v7187_v5 = vld [vmem:[#allocation2 + $0x30] sm:$0xff]  ;;  %429 = vst.msk [vmem:[#allocation2 + $0x171] sm:$0xff] %vm311_vm1, %v396_v3  ;;  %v597_v8 = vrot.slane %v7177_v0, 1 }
  0x50   : > { %6210 = vmatmul.msk.f32.gmra.mxu0 %vm311_vm1, %v7161_v55  ;;  %6277 = vmatmul.msk.f32.gmra.mxu2 %vm311_vm1, %v7170_v57  ;;  %v7189_v6 = vld [vmem:[#allocation2 + $0x38] sm:$0xff]  ;;  %v985_v7 = vsel %vm975_vm4, %v7157_v54, %v984_v61  ;;  %v598_v9 = vrot.slane %v7179_v2, 1  ;;  %v542_v12 = vrot.slane %v7187_v5, 1  ;;  %v986_v16 = vrot.slane %v7187_v5, 2  ;;  %406 = vst.msk [vmem:[#allocation2 + $0x61] sm:$0xff] %vm311_vm1, %v373_v14 }
  0x51   : > { %v7201_v13 = vrot.slane %v7189_v6, 1  ;;  %v7206_v17 = vrot.slane %v7189_v6, 2  ;;  %407 = vst.msk [vmem:[#allocation2 + $0x69] sm:$0xff] %vm311_vm1, %v374_v15  ;;  %v440_v21 = vld [vmem:[#allocation2 + $0x40] sm:$0x3]  ;;  %v600_v23 = vrot.slane %v7210_v19, 1 }
  0x52   : > { %v599_v18 = vsel %vm531_vm2, %v597_v8, %v598_v9  ;;  %v545_v24 = vrot.slane %v440_v21, 1  ;;  %v989_v25 = vrot.slane %v440_v21, 2  ;;  %v7230_v27 = vld [vmem:[#allocation2 + $0x150] sm:$0xff]  ;;  %v7232_v28 = vld [vmem:[#allocation2 + $0x158] sm:$0xff]  ;;  %408 = vst.msk [vmem:[#allocation2 + $0x79] sm:$0xff] %vm311_vm1, %v375_v39  ;;  %v377_v15 = vmax.f32 %v289_v10, 0.0 }
  0x53   : > { %v7217_v20 = vsel %vm531_vm2, %v542_v12, %v7201_v13  ;;  %v7222_v22 = vsel %vm975_vm4, %v986_v16, %v7206_v17  ;;  %v601_v26 = vsel %vm531_vm2, %v598_v9, %v600_v23  ;;  %v7239_v30 = vld [vmem:[#allocation2 + $0x48] sm:$0xff]  ;;  %v602_v33 = vrot.slane %v7230_v27, 1  ;;  %v7261_v48 = vld [vmem:[#allocation2 + $0x160] sm:$0x3]  ;;  %409 = vst.msk [vmem:[#allocation2 + $0x81] sm:$0xff] %vm311_vm1, %v376_v41 }
  0x54   : > { %6244 = vmatmul.msk.f32.gmra.mxu1 %vm311_vm1, %v7141_v47  ;;  %v546_v29 = vsel %vm531_vm2, %v7201_v13, %v545_v24  ;;  %v7241_v31 = vld [vmem:[#allocation2 + $0x50] sm:$0xff]  ;;  %v990_v32 = vsel %vm975_vm4, %v7206_v17, %v989_v25  ;;  %v603_v34 = vrot.slane %v7232_v28, 1  ;;  %v547_v37 = vrot.slane %v7239_v30, 1  ;;  %v443_v51 = vld [vmem:[#allocation2 + $0x58] sm:$0x3]  ;;  %410 = vst.msk [vmem:[#allocation2 + $0x91] sm:$0xff] %vm311_vm1, %v377_v15 }
  0x55   : > { %v7252_v38 = vrot.slane %v7241_v31, 1  ;;  %v991_v42 = vrot.slane %v7239_v30, 2  ;;  %v7257_v44 = vrot.slane %v7241_v31, 2  ;;  %v605_v56 = vrot.slane %v7261_v48, 1  ;;  %v7281_v61 = vld [vmem:[#allocation2 + $0x168] sm:$0xff] }
  0x56   : > { %6233 = vmatmul.msk.f32.gmra.mxu3 %vm311_vm1, %v596_v63  ;;  %v604_v45 = vsel %vm531_vm2, %v602_v33, %v603_v34  ;;  %v550_v58 = vrot.slane %v443_v51, 1  ;;  %v994_v59 = vrot.slane %v443_v51, 2  ;;  %v7283_v62 = vld [vmem:[#allocation2 + $0x170] sm:$0xff]  ;;  %v607_v8 = vrot.slane %v7281_v61, 1  ;;  %v7312_v24 = vld [vmem:[#allocation2 + $0x178] sm:$0x3] }
  0x57   : > { %v7268_v50 = vsel %vm531_vm2, %v547_v37, %v7252_v38  ;;  %v7273_v53 = vsel %vm975_vm4, %v991_v42, %v7257_v44  ;;  %v606_v60 = vsel %vm531_vm2, %v603_v34, %v605_v56  ;;  %v7290_v3 = vld [vmem:[#allocation2 + $0x60] sm:$0xff]  ;;  %v608_v9 = vrot.slane %v7283_v62, 1 }
  0x58   : > { %6211 = vmatmul.msk.f32.gmra.mxu0 %vm311_vm1, %v541_v4  ;;  %6278 = vmatmul.msk.f32.gmra.mxu2 %vm311_vm1, %v985_v7  ;;  %v551_v63 = vsel %vm531_vm2, %v7252_v38, %v550_v58  ;;  %v7292_v4 = vld [vmem:[#allocation2 + $0x68] sm:$0xff]  ;;  %v995_v7 = vsel %vm975_vm4, %v7257_v44, %v994_v59  ;;  %v552_v12 = vrot.slane %v7290_v3, 1  ;;  %v378_v16 = vmax.f32 %v290_v11, 0.0  ;;  %v291_v42 = vld [vmem:[%s7083_s14 + $0x60] sm:$0xff] }
  0x59   : > { %v7303_v14 = vrot.slane %v7292_v4, 1  ;;  %v7308_v21 = vrot.slane %v7292_v4, 2  ;;  %v609_v23 = vsel %vm531_vm2, %v607_v8, %v608_v9  ;;  %v7337_v37 = vld [vmem:[#allocation2 + $0x78] sm:$0xff]  ;;  %v379_v58 = vmax.f32 %v291_v42, 0.0 }
  0x5a   : > { %411 = vst.msk [vmem:[#allocation2 + $0x99] sm:$0xff] %vm311_vm1, %v378_v16  ;;  %v7339_v39 = vld [vmem:[#allocation2 + $0x80] sm:$0xff]  ;;  %v557_v51 = vrot.slane %v7337_v37, 1  ;;  %v449_v8 = vld [vmem:[#allocation2 + $0x88] sm:$0x3] }
  0x5b   : > { %v7319_v25 = vsel %vm531_vm2, %v552_v12, %v7303_v14  ;;  %v7348_v56 = vrot.slane %v7339_v39, 1  ;;  %412 = vst.msk [vmem:[#allocation2 + $0xa9] sm:$0xff] %vm311_vm1, %v379_v58  ;;  %v560_v10 = vrot.slane %v449_v8, 1  ;;  %v1004_v11 = vrot.slane %v449_v8, 2  ;;  %v7379_v15 = vld [vmem:[#allocation2 + $0x90] sm:$0xff] }
  0x5c   : > { %6245 = vmatmul.msk.f32.gmra.mxu1 %vm311_vm1, %v7187_v5 }
  0x5d   : > { %10878 = vst [vmem:[#allocation4_spill] sm:$0xff] %v7348_v56  ;;  %v561_v12 = vsel %vm531_vm2, %v7348_v56, %v560_v10 }
  0x5e   : > { %6234 = vmatmul.msk.f32.gmra.mxu3 %vm311_vm1, %v599_v18  ;;  %v996_v18 = vrot.slane %v7290_v3, 2 }
  0x60   : > { %6212 = vmatmul.msk.f32.gmra.mxu0 %vm311_vm1, %v7217_v20  ;;  %6279 = vmatmul.msk.f32.gmra.mxu2 %vm311_vm1, %v7222_v22 }
  0x61   : > { %v7381_v16 = vld [vmem:[#allocation2 + $0x98] sm:$0xff] }
  0x62   : > { %v7421_v8 = vld [vmem:[#allocation2 + $0xa8] sm:$0xff] }
  0x64   : > { %6246 = vmatmul.msk.f32.gmra.mxu1 %vm311_vm1, %v7189_v6 }
  0x66   : > { %6235 = vmatmul.msk.f32.gmra.mxu3 %vm311_vm1, %v601_v26  ;;  %v446_v26 = vld [vmem:[#allocation2 + $0x70] sm:$0x3] }
  0x67   : > { %v555_v33 = vrot.slane %v446_v26, 1  ;;  %v999_v34 = vrot.slane %v446_v26, 2  ;;  %v294_v26 = vld [vmem:[%s7083_s14 + $0x78] sm:$0xff] }
  0x68   : > { %6213 = vmatmul.msk.f32.gmra.mxu0 %vm311_vm1, %v546_v29  ;;  %6280 = vmatmul.msk.f32.gmra.mxu2 %vm311_vm1, %v990_v32  ;;  %v7324_v29 = vsel %vm975_vm4, %v996_v18, %v7308_v21  ;;  %v610_v32 = vrot.slane %v7312_v24, 1 }
  0x69   : > { %v556_v36 = vsel %vm531_vm2, %v7303_v14, %v555_v33  ;;  %v1000_v41 = vsel %vm975_vm4, %v7308_v21, %v999_v34  ;;  %v7390_v33 = vrot.slane %v7381_v16, 1 }
  0x6a   : > { %v611_v35 = vsel %vm531_vm2, %v608_v9, %v610_v32  ;;  %v562_v32 = vrot.slane %v7379_v15, 1 }
  0x6b   : > { %10879 = vst [vmem:[#allocation5_spill] sm:$0xff] %v7390_v33 }
  0x6c   : > { %6247 = vmatmul.msk.f32.gmra.mxu1 %vm311_vm1, %v7239_v30  ;;  %v7403_v42 = vsel %vm531_vm2, %v562_v32, %v7390_v33 }
  0x6d   : > { %10881 = vst [vmem:[#allocation7_spill] sm:$0xff] %v7403_v42 }
  0x6e   : > { %6236 = vmatmul.msk.f32.gmra.mxu3 %vm311_vm1, %v604_v45  ;;  %v292_v45 = vld [vmem:[%s7083_s14 + $0x68] sm:$0xff] }
  0x6f   : > { %v380_v59 = vmax.f32 %v292_v45, 0.0  ;;  %v452_v45 = vld [vmem:[#allocation2 + $0xa0] sm:$0x3] }
  0x70   : > { %6214 = vmatmul.msk.f32.gmra.mxu0 %vm311_vm1, %v7268_v50  ;;  %6281 = vmatmul.msk.f32.gmra.mxu2 %vm311_vm1, %v7273_v53  ;;  %v565_v58 = vrot.slane %v452_v45, 1 }
  0x71   : > { %413 = vst.msk [vmem:[#allocation2 + $0xb1] sm:$0xff] %vm311_vm1, %v380_v59  ;;  %v1009_v59 = vrot.slane %v452_v45, 2 }
  0x74   : > { %6248 = vmatmul.msk.f32.gmra.mxu1 %vm311_vm1, %v7241_v31 }
  0x76   : > { %6237 = vmatmul.msk.f32.gmra.mxu3 %vm311_vm1, %v606_v60  ;;  %v1001_v60 = vrot.slane %v7337_v37, 2 }
  0x78   : > { %6215 = vmatmul.msk.f32.gmra.mxu0 %vm311_vm1, %v551_v63  ;;  %6282 = vmatmul.msk.f32.gmra.mxu2 %vm311_vm1, %v995_v7  ;;  %v7353_v63 = vrot.slane %v7339_v39, 2  ;;  %v7361_v7 = vsel %vm531_vm2, %v557_v51, %v7348_v56  ;;  %v7423_v10 = vld [vmem:[#allocation2 + $0xb0] sm:$0xff] }
  0x79   : > { %10882 = vst [vmem:[#allocation8_spill] sm:$0xff] %v7423_v10 }
  0x7a   : > { %v7367_v9 = vsel %vm975_vm4, %v1001_v60, %v7353_v63  ;;  %v1005_v18 = vsel %vm975_vm4, %v7353_v63, %v1004_v11  ;;  %v566_v60 = vsel %vm531_vm2, %v7390_v33, %v565_v58  ;;  %v455_v58 = vld [vmem:[#allocation2 + $0xb8] sm:$0x3] }
  0x7c   : > { %6249 = vmatmul.msk.f32.gmra.mxu1 %vm311_vm1, %v7290_v3 }
  0x7e   : > { %6238 = vmatmul.msk.f32.gmra.mxu3 %vm311_vm1, %v609_v23  ;;  %v293_v23 = vld [vmem:[%s7083_s14 + $0x70] sm:$0xff] }
  0x7f   : > { %v381_v34 = vmax.f32 %v293_v23, 0.0  ;;  %v567_v23 = vrot.slane %v7421_v8, 1 }
  0x80   : > { %6216 = vmatmul.msk.f32.gmra.mxu0 %vm311_vm1, %v7319_v25  ;;  %6283 = vmatmul.msk.f32.gmra.mxu2 %vm311_vm1, %v7324_v29 }
  0x81   : > { %414 = vst.msk [vmem:[#allocation2 + $0xc1] sm:$0xff] %vm311_vm1, %v381_v34 }
  0x84   : > { %6250 = vmatmul.msk.f32.gmra.mxu1 %vm311_vm1, %v7292_v4 }
  0x86   : > { %6239 = vmatmul.msk.f32.gmra.mxu3 %vm311_vm1, %v611_v35  ;;  %v382_v35 = vmax.f32 %v294_v26, 0.0  ;;  %v7432_v26 = vrot.slane %v7423_v10, 1 }
  0x88   : > { %6217 = vmatmul.msk.f32.gmra.mxu0 %vm311_vm1, %v556_v36  ;;  %6284 = vmatmul.msk.f32.gmra.mxu2 %vm311_vm1, %v1000_v41  ;;  %v1006_v36 = vrot.slane %v7379_v15, 2  ;;  %v7395_v41 = vrot.slane %v7381_v16, 2  ;;  %415 = vst.msk [vmem:[#allocation2 + $0xc9] sm:$0xff] %vm311_vm1, %v382_v35  ;;  %v1011_v35 = vrot.slane %v7421_v8, 2  ;;  %v7445_v45 = vsel %vm531_vm2, %v567_v23, %v7432_v26 }
  0x89   : > { %10883 = vst [vmem:[#allocation9_spill] sm:$0xff] %v7432_v26 }
  0x8a   : > { %10880 = vst [vmem:[#allocation6_spill] sm:$0xff] %v7395_v41  ;;  %v7409_v51 = vsel %vm975_vm4, %v1006_v36, %v7395_v41  ;;  %v1010_v11 = vsel %vm975_vm4, %v7395_v41, %v1009_v59  ;;  %v7437_v36 = vrot.slane %v7423_v10, 2 }
  0x8b   : > { %10885 = vst [vmem:[#allocation11_spill] sm:$0xff] %v7445_v45 }
  0x8c   : > { %6251 = vmatmul.msk.f32.gmra.mxu1 %vm311_vm1, %v7337_v37  ;;  %10884 = vst [vmem:[#allocation10_spill] sm:$0xff] %v7437_v36  ;;  %v7451_v59 = vsel %vm975_vm4, %v1011_v35, %v7437_v36 }
  0x8d   : > { %10886 = vst [vmem:[#allocation12_spill] sm:$0xff] %v7451_v59 }
  0x8e   : > { %6265 = vmatmul.msk.f32.vlgmr.msrb.gmra.mxu3 %vm311_vm1, %v7130_v40 }
  0x90   : > { %6218 = vmatmul.msk.f32.gmra.mxu0 %vm311_vm1, %v7361_v7  ;;  %6285 = vmatmul.msk.f32.gmra.mxu2 %vm311_vm1, %v7367_v9 }
  0x91   : > { %v7465_v23 = vpop.f32.mrf.mxu1 }
  0x92   : > { %10887 = vst [vmem:[#allocation13_spill] sm:$0xff] %v7465_v23 }
  0x94   : > { %6252 = vmatmul.msk.f32.gmra.mxu1 %vm311_vm1, %v7339_v39 }
  0x95   : > { %v7478_v1 = vpop.f32.mrf.mxu0 }
  0x96   : > { %6266 = vmatmul.msk.f32.gmra.mxu3 %vm311_vm1, %v7133_v43  ;;  %10890 = vst [vmem:[#allocation16_spill] sm:$0xff] %v7478_v1 }
  0x98   : > { %6219 = vmatmul.msk.f32.gmra.mxu0 %vm311_vm1, %v561_v12  ;;  %6286 = vmatmul.msk.f32.gmra.mxu2 %vm311_vm1, %v1005_v18  ;;  %v295_v12 = vld [vmem:[%s7083_s14 + $0x80] sm:$0xff]  ;;  %v296_v18 = vld [vmem:[%s7083_s14 + $0x88] sm:$0xff] }
  0x99   : > { %v383_v32 = vmax.f32 %v295_v12, 0.0  ;;  %v384_v34 = vmax.f32 %v296_v18, 0.0  ;;  %v1014_v12 = vrot.slane %v455_v58, 2 }
  0x9b   : > { %416 = vst.msk [vmem:[#allocation2 + $0xd9] sm:$0xff] %vm311_vm1, %v383_v32  ;;  %v7469_v32 = vld [vmem:[#allocation2 + $0xc0] sm:$0xff]  ;;  %v1015_v35 = vsel %vm975_vm4, %v7437_v36, %v1014_v12  ;;  %v6375_v12 = vld [vmem:[%s10747_s1 + $0x14] sm:$0xf] }
  0x9c   : > { %6253 = vmatmul.msk.f32.gmra.mxu1 %vm311_vm1, %v7379_v15  ;;  %417 = vst.msk [vmem:[#allocation2 + $0xe1] sm:$0xff] %vm311_vm1, %v384_v34  ;;  %v7471_v34 = vld [vmem:[#allocation2 + $0xc8] sm:$0xff] }
  0x9d   : > { %10888 = vst [vmem:[#allocation14_spill] sm:$0xff] %v7469_v32  ;;  %v7482_v23 = vrot.slane %v7471_v34, 1  ;;  %v7493_v36 = vrot.slane %v7471_v34, 2  ;;  %6376 = vmatpush.msk.msrb.mxu1 %vm676_vm0, %v6375_v12 }
  0x9e   : > { %6267 = vmatmul.msk.f32.gmra.mxu3 %vm311_vm1, %v7177_v0  ;;  %10889 = vst [vmem:[#allocation15_spill] sm:$0xff] %v7471_v34 }
  0x9f   : > { %10891 = vst [vmem:[#allocation17_spill] sm:$0xff] %v7482_v23 }
  0xa0   : > { %6220 = vmatmul.msk.f32.gmra.mxu0 %vm311_vm1, %v7403_v42  ;;  %6287 = vmatmul.msk.f32.gmra.mxu2 %vm311_vm1, %v7409_v51  ;;  %10892 = vst [vmem:[#allocation18_spill] sm:$0xff] %v7493_v36 }
  0xa4   : > { %6254 = vmatmul.msk.f32.gmra.mxu1 %vm311_vm1, %v7381_v16 }
  0xa6   : > { %6268 = vmatmul.msk.f32.gmra.mxu3 %vm311_vm1, %v7179_v2 }
  0xa8   : > { %6221 = vmatmul.msk.f32.gmra.mxu0 %vm311_vm1, %v566_v60  ;;  %6288 = vmatmul.msk.f32.gmra.mxu2 %vm311_vm1, %v1010_v11  ;;  %v6307_v60 = vld [vmem:[%s10747_s1 + $0xc] sm:$0xf]  ;;  %v570_v11 = vrot.slane %v455_v58, 1  ;;  %v297_v58 = vld [vmem:[%s7083_s14 + $0x90] sm:$0xff] }
  0xa9   : > { %6308 = vmatpush.msk.msrb.mxu3 %vm676_vm0, %v6307_v60  ;;  %v298_v60 = vld [vmem:[%s7083_s14 + $0x98] sm:$0xff]  ;;  %v385_v1 = vmax.f32 %v297_v58, 0.0  ;;  %v7511_v58 = vpop.f32.mrf.mxu1 }
  0xaa   : > { %v571_v18 = vsel %vm531_vm2, %v7432_v26, %v570_v11  ;;  %v572_v11 = vrot.slane %v7469_v32, 1  ;;  %v6409_v26 = vld [vmem:[%s10747_s1 + $0x18] sm:$0xf]  ;;  %10895 = vst [vmem:[#allocation21_spill] sm:$0xff] %v7511_v58  ;;  %v7529_v58 = vld [vmem:[#allocation2 + $0xe0] sm:$0xff] }
  0xab   : > { %6410 = vmatpush.msk.msrb.mxu2 %vm676_vm0, %v6409_v26  ;;  %418 = vst.msk [vmem:[#allocation2 + $0xf1] sm:$0xff] %vm311_vm1, %v385_v1 }
  0xac   : > { %6255 = vmatmul.msk.f32.gmra.mxu1 %vm311_vm1, %v7421_v8 }
  0xae   : > { %6269 = vmatmul.msk.f32.gmra.mxu3 %vm311_vm1, %v7230_v27 }
  0xb0   : > { %6222 = vmatmul.msk.f32.gmra.mxu0 %vm311_vm1, %v7445_v45  ;;  %6289 = vmatmul.msk.f32.gmra.mxu2 %vm311_vm1, %v7451_v59  ;;  %v386_v45 = vmax.f32 %v298_v60, 0.0  ;;  %v458_v59 = vld [vmem:[#allocation2 + $0xd0] sm:$0x3]  ;;  %v7515_v60 = vpop.f32.mrf.mxu2 }
  0xb1   : > { %10896 = vst [vmem:[#allocation22_spill] sm:$0xff] %v7515_v60  ;;  %v575_v1 = vrot.slane %v458_v59, 1 }
  0xb2   : > { %419 = vst.msk [vmem:[#allocation2 + $0xf9] sm:$0xff] %vm311_vm1, %v386_v45  ;;  %v7578_v41 = vld [vmem:[#allocation2 + $0xf0] sm:$0xff] }
  0xb3   : > { %v576_v45 = vsel %vm531_vm2, %v7482_v23, %v575_v1  ;;  %10905 = vst [vmem:[#allocation31_spill] sm:$0xff] %v7578_v41 }
  0xb4   : > { %6256 = vmatmul.msk.f32.gmra.mxu1 %vm311_vm1, %v7423_v10 }
  0xb6   : > { %6270 = vmatmul.msk.f32.gmra.mxu3 %vm311_vm1, %v7232_v28 }
  0xb8   : > { %6223 = vmatmul.msk.f32.gmra.mxu0 %vm311_vm1, %v571_v18  ;;  %6290 = vmatmul.msk.f32.gmra.mxu2 %vm311_vm1, %v1015_v35  ;;  %v1016_v18 = vrot.slane %v7469_v32, 2  ;;  %v7501_v35 = vsel %vm531_vm2, %v572_v11, %v7482_v23  ;;  %v1019_v11 = vrot.slane %v458_v59, 2  ;;  %v7519_v12 = vpop.f32.mrf.mxu0  ;;  %v1036_v59 = vrot.slane %v7130_v40, 2 }
  0xb9   : > { %10893 = vst [vmem:[#allocation19_spill] sm:$0xff] %v7501_v35  ;;  %v7540_v23 = vrot.slane %v7529_v58, 1  ;;  %v7547_v40 = vrot.slane %v7529_v58, 2 }
  0xba   : > { %v7508_v26 = vsel %vm975_vm4, %v1016_v18, %v7493_v36  ;;  %10897 = vst [vmem:[#allocation23_spill] sm:$0xff] %v7519_v12  ;;  %v7527_v18 = vld [vmem:[#allocation2 + $0xd8] sm:$0xff]  ;;  %v1020_v60 = vsel %vm975_vm4, %v7493_v36, %v1019_v11  ;;  %v1037_v12 = vrot.slane %v7133_v43, 2 }
  0xbb   : > { %10894 = vst [vmem:[#allocation20_spill] sm:$0xff] %v7508_v26  ;;  %v577_v1 = vrot.slane %v7527_v18, 1  ;;  %v1021_v11 = vrot.slane %v7527_v18, 2 }
  0xbc   : > { %6257 = vmatmul.msk.f32.gmra.mxu1 %vm311_vm1, %v7469_v32  ;;  %10898 = vst [vmem:[#allocation24_spill] sm:$0xff] %v7527_v18 }
  0xbd   : > { %10899 = vst [vmem:[#allocation25_spill] sm:$0xff] %v7540_v23 }
  0xbe   : > { %6271 = vmatmul.msk.f32.gmra.mxu3 %vm311_vm1, %v7281_v61  ;;  %v7543_v10 = vpop.f32.mrf.mxu2  ;;  %10901 = vst [vmem:[#allocation27_spill] sm:$0xff] %v7547_v40 }
  0xbf   : > { %10900 = vst [vmem:[#allocation26_spill] sm:$0xff] %v7543_v10  ;;  %v461_v10 = vld [vmem:[#allocation2 + $0xe8] sm:$0x3] }
  0xc0   : > { %6224 = vmatmul.msk.f32.gmra.mxu0 %vm311_vm1, %v7501_v35  ;;  %6291 = vmatmul.msk.f32.gmra.mxu2 %vm311_vm1, %v7508_v26  ;;  %v299_v35 = vld [vmem:[%s7083_s14 + $0xa0] sm:$0xff]  ;;  %v300_v26 = vld [vmem:[%s7083_s14 + $0xa8] sm:$0xff] }
  0xc1   : > { %v387_v32 = vmax.f32 %v299_v35, 0.0  ;;  %v388_v43 = vmax.f32 %v300_v26, 0.0  ;;  %v7556_v35 = vsel %vm531_vm2, %v577_v1, %v7540_v23  ;;  %v7561_v26 = vsel %vm975_vm4, %v1021_v11, %v7547_v40 }
  0xc2   : > { %10902 = vst [vmem:[#allocation28_spill] sm:$0xff] %v7556_v35 }
  0xc3   : > { %420 = vst.msk [vmem:[#allocation2 + $0x109] sm:$0xff] %vm311_vm1, %v387_v32 }
  0xc4   : > { %6258 = vmatmul.msk.f32.gmra.mxu1 %vm311_vm1, %v7471_v34  ;;  %421 = vst.msk [vmem:[#allocation2 + $0x111] sm:$0xff] %vm311_vm1, %v388_v43  ;;  %v580_v43 = vrot.slane %v461_v10, 1 }
  0xc5   : > { %10903 = vst [vmem:[#allocation29_spill] sm:$0xff] %v7561_v26 }
  0xc6   : > { %6272 = vmatmul.msk.f32.gmra.mxu3 %vm311_vm1, %v7283_v62 }
  0xc8   : > { %6225 = vmatmul.msk.f32.gmra.mxu0 %vm311_vm1, %v576_v45  ;;  %6292 = vmatmul.msk.f32.gmra.mxu2 %vm311_vm1, %v1020_v60  ;;  %v1038_v45 = vsel %vm975_vm4, %v1036_v59, %v1037_v12  ;;  %v1039_v59 = vrot.slane %v7144_v49, 2  ;;  %v581_v49 = vsel %vm531_vm2, %v7540_v23, %v580_v43 }
  0xc9   : > { %v883_v34 = vpop.f32.mrf.mxu1 }
  0xcc   : > { %6259 = vmatmul.msk.f32.gmra.mxu1 %vm311_vm1, %v7527_v18  ;;  %v1024_v18 = vrot.slane %v461_v10, 2 }
  0xcd   : > { %v703_v60 = vpop.f32.mrf.mxu0 }
  0xce   : > { %6299 = vmatmul.msk.f32.vlgmr.msra.gmra.mxu3 %vm311_vm1, %v1038_v45  ;;  %v884_v1 = vadd.f32 %v883_v34, %v703_v60  ;;  %v1040_v45 = vsel %vm975_vm4, %v1037_v12, %v1039_v59  ;;  %v1025_v10 = vsel %vm975_vm4, %v7547_v40, %v1024_v18  ;;  %v1041_v34 = vrot.slane %v7177_v0, 2 }
  0xcf   : > { %v1042_v12 = vrot.slane %v7179_v2, 2 }
  0xd0   : > { %6226 = vmatmul.msk.f32.gmra.mxu0 %vm311_vm1, %v7556_v35  ;;  %6293 = vmatmul.msk.f32.gmra.mxu2 %vm311_vm1, %v7561_v26  ;;  %v7580_v26 = vld [vmem:[#allocation2 + $0xf8] sm:$0xff] }
  0xd1   : > { %v7566_v32 = vpop.f32.mrf.mxu3  ;;  %v886_v36 = vpop.f32.mrf.mxu1  ;;  %v7591_v59 = vrot.slane %v7580_v26, 1  ;;  %v7596_v18 = vrot.slane %v7580_v26, 2  ;;  %v1043_v0 = vsel %vm975_vm4, %v1041_v34, %v1042_v12 }
  0xd3   : > { %v1146_v33 = vpop.f32.mrf.mxu2  ;;  %10906 = vst [vmem:[#allocation32_spill] sm:$0xff] %v7591_v59 }
  0xd4   : > { %6260 = vmatmul.msk.f32.gmra.mxu1 %vm311_vm1, %v7529_v58  ;;  %v7575_v35 = vadd.f32 %v1146_v33, %v884_v1  ;;  %v582_v33 = vrot.slane %v7578_v41, 1  ;;  %10907 = vst [vmem:[#allocation33_spill] sm:$0xff] %v7596_v18 }
  0xd5   : > { %v706_v11 = vpop.f32.mrf.mxu0 }
  0xd6   : > { %10904 = vst [vmem:[#allocation30_spill] sm:$0xff] %v7575_v35  ;;  %6300 = vmatmul.msk.f32.gmra.mxu3 %vm311_vm1, %v1040_v45  ;;  %v887_v43 = vadd.f32 %v886_v36, %v706_v11  ;;  %v1026_v45 = vrot.slane %v7578_v41, 2  ;;  %v7603_v35 = vsel %vm531_vm2, %v582_v33, %v7591_v59  ;;  %v464_v36 = vld [vmem:[#allocation2 + $0x100] sm:$0x3] }
  0xd7   : > { %10908 = vst [vmem:[#allocation34_spill] sm:$0xff] %v7603_v35  ;;  %v585_v40 = vrot.slane %v464_v36, 1 }
  0xd8   : > { %6227 = vmatmul.msk.f32.gmra.mxu0 %vm311_vm1, %v581_v49  ;;  %6294 = vmatmul.msk.f32.gmra.mxu2 %vm311_vm1, %v1025_v10  ;;  %v7610_v11 = vsel %vm975_vm4, %v1026_v45, %v7596_v18  ;;  %v1044_v10 = vrot.slane %v7210_v19, 2 }
  0xd9   : > { %v7587_v60 = vpop.f32.mrf.mxu3  ;;  %v889_v1 = vpop.f32.mrf.mxu1  ;;  %10910 = vst [vmem:[#allocation36_spill] sm:$0xff] %v7610_v11  ;;  %v586_v19 = vsel %vm531_vm2, %v7591_v59, %v585_v40 }
  0xdb   : > { %v1149_v2 = vpop.f32.mrf.mxu2 }
  0xdc   : > { %6261 = vmatmul.msk.f32.gmra.mxu1 %vm311_vm1, %v7578_v41  ;;  %v7605_v23 = vadd.f32 %v1149_v2, %v887_v43  ;;  %v1029_v2 = vrot.slane %v464_v36, 2  ;;  %v7627_v41 = vld [vmem:[#allocation2 + $0x108] sm:$0xff] }
  0xdd   : > { %v709_v49 = vpop.f32.mrf.mxu0 }
  0xde   : > { %10909 = vst [vmem:[#allocation35_spill] sm:$0xff] %v7605_v23  ;;  %6301 = vmatmul.msk.f32.gmra.mxu3 %vm311_vm1, %v1043_v0  ;;  %v890_v33 = vadd.f32 %v889_v1, %v709_v49  ;;  %v1045_v0 = vsel %vm975_vm4, %v1042_v12, %v1044_v10  ;;  %v1030_v1 = vsel %vm975_vm4, %v7596_v18, %v1029_v2  ;;  %v1046_v12 = vrot.slane %v7230_v27, 2 }
  0xdf   : > { %v1047_v49 = vrot.slane %v7232_v28, 2 }
  0xe0   : > { %6228 = vmatmul.msk.f32.gmra.mxu0 %vm311_vm1, %v7603_v35  ;;  %6295 = vmatmul.msk.f32.gmra.mxu2 %vm311_vm1, %v7610_v11  ;;  %v7629_v11 = vld [vmem:[#allocation2 + $0x110] sm:$0xff] }
  0xe1   : > { %v7615_v34 = vpop.f32.mrf.mxu3  ;;  %v892_v43 = vpop.f32.mrf.mxu1  ;;  %v7640_v40 = vrot.slane %v7629_v11, 1  ;;  %v7645_v2 = vrot.slane %v7629_v11, 2  ;;  %v1048_v27 = vsel %vm975_vm4, %v1046_v12, %v1047_v49  ;;  %v1049_v12 = vrot.slane %v7261_v48, 2 }
  0xe3   : > { %v1152_v23 = vpop.f32.mrf.mxu2  ;;  %10912 = vst [vmem:[#allocation38_spill] sm:$0xff] %v7640_v40 }
  0xe4   : > { %6262 = vmatmul.msk.f32.gmra.mxu1 %vm311_vm1, %v7580_v26  ;;  %v7624_v35 = vadd.f32 %v1152_v23, %v890_v33  ;;  %v587_v23 = vrot.slane %v7627_v41, 1 }
  0xe5   : > { %v712_v45 = vpop.f32.mrf.mxu0 }
  0xe6   : > { %10911 = vst [vmem:[#allocation37_spill] sm:$0xff] %v7624_v35  ;;  %6302 = vmatmul.msk.f32.gmra.mxu3 %vm311_vm1, %v1045_v0  ;;  %v893_v10 = vadd.f32 %v892_v43, %v712_v45  ;;  %v1031_v0 = vrot.slane %v7627_v41, 2  ;;  %v7652_v35 = vsel %vm531_vm2, %v587_v23, %v7640_v40  ;;  %v467_v43 = vld [vmem:[#allocation2 + $0x118] sm:$0x3] }
  0xe7   : > { %10913 = vst [vmem:[#allocation39_spill] sm:$0xff] %v7652_v35 }
  0xe8   : > { %6229 = vmatmul.msk.f32.gmra.mxu0 %vm311_vm1, %v586_v19  ;;  %6296 = vmatmul.msk.f32.gmra.mxu2 %vm311_vm1, %v1030_v1  ;;  %v7659_v45 = vsel %vm975_vm4, %v1031_v0, %v7645_v2  ;;  %v6443_v1 = vld [vmem:[%s10747_s1 + $0x1c] sm:$0xf] }
  0xe9   : > { %v7636_v36 = vpop.f32.mrf.mxu3  ;;  %v895_v33 = vpop.f32.mrf.mxu1  ;;  %10915 = vst [vmem:[#allocation41_spill] sm:$0xff] %v7659_v45  ;;  %6444 = vmatpush.msk.msra.mxu3 %vm676_vm0, %v6443_v1 }
  0xeb   : > { %v1155_v28 = vpop.f32.mrf.mxu2 }
  0xec   : > { %6263 = vmatmul.msk.f32.gmra.mxu1 %vm311_vm1, %v7627_v41  ;;  %v7654_v59 = vadd.f32 %v1155_v28, %v893_v10  ;;  %v590_v10 = vrot.slane %v467_v43, 1  ;;  %v1034_v28 = vrot.slane %v467_v43, 2 }
  0xed   : > { %v715_v19 = vpop.f32.mrf.mxu0 }
  0xee   : > { %10914 = vst [vmem:[#allocation40_spill] sm:$0xff] %v7654_v59  ;;  %6303 = vmatmul.msk.f32.gmra.mxu3 %vm311_vm1, %v1048_v27  ;;  %v896_v27 = vadd.f32 %v895_v33, %v715_v19  ;;  %v1050_v59 = vsel %vm975_vm4, %v1047_v49, %v1049_v12  ;;  %v591_v1 = vsel %vm531_vm2, %v7640_v40, %v590_v10  ;;  %v6477_v33 = vld [vmem:[%s10747_s1 + $0x20] sm:$0xf]  ;;  %v1051_v49 = vrot.slane %v7281_v61, 2 }
  0xef   : > { %v1052_v19 = vrot.slane %v7283_v62, 2  ;;  %6478 = vmatpush.msk.msra.mxu0 %vm676_vm0, %v6477_v33 }
  0xf0   : > { %6230 = vmatmul.msk.f32.gmra.mxu0 %vm311_vm1, %v7652_v35  ;;  %6297 = vmatmul.msk.f32.gmra.mxu2 %vm311_vm1, %v7659_v45  ;;  %v1035_v45 = vsel %vm975_vm4, %v7645_v2, %v1034_v28 }
  0xf1   : > { %v7668_v23 = vpop.f32.mrf.mxu3  ;;  %v898_v0 = vpop.f32.mrf.mxu1  ;;  %v1053_v12 = vsel %vm975_vm4, %v1051_v49, %v1052_v19 }
  0xf3   : > { %v1158_v18 = vpop.f32.mrf.mxu2 }
  0xf4   : > { %6264 = vmatmul.msk.f32.gmra.mxu1 %vm311_vm1, %v7629_v11  ;;  %v7677_v35 = vadd.f32 %v1158_v18, %v896_v27  ;;  %v1270_v27 = vld [vmem:[#allocation2 + $0x28] sm:$0x3] }
  0xf5   : > { %v718_v48 = vpop.f32.mrf.mxu0  ;;  %v1877_v62 = vrot.slane %v1270_v27, 2 }
  0xf6   : > { %6304 = vmatmul.msk.f32.gmra.mxu3 %vm311_vm1, %v1050_v59  ;;  %v899_v59 = vadd.f32 %v898_v0, %v718_v48  ;;  %v1583_v0 = vrot.slane %v1270_v27, 1  ;;  %v1273_v27 = vld [vmem:[#allocation2 + $0x40] sm:$0x3] }
  0xf8   : > { %6231 = vmatmul.msk.f32.gmra.mxu0 %vm311_vm1, %v591_v1  ;;  %6298 = vmatmul.msk.f32.gmra.mxu2 %vm311_vm1, %v1035_v45  ;;  %v1054_v1 = vrot.slane %v7312_v24, 2 }
  0xf9   : > { %v7689_v43 = vpop.f32.mrf.mxu3  ;;  %v901_v18 = vpop.f32.mrf.mxu1 }
  0xfa   : > { %v1055_v49 = vsel %vm975_vm4, %v1052_v19, %v1054_v1 }
  0xfb   : > { %v1161_v10 = vpop.f32.mrf.mxu2 }
  0xfc   : > { %6377 = vmatmul.msk.f32.vlgmr.msrb.gmra.mxu1 %vm311_vm1, %v7170_v57  ;;  %v7695_v28 = vadd.f32 %v1161_v10, %v899_v59  ;;  %v1878_v57 = vsel %vm975_vm4, %v7157_v54, %v1877_v62  ;;  %v1882_v62 = vrot.slane %v1273_v27, 2 }
  0xfd   : > { %v721_v61 = vpop.f32.mrf.mxu0 }
  0xfe   : > { %6305 = vmatmul.msk.f32.gmra.mxu3 %vm311_vm1, %v1053_v12  ;;  %v902_v48 = vadd.f32 %v901_v18, %v721_v61 }
 0x100   : > { %6343 = vmatmul.msk.f32.vlgmr.msrb.gmra.mxu0 %vm311_vm1, %v7161_v55  ;;  %6411 = vmatmul.msk.f32.vlgmr.msrb.gmra.mxu2 %vm311_vm1, %v7187_v5  ;;  %v1584_v55 = vsel %vm531_vm2, %v7152_v52, %v1583_v0  ;;  %v1588_v0 = vrot.slane %v1273_v27, 1 }
 0x101   : > { %v7701_v45 = vpop.f32.mrf.mxu3  ;;  %v904_v33 = vpop.f32.mrf.mxu1 }
 0x103   : > { %v1164_v59 = vpop.f32.mrf.mxu2 }
 0x104   : > { %6378 = vmatmul.msk.f32.gmra.mxu1 %vm311_vm1, %v1878_v57  ;;  %v7711_v12 = vadd.f32 %v1164_v59, %v902_v48  ;;  %v1883_v57 = vsel %vm975_vm4, %v7206_v17, %v1882_v62 }
 0x105   : > { %v724_v24 = vpop.f32.mrf.mxu0 }
 0x106   : > { %6306 = vmatmul.msk.f32.gmra.mxu3 %vm311_vm1, %v1055_v49  ;;  %v905_v10 = vadd.f32 %v904_v33, %v724_v24  ;;  %v1589_v24 = vsel %vm531_vm2, %v7201_v13, %v1588_v0 }
 0x108   : > { %6344 = vmatmul.msk.f32.gmra.mxu0 %vm311_vm1, %v1584_v55  ;;  %6412 = vmatmul.msk.f32.gmra.mxu2 %vm311_vm1, %v7189_v6 }
 0x109   : > { %v7715_v18 = vpop.f32.mrf.mxu3  ;;  %v907_v54 = vpop.f32.mrf.mxu1 }
 0x10b   : > { %v1167_v19 = vpop.f32.mrf.mxu2 }
 0x10c   : > { %6379 = vmatmul.msk.f32.gmra.mxu1 %vm311_vm1, %v7222_v22  ;;  %v7721_v52 = vadd.f32 %v1167_v19, %v905_v10 }
 0x10d   : > { %v727_v61 = vpop.f32.mrf.mxu0 }
 0x10e   : > { %6309 = vmatmul.msk.f32.vlgmr.msrb.gmra.mxu3 %vm311_vm1, %v7138_v46  ;;  %v908_v48 = vadd.f32 %v907_v54, %v727_v61  ;;  %v1276_v61 = vld [vmem:[#allocation2 + $0x58] sm:$0x3] }
 0x110   : > { %6345 = vmatmul.msk.f32.gmra.mxu0 %vm311_vm1, %v7217_v20  ;;  %6413 = vmatmul.msk.f32.gmra.mxu2 %vm311_vm1, %v7239_v30 }
 0x111   : > { %v949_v1 = vpop.f32.mrf.mxu3  ;;  %v910_v33 = vpop.f32.mrf.mxu1 }
 0x112   : > { %v7732_v49 = vadd.f32 %v949_v1, %v7566_v32 }
 0x113   : > { %v1170_v59 = vpop.f32.mrf.mxu2 }
 0x114   : > { %6380 = vmatmul.msk.f32.gmra.mxu1 %vm311_vm1, %v1883_v57  ;;  %v7737_v55 = vadd.f32 %v1170_v59, %v908_v48  ;;  %v1593_v48 = vrot.slane %v1276_v61, 1 }
 0x115   : > { %v730_v46 = vpop.f32.mrf.mxu0 }
 0x116   : > { %6310 = vmatmul.msk.f32.gmra.mxu3 %vm311_vm1, %v7141_v47  ;;  %v911_v54 = vadd.f32 %v910_v33, %v730_v46  ;;  %v1887_v47 = vrot.slane %v1276_v61, 2 }
 0x118   : > { %6346 = vmatmul.msk.f32.gmra.mxu0 %vm311_vm1, %v1589_v24  ;;  %6414 = vmatmul.msk.f32.gmra.mxu2 %vm311_vm1, %v7241_v31  ;;  %v1888_v57 = vsel %vm975_vm4, %v7257_v44, %v1887_v47  ;;  %v1594_v24 = vsel %vm531_vm2, %v7252_v38, %v1593_v48 }
 0x119   : > { %v952_v10 = vpop.f32.mrf.mxu3  ;;  %v913_v32 = vpop.f32.mrf.mxu1 }
 0x11a   : > { %v7745_v19 = vadd.f32 %v952_v10, %v7587_v60 }
 0x11b   : > { %v1173_v27 = vpop.f32.mrf.mxu2 }
 0x11c   : > { %6381 = vmatmul.msk.f32.gmra.mxu1 %vm311_vm1, %v7273_v53  ;;  %v7749_v1 = vadd.f32 %v1173_v27, %v911_v54 }
 0x11d   : > { %v733_v62 = vpop.f32.mrf.mxu0 }
 0x11e   : > { %6311 = vmatmul.msk.f32.gmra.mxu3 %vm311_vm1, %v7187_v5  ;;  %v914_v33 = vadd.f32 %v913_v32, %v733_v62  ;;  %v1279_v62 = vld [vmem:[#allocation2 + $0x70] sm:$0x3] }
 0x120   : > { %6347 = vmatmul.msk.f32.gmra.mxu0 %vm311_vm1, %v7268_v50  ;;  %6415 = vmatmul.msk.f32.gmra.mxu2 %vm311_vm1, %v7290_v3 }
 0x121   : > { %v955_v0 = vpop.f32.mrf.mxu3  ;;  %v916_v60 = vpop.f32.mrf.mxu1 }
 0x122   : > { %v7760_v59 = vadd.f32 %v955_v0, %v7615_v34 }
 0x123   : > { %v1176_v46 = vpop.f32.mrf.mxu2 }
 0x124   : > { %6382 = vmatmul.msk.f32.gmra.mxu1 %vm311_vm1, %v1888_v57  ;;  %v7765_v10 = vadd.f32 %v1176_v46, %v914_v33  ;;  %v1598_v33 = vrot.slane %v1279_v62, 1 }
 0x125   : > { %v736_v5 = vpop.f32.mrf.mxu0 }
 0x126   : > { %6312 = vmatmul.msk.f32.gmra.mxu3 %vm311_vm1, %v7189_v6  ;;  %v917_v32 = vadd.f32 %v916_v60, %v736_v5  ;;  %v1892_v6 = vrot.slane %v1279_v62, 2 }
 0x128   : > { %6348 = vmatmul.msk.f32.gmra.mxu0 %vm311_vm1, %v1594_v24  ;;  %6416 = vmatmul.msk.f32.gmra.mxu2 %vm311_vm1, %v7292_v4  ;;  %v1893_v57 = vsel %vm975_vm4, %v7308_v21, %v1892_v6  ;;  %v1599_v24 = vsel %vm531_vm2, %v7303_v14, %v1598_v33 }
 0x129   : > { %v958_v54 = vpop.f32.mrf.mxu3  ;;  %v919_v34 = vpop.f32.mrf.mxu1 }
 0x12a   : > { %v7773_v27 = vadd.f32 %v958_v54, %v7636_v36 }
 0x12b   : > { %v1179_v61 = vpop.f32.mrf.mxu2 }
 0x12c   : > { %6383 = vmatmul.msk.f32.gmra.mxu1 %vm311_vm1, %v7324_v29  ;;  %v7777_v0 = vadd.f32 %v1179_v61, %v917_v32 }
 0x12d   : > { %v739_v47 = vpop.f32.mrf.mxu0 }
 0x12e   : > { %6313 = vmatmul.msk.f32.gmra.mxu3 %vm311_vm1, %v7239_v30  ;;  %v920_v60 = vadd.f32 %v919_v34, %v739_v47  ;;  %v1282_v47 = vld [vmem:[#allocation2 + $0x88] sm:$0x3] }
 0x130   : > { %6349 = vmatmul.msk.f32.gmra.mxu0 %vm311_vm1, %v7319_v25  ;;  %6417 = vmatmul.msk.f32.gmra.mxu2 %vm311_vm1, %v7337_v37 }
 0x131   : > { %v961_v48 = vpop.f32.mrf.mxu3  ;;  %v922_v36 = vpop.f32.mrf.mxu1 }
 0x132   : > { %v7788_v46 = vadd.f32 %v961_v48, %v7668_v23 }
 0x133   : > { %v1182_v5 = vpop.f32.mrf.mxu2 }
 0x134   : > { %6384 = vmatmul.msk.f32.gmra.mxu1 %vm311_vm1, %v1893_v57  ;;  %v7793_v54 = vadd.f32 %v1182_v5, %v920_v60  ;;  %v1603_v60 = vrot.slane %v1282_v47, 1 }
 0x135   : > { %v742_v30 = vpop.f32.mrf.mxu0 }
 0x136   : > { %6314 = vmatmul.msk.f32.gmra.mxu3 %vm311_vm1, %v7241_v31  ;;  %v923_v34 = vadd.f32 %v922_v36, %v742_v30  ;;  %v1897_v31 = vrot.slane %v1282_v47, 2 }
 0x138   : > { %6350 = vmatmul.msk.f32.gmra.mxu0 %vm311_vm1, %v1599_v24  ;;  %6418 = vmatmul.msk.f32.gmra.mxu2 %vm311_vm1, %v7339_v39  ;;  %v1898_v57 = vsel %vm975_vm4, %v7353_v63, %v1897_v31  ;;  %v1604_v24 = vsel %vm531_vm2, %v7348_v56, %v1603_v60 }
 0x139   : > { %v964_v32 = vpop.f32.mrf.mxu3  ;;  %v925_v23 = vpop.f32.mrf.mxu1 }
 0x13a   : > { %v7801_v61 = vadd.f32 %v964_v32, %v7689_v43 }
 0x13b   : > { %v1185_v62 = vpop.f32.mrf.mxu2 }
 0x13c   : > { %6385 = vmatmul.msk.f32.gmra.mxu1 %vm311_vm1, %v7367_v9  ;;  %v7805_v48 = vadd.f32 %v1185_v62, %v923_v34 }
 0x13d   : > { %v745_v6 = vpop.f32.mrf.mxu0 }
 0x13e   : > { %6315 = vmatmul.msk.f32.gmra.mxu3 %vm311_vm1, %v7290_v3  ;;  %v926_v36 = vadd.f32 %v925_v23, %v745_v6  ;;  %v1285_v6 = vld [vmem:[#allocation2 + $0xa0] sm:$0x3] }
 0x140   : > { %6351 = vmatmul.msk.f32.gmra.mxu0 %vm311_vm1, %v7361_v7  ;;  %6419 = vmatmul.msk.f32.gmra.mxu2 %vm311_vm1, %v7379_v15 }
 0x141   : > { %v967_v33 = vpop.f32.mrf.mxu3  ;;  %v928_v43 = vpop.f32.mrf.mxu1 }
 0x142   : > { %v7816_v5 = vadd.f32 %v967_v33, %v7701_v45 }
 0x143   : > { %v1188_v30 = vpop.f32.mrf.mxu2 }
 0x144   : > { %6386 = vmatmul.msk.f32.gmra.mxu1 %vm311_vm1, %v1898_v57  ;;  %v7821_v32 = vadd.f32 %v1188_v30, %v926_v36  ;;  %v1608_v36 = vrot.slane %v1285_v6, 1  ;;  %v10916_v57 = vld [vmem:[#allocation6_spill] sm:$0xff] }
 0x145   : > { %v748_v3 = vpop.f32.mrf.mxu0 }
 0x146   : > { %6316 = vmatmul.msk.f32.gmra.mxu3 %vm311_vm1, %v7292_v4  ;;  %v929_v23 = vadd.f32 %v928_v43, %v748_v3  ;;  %v1902_v4 = vrot.slane %v1285_v6, 2 }
 0x148   : > { %6352 = vmatmul.msk.f32.gmra.mxu0 %vm311_vm1, %v1604_v24  ;;  %6420 = vmatmul.msk.f32.gmra.mxu2 %vm311_vm1, %v7381_v16  ;;  %v1903_v30 = vsel %vm975_vm4, %v10916_v57, %v1902_v4 }
 0x149   : > { %v970_v34 = vpop.f32.mrf.mxu3  ;;  %v931_v45 = vpop.f32.mrf.mxu1 }
 0x14a   : > { %v7829_v62 = vadd.f32 %v970_v34, %v7715_v18  ;;  %v10918_v34 = vld [vmem:[#allocation5_spill] sm:$0xff] }
 0x14b   : > { %v1191_v47 = vpop.f32.mrf.mxu2 }
 0x14c   : > { %6387 = vmatmul.msk.f32.gmra.mxu1 %vm311_vm1, %v7409_v51  ;;  %v7833_v33 = vadd.f32 %v1191_v47, %v929_v23  ;;  %v1609_v23 = vsel %vm531_vm2, %v10918_v34, %v1608_v36 }
 0x14d   : > { %v751_v31 = vpop.f32.mrf.mxu0 }
 0x14e   : > { %6317 = vmatmul.msk.f32.gmra.mxu3 %vm311_vm1, %v7337_v37  ;;  %v932_v43 = vadd.f32 %v931_v45, %v751_v31  ;;  %v10919_v31 = vld [vmem:[#allocation8_spill] sm:$0xff] }
 0x150   : > { %6353 = vmatmul.msk.f32.gmra.mxu0 %vm311_vm1, %v7403_v42  ;;  %6421 = vmatmul.msk.f32.gmra.mxu2 %vm311_vm1, %v7421_v8 }
 0x151   : > { %v1212_v60 = vpop.f32.mrf.mxu3  ;;  %v934_v18 = vpop.f32.mrf.mxu1 }
 0x152   : > { %v7844_v3 = vadd.f32 %v1212_v60, %v7732_v49 }
 0x153   : > { %v1194_v24 = vpop.f32.mrf.mxu2 }
 0x154   : > { %10917 = vst [vmem:[#allocation42_spill] sm:$0xff] %v7844_v3  ;;  %6388 = vmatmul.msk.f32.gmra.mxu1 %vm311_vm1, %v1903_v30  ;;  %v7849_v47 = vadd.f32 %v1194_v24, %v932_v43  ;;  %v1288_v30 = vld [vmem:[#allocation2 + $0xb8] sm:$0x3]  ;;  %v10921_v3 = vld [vmem:[#allocation12_spill] sm:$0xff] }
 0x155   : > { %v754_v37 = vpop.f32.mrf.mxu0 }
 0x156   : > { %6318 = vmatmul.msk.f32.gmra.mxu3 %vm311_vm1, %v7339_v39  ;;  %v935_v6 = vadd.f32 %v934_v18, %v754_v37  ;;  %v1907_v39 = vrot.slane %v1288_v30, 2  ;;  %v10922_v18 = vld [vmem:[#allocation11_spill] sm:$0xff]  ;;  %v1613_v37 = vrot.slane %v1288_v30, 1 }
 0x158   : > { %6354 = vmatmul.msk.f32.gmra.mxu0 %vm311_vm1, %v1609_v23  ;;  %6422 = vmatmul.msk.f32.gmra.mxu2 %vm311_vm1, %v10919_v31 }
 0x159   : > { %v1215_v45 = vpop.f32.mrf.mxu3  ;;  %v937_v49 = vpop.f32.mrf.mxu1 }
 0x15a   : > { %v7857_v4 = vadd.f32 %v1215_v45, %v7745_v19  ;;  %v10923_v19 = vld [vmem:[#allocation14_spill] sm:$0xff] }
 0x15b   : > { %v1197_v60 = vpop.f32.mrf.mxu2  ;;  %v10924_v45 = vld [vmem:[#allocation10_spill] sm:$0xff] }
 0x15c   : > { %10920 = vst [vmem:[#allocation8_spill] sm:$0xff] %v7857_v4  ;;  %6389 = vmatmul.msk.f32.gmra.mxu1 %vm311_vm1, %v10921_v3  ;;  %v7861_v43 = vadd.f32 %v1197_v60, %v935_v6  ;;  %v1908_v4 = vsel %vm975_vm4, %v10924_v45, %v1907_v39  ;;  %v10926_v3 = vld [vmem:[#allocation9_spill] sm:$0xff]  ;;  %v1291_v39 = vld [vmem:[#allocation2 + $0xd0] sm:$0x3] }
 0x15d   : > { %v757_v36 = vpop.f32.mrf.mxu0  ;;  %v10952_v45 = vld [vmem:[#allocation21_spill] sm:$0xff] }
 0x15e   : > { %6319 = vmatmul.msk.f32.gmra.mxu3 %vm311_vm1, %v7379_v15  ;;  %v938_v23 = vadd.f32 %v937_v49, %v757_v36  ;;  %v10927_v36 = vld [vmem:[#allocation15_spill] sm:$0xff] }
 0x160   : > { %6355 = vmatmul.msk.f32.gmra.mxu0 %vm311_vm1, %v10922_v18  ;;  %6423 = vmatmul.msk.f32.gmra.mxu2 %vm311_vm1, %v10923_v19  ;;  %v1614_v18 = vsel %vm531_vm2, %v10926_v3, %v1613_v37 }
 0x161   : > { %v1218_v24 = vpop.f32.mrf.mxu3  ;;  %v940_v6 = vpop.f32.mrf.mxu1 }
 0x162   : > { %v7872_v34 = vadd.f32 %v1218_v24, %v7760_v59 }
 0x163   : > { %v1200_v60 = vpop.f32.mrf.mxu2 }
 0x164   : > { %10925 = vst [vmem:[#allocation14_spill] sm:$0xff] %v7872_v34  ;;  %6390 = vmatmul.msk.f32.gmra.mxu1 %vm311_vm1, %v1908_v4  ;;  %v7877_v42 = vadd.f32 %v1200_v60, %v938_v23  ;;  %v10929_v34 = vld [vmem:[#allocation20_spill] sm:$0xff]  ;;  %v1618_v60 = vrot.slane %v1291_v39, 1 }
 0x165   : > { %v760_v15 = vpop.f32.mrf.mxu0 }
 0x166   : > { %6320 = vmatmul.msk.f32.gmra.mxu3 %vm311_vm1, %v7381_v16  ;;  %v941_v30 = vadd.f32 %v940_v6, %v760_v15  ;;  %v1912_v16 = vrot.slane %v1291_v39, 2  ;;  %v10931_v15 = vld [vmem:[#allocation24_spill] sm:$0xff] }
 0x168   : > { %6356 = vmatmul.msk.f32.gmra.mxu0 %vm311_vm1, %v1614_v18  ;;  %6424 = vmatmul.msk.f32.gmra.mxu2 %vm311_vm1, %v10927_v36  ;;  %v10930_v18 = vld [vmem:[#allocation19_spill] sm:$0xff] }
 0x169   : > { %v1221_v49 = vpop.f32.mrf.mxu3  ;;  %v943_v24 = vpop.f32.mrf.mxu1 }
 0x16a   : > { %v7885_v59 = vadd.f32 %v1221_v49, %v7773_v27  ;;  %v10932_v49 = vld [vmem:[#allocation18_spill] sm:$0xff] }
 0x16b   : > { %v1203_v4 = vpop.f32.mrf.mxu2 }
 0x16c   : > { %10928 = vst [vmem:[#allocation15_spill] sm:$0xff] %v7885_v59  ;;  %6391 = vmatmul.msk.f32.gmra.mxu1 %vm311_vm1, %v10929_v34  ;;  %v7889_v23 = vadd.f32 %v1203_v4, %v941_v30  ;;  %v1913_v59 = vsel %vm975_vm4, %v10932_v49, %v1912_v16  ;;  %v10951_v49 = vld [vmem:[#allocation23_spill] sm:$0xff] }
 0x16d   : > { %v763_v37 = vpop.f32.mrf.mxu0 }
 0x16e   : > { %6321 = vmatmul.msk.f32.gmra.mxu3 %vm311_vm1, %v7421_v8  ;;  %v944_v27 = vadd.f32 %v943_v24, %v763_v37  ;;  %v10934_v8 = vld [vmem:[#allocation17_spill] sm:$0xff] }
 0x16f   : > { %v1619_v34 = vsel %vm531_vm2, %v10934_v8, %v1618_v60  ;;  %v10937_v60 = vld [vmem:[#allocation29_spill] sm:$0xff] }
 0x170   : > { %6357 = vmatmul.msk.f32.gmra.mxu0 %vm311_vm1, %v10930_v18  ;;  %6425 = vmatmul.msk.f32.gmra.mxu2 %vm311_vm1, %v10931_v15 }
 0x171   : > { %v1224_v6 = vpop.f32.mrf.mxu3  ;;  %v946_v39 = vpop.f32.mrf.mxu1 }
 0x172   : > { %v7900_v3 = vadd.f32 %v1224_v6, %v7788_v46  ;;  %v1294_v6 = vld [vmem:[#allocation2 + $0xe8] sm:$0x3] }
 0x173   : > { %v1206_v30 = vpop.f32.mrf.mxu2 }
 0x174   : > { %10933 = vst [vmem:[#allocation24_spill] sm:$0xff] %v7900_v3  ;;  %6392 = vmatmul.msk.f32.gmra.mxu1 %vm311_vm1, %v1913_v59  ;;  %v7905_v18 = vadd.f32 %v1206_v30, %v944_v27  ;;  %v3270_v59 = vld [vmem:[%s10749_s3] sm:$0xff]  ;;  %v1917_v27 = vrot.slane %v1294_v6, 2 }
 0x175   : > { %v766_v4 = vpop.f32.mrf.mxu0  ;;  %3657 = vmatpush.msra.mxu2 %v3270_v59  ;;  %v10939_v30 = vld [vmem:[#allocation28_spill] sm:$0xff]  ;;  %v10941_v59 = vld [vmem:[#allocation27_spill] sm:$0xff] }
 0x176   : > { %10935 = vst [vmem:[#allocation43_spill] sm:$0xff] %v7905_v18  ;;  %6322 = vmatmul.msk.f32.gmra.mxu3 %vm311_vm1, %v10919_v31  ;;  %v947_v37 = vadd.f32 %v946_v39, %v766_v4  ;;  %v1623_v39 = vrot.slane %v1294_v6, 1 }
 0x178   : > { %6358 = vmatmul.msk.f32.gmra.mxu0 %vm311_vm1, %v1619_v34  ;;  %6426 = vmatmul.msk.f32.gmra.mxu2 %vm311_vm1, %v7529_v58 }
 0x179   : > { %v1227_v24 = vpop.f32.mrf.mxu3  ;;  %v2038_v8 = vpop.f32.mrf.mxu1 }
 0x17a   : > { %v7913_v46 = vadd.f32 %v1227_v24, %v7801_v61  ;;  %v6511_v61 = vld [vmem:[%s10749_s3 + $0x8] sm:$0xff]  ;;  %v10940_v24 = vld [vmem:[#allocation31_spill] sm:$0xff] }
 0x17b   : > { %v1209_v16 = vpop.f32.mrf.mxu2  ;;  %3480 = vmatpush.msra.mxu1 %v6511_v61 }
 0x17c   : > { %10936 = vst [vmem:[#allocation44_spill] sm:$0xff] %v7913_v46  ;;  %6393 = vmatmul.msk.f32.gmra.mxu1 %vm311_vm1, %v10937_v60  ;;  %v7920_v34 = vadd.f32 %v1209_v16, %v947_v37  ;;  %v1918_v37 = vsel %vm975_vm4, %v10941_v59, %v1917_v27  ;;  %v10943_v46 = vld [vmem:[#allocation25_spill] sm:$0xff]  ;;  %v10945_v27 = vld [vmem:[#allocation16_spill] sm:$0xff]  ;;  %v10949_v60 = vld [vmem:[#allocation34_spill] sm:$0xff] }
 0x17d   : > { %v1744_v31 = vpop.f32.mrf.mxu0  ;;  %v1624_v61 = vsel %vm531_vm2, %v10943_v46, %v1623_v39  ;;  %v10947_v59 = vld [vmem:[#allocation36_spill] sm:$0xff] }
 0x17e   : > { %10938 = vst [vmem:[#allocation45_spill] sm:$0xff] %v7920_v34  ;;  %6323 = vmatmul.msk.f32.gmra.mxu3 %vm311_vm1, %v10923_v19  ;;  %v881_v34 = vadd.f32 %v10952_v45, %v10951_v49 }
 0x180   : > { %6359 = vmatmul.msk.f32.gmra.mxu0 %vm311_vm1, %v10939_v30  ;;  %6427 = vmatmul.msk.f32.gmra.mxu2 %vm311_vm1, %v10940_v24 }
 0x181   : > { %v1230_v4 = vpop.f32.mrf.mxu3 }
 0x182   : > { %v7934_v16 = vadd.f32 %v1230_v4, %v7816_v5  ;;  %v10946_v4 = vld [vmem:[#allocation13_spill] sm:$0xff] }
 0x183   : > { %v2333_v6 = vpop.f32.mrf.mxu2 }
 0x184   : > { %10942 = vst [vmem:[#allocation31_spill] sm:$0xff] %v7934_v16  ;;  %6394 = vmatmul.msk.f32.gmra.mxu1 %vm311_vm1, %v1918_v37  ;;  %v878_v37 = vadd.f32 %v10946_v4, %v10945_v27  ;;  %v1297_v16 = vld [vmem:[#allocation2 + $0x100] sm:$0x3]  ;;  %v10950_v27 = vld [vmem:[#allocation33_spill] sm:$0xff] }
 0x185   : > { %v1747_v19 = vpop.f32.mrf.mxu0  ;;  %v1922_v46 = vrot.slane %v1297_v16, 2 }
 0x186   : > { %6324 = vmatmul.msk.f32.gmra.mxu3 %vm311_vm1, %v10927_v36  ;;  %v2041_v36 = vpop.f32.mrf.mxu1 }
 0x187   : > { %v1923_v4 = vsel %vm975_vm4, %v10950_v27, %v1922_v46 }
 0x188   : > { %6360 = vmatmul.msk.f32.gmra.mxu0 %vm311_vm1, %v1624_v61  ;;  %6428 = vmatmul.msk.f32.gmra.mxu2 %vm311_vm1, %v7580_v26  ;;  %v10948_v61 = vld [vmem:[#allocation22_spill] sm:$0xff] }
 0x189   : > { %v1233_v30 = vpop.f32.mrf.mxu3  ;;  %v1236_v3 = vadd.f32 %v10948_v61, %v878_v37  ;;  %v10953_v61 = vld [vmem:[#allocation32_spill] sm:$0xff] }
 0x18a   : > { %v7945_v5 = vadd.f32 %v1233_v30, %v7829_v62  ;;  %v1628_v30 = vrot.slane %v1297_v16, 1  ;;  %v10954_v16 = vld [vmem:[#allocation26_spill] sm:$0xff] }
 0x18b   : > { %v1237_v56 = vadd.f32 %v10954_v16, %v881_v34  ;;  %v10956_v34 = vld [vmem:[#allocation39_spill] sm:$0xff] }
 0x18c   : > { %10944 = vst [vmem:[#allocation46_spill] sm:$0xff] %v7945_v5  ;;  %6395 = vmatmul.msk.f32.gmra.mxu1 %vm311_vm1, %v10947_v59  ;;  %v2336_v5 = vpop.f32.mrf.mxu2 }
 0x18d   : > { %v1750_v39 = vpop.f32.mrf.mxu0 }
 0x18e   : > { %6325 = vmatmul.msk.f32.gmra.mxu3 %vm311_vm1, %v10931_v15  ;;  %v2044_v46 = vpop.f32.mrf.mxu1 }
 0x190   : > { %6361 = vmatmul.msk.f32.gmra.mxu0 %vm311_vm1, %v10949_v60  ;;  %6429 = vmatmul.msk.f32.gmra.mxu2 %vm311_vm1, %v7627_v41  ;;  %v1629_v60 = vsel %vm531_vm2, %v10953_v61, %v1628_v30 }
 0x191   : > { %v1434_v62 = vpop.f32.mrf.mxu3 }
 0x192   : > { %v1530_v59 = vadd.f32 %v1434_v62, %v1236_v3  ;;  %v10955_v62 = vld [vmem:[#allocation41_spill] sm:$0xff] }
 0x194   : > { %v1840_v15 = vadd.f32 %v1744_v31, %v1530_v59  ;;  %6396 = vmatmul.msk.f32.gmra.mxu1 %vm311_vm1, %v1923_v4  ;;  %v2339_v49 = vpop.f32.mrf.mxu2  ;;  %v1300_v59 = vld [vmem:[#allocation2 + $0x118] sm:$0x3]  ;;  %v10957_v4 = vld [vmem:[#allocation30_spill] sm:$0xff] }
 0x195   : > { %v1753_v37 = vpop.f32.mrf.mxu0 }
 0x196   : > { %v2134_v57 = vadd.f32 %v2038_v8, %v1840_v15  ;;  %6326 = vmatmul.msk.f32.gmra.mxu3 %vm311_vm1, %v7529_v58  ;;  %v1927_v58 = vrot.slane %v1300_v59, 2  ;;  %v2047_v15 = vpop.f32.mrf.mxu1 }
 0x198   : > { %v7968_v18 = vadd.f32 %v2333_v6, %v2134_v57  ;;  %6362 = vmatmul.msk.f32.gmra.mxu0 %vm311_vm1, %v1629_v60  ;;  %6430 = vmatmul.msk.f32.gmra.mxu2 %vm311_vm1, %v7629_v11  ;;  %v7977_v57 = vld [vmem:[#allocation2 + $0x120] sm:$0xff]  ;;  %v1633_v6 = vrot.slane %v1300_v59, 1 }
 0x199   : > { %v1437_v3 = vpop.f32.mrf.mxu3 }
 0x19a   : > { %v1531_v45 = vadd.f32 %v1437_v3, %v1237_v56  ;;  %v1634_v3 = vsel %vm531_vm2, %v7640_v40, %v1633_v6 }
 0x19c   : > { %v1841_v31 = vadd.f32 %v1747_v19, %v1531_v45  ;;  %6397 = vmatmul.msk.f32.gmra.mxu1 %vm311_vm1, %v10955_v62  ;;  %v1928_v19 = vsel %vm975_vm4, %v7645_v2, %v1927_v58  ;;  %v2342_v45 = vpop.f32.mrf.mxu2 }
 0x19d   : > { %v1756_v8 = vpop.f32.mrf.mxu0 }
 0x19e   : > { %v2135_v30 = vadd.f32 %v2041_v36, %v1841_v31  ;;  %6327 = vmatmul.msk.f32.gmra.mxu3 %vm311_vm1, %v10940_v24  ;;  %v7988_v24 = vld [vmem:[#allocation2 + $0x128] sm:$0xff]  ;;  %v2823_v31 = vrot.slane %v7977_v57, 2 }
 0x19f   : > { %v7995_v59 = vrot.slane %v7988_v24, 2 }
 0x1a0   : > { %v7979_v60 = vadd.f32 %v2336_v5, %v2135_v30  ;;  %6363 = vmatmul.msk.f32.gmra.mxu0 %vm311_vm1, %v10956_v34  ;;  %6431 = vmatmul.msk.f32.gmra.mxu2 %vm311_vm1, %v7977_v57 }
 0x1a1   : > { %v1440_v56 = vpop.f32.mrf.mxu3  ;;  %10958 = vst [vmem:[#allocation16_spill] sm:$0xff] %v7995_v59  ;;  %v8010_v6 = vsel %vm975_vm4, %v2823_v31, %v7995_v59  ;;  %v8021_v31 = vld [vmem:[#allocation2 + $0x138] sm:$0xff] }
 0x1a2   : > { %v1532_v36 = vadd.f32 %v1440_v56, %v10957_v4  ;;  %v2529_v56 = vrot.slane %v7977_v57, 1 }
 0x1a4   : > { %v1842_v16 = vadd.f32 %v1750_v39, %v1532_v36  ;;  %6398 = vmatmul.msk.f32.gmra.mxu1 %vm311_vm1, %v1928_v19  ;;  %v8004_v19 = vrot.slane %v7988_v24, 1 }
 0x1a5   : > { %v1759_v5 = vpop.f32.mrf.mxu0 }
 0x1a6   : > { %v2136_v30 = vadd.f32 %v2044_v46, %v1842_v16  ;;  %6328 = vmatmul.msk.f32.gmra.mxu3 %vm311_vm1, %v7580_v26  ;;  %10960 = vst [vmem:[#allocation22_spill] sm:$0xff] %v8004_v19  ;;  %v10961_v46 = vld [vmem:[#allocation35_spill] sm:$0xff]  ;;  %v2050_v16 = vpop.f32.mrf.mxu1 }
 0x1a8   : > { %v7999_v58 = vadd.f32 %v2339_v49, %v2136_v30  ;;  %6364 = vmatmul.msk.f32.gmra.mxu0 %vm311_vm1, %v1634_v3  ;;  %6432 = vmatmul.msk.f32.gmra.mxu2 %vm311_vm1, %v7988_v24  ;;  %v1303_v49 = vld [vmem:[#allocation2 + $0x130] sm:$0x3]  ;;  %v8017_v3 = vsel %vm531_vm2, %v2529_v56, %v8004_v19 }
 0x1a9   : > { %v1443_v39 = vpop.f32.mrf.mxu3  ;;  %10962 = vst [vmem:[#allocation33_spill] sm:$0xff] %v8017_v3  ;;  %v1932_v30 = vrot.slane %v1303_v49, 2 }
 0x1aa   : > { %10959 = vst [vmem:[#allocation13_spill] sm:$0xff] %v7999_v58  ;;  %v1533_v4 = vadd.f32 %v1443_v39, %v10961_v46  ;;  %v2345_v58 = vpop.f32.mrf.mxu2  ;;  %v1638_v46 = vrot.slane %v1303_v49, 1 }
 0x1ab   : > { %v1933_v56 = vsel %vm975_vm4, %v7995_v59, %v1932_v30  ;;  %v8065_v59 = vld [vmem:[#allocation2 + $0x150] sm:$0xff] }
 0x1ac   : > { %v1843_v26 = vadd.f32 %v1753_v37, %v1533_v4  ;;  %6399 = vmatmul.msk.f32.gmra.mxu1 %vm311_vm1, %v8010_v6 }
 0x1ad   : > { %v1762_v36 = vpop.f32.mrf.mxu0 }
 0x1ae   : > { %v2137_v40 = vadd.f32 %v2047_v15, %v1843_v26  ;;  %6329 = vmatmul.msk.f32.gmra.mxu3 %vm311_vm1, %v7627_v41  ;;  %v10964_v15 = vld [vmem:[#allocation37_spill] sm:$0xff]  ;;  %v8032_v41 = vld [vmem:[#allocation2 + $0x140] sm:$0xff]  ;;  %v2053_v30 = vpop.f32.mrf.mxu1 }
 0x1af   : > { %v8039_v49 = vrot.slane %v8032_v41, 2 }
 0x1b0   : > { %v8023_v39 = vadd.f32 %v2342_v45, %v2137_v40  ;;  %6365 = vmatmul.msk.f32.gmra.mxu0 %vm311_vm1, %v8017_v3  ;;  %6433 = vmatmul.msk.f32.gmra.mxu2 %vm311_vm1, %v8021_v31  ;;  %v1639_v45 = vsel %vm531_vm2, %v8004_v19, %v1638_v46  ;;  %v2828_v3 = vrot.slane %v8021_v31, 2  ;;  %v8048_v46 = vrot.slane %v8032_v41, 1 }
 0x1b1   : > { %v1446_v37 = vpop.f32.mrf.mxu3 }
 0x1b2   : > { %10963 = vst [vmem:[#allocation23_spill] sm:$0xff] %v8023_v39  ;;  %v1534_v4 = vadd.f32 %v1446_v37, %v10964_v15  ;;  %v2534_v15 = vrot.slane %v8021_v31, 1 }
 0x1b3   : > { %10966 = vst [vmem:[#allocation32_spill] sm:$0xff] %v8048_v46 }
 0x1b4   : > { %v1844_v26 = vadd.f32 %v1756_v8, %v1534_v4  ;;  %6400 = vmatmul.msk.f32.gmra.mxu1 %vm311_vm1, %v1933_v56  ;;  %v2348_v56 = vpop.f32.mrf.mxu2 }
 0x1b5   : > { %v1765_v40 = vpop.f32.mrf.mxu0 }
 0x1b6   : > { %v2138_v39 = vadd.f32 %v2050_v16, %v1844_v26  ;;  %6330 = vmatmul.msk.f32.gmra.mxu3 %vm311_vm1, %v7629_v11  ;;  %v8054_v16 = vsel %vm975_vm4, %v2828_v3, %v8039_v49  ;;  %v10967_v11 = vld [vmem:[#allocation40_spill] sm:$0xff] }
 0x1b8   : > { %v8043_v37 = vadd.f32 %v2345_v58, %v2138_v39  ;;  %6366 = vmatmul.msk.f32.gmra.mxu0 %vm311_vm1, %v1639_v45  ;;  %6434 = vmatmul.msk.f32.gmra.mxu2 %vm311_vm1, %v8032_v41  ;;  %v1306_v39 = vld [vmem:[#allocation2 + $0x148] sm:$0x3]  ;;  %v8061_v45 = vsel %vm531_vm2, %v2534_v15, %v8048_v46 }
 0x1b9   : > { %v1449_v8 = vpop.f32.mrf.mxu3  ;;  %10968 = vst [vmem:[#allocation26_spill] sm:$0xff] %v8061_v45  ;;  %v1937_v19 = vrot.slane %v1306_v39, 2 }
 0x1ba   : > { %10965 = vst [vmem:[#allocation21_spill] sm:$0xff] %v8043_v37  ;;  %v1535_v4 = vadd.f32 %v1449_v8, %v10967_v11  ;;  %v2056_v8 = vpop.f32.mrf.mxu1  ;;  %v1643_v11 = vrot.slane %v1306_v39, 1  ;;  %v2833_v39 = vrot.slane %v8065_v59, 2 }
 0x1bc   : > { %v1845_v58 = vadd.f32 %v1759_v5, %v1535_v4  ;;  %6401 = vmatmul.msk.f32.gmra.mxu1 %vm311_vm1, %v8054_v16  ;;  %v2351_v15 = vpop.f32.mrf.mxu2 }
 0x1bd   : > { %v1768_v26 = vpop.f32.mrf.mxu0 }
 0x1be   : > { %v2139_v37 = vadd.f32 %v2053_v30, %v1845_v58  ;;  %6331 = vmatmul.msk.f32.gmra.mxu3 %vm311_vm1, %v7977_v57  ;;  %v1938_v30 = vsel %vm975_vm4, %v8039_v49, %v1937_v19  ;;  %v1644_v58 = vsel %vm531_vm2, %v8048_v46, %v1643_v11  ;;  %v2539_v19 = vrot.slane %v8065_v59, 1 }
 0x1c0   : > { %v8067_v3 = vadd.f32 %v2348_v56, %v2139_v37  ;;  %6367 = vmatmul.msk.f32.gmra.mxu0 %vm311_vm1, %v8061_v45  ;;  %6435 = vmatmul.msk.f32.gmra.mxu2 %vm311_vm1, %v8065_v59  ;;  %v8076_v37 = vld [vmem:[#allocation2 + $0x158] sm:$0xff] }
 0x1c1   : > { %v1452_v5 = vpop.f32.mrf.mxu3  ;;  %v8083_v45 = vrot.slane %v8076_v37, 2  ;;  %v8094_v11 = vrot.slane %v8076_v37, 1 }
 0x1c2   : > { %10969 = vst [vmem:[#allocation41_spill] sm:$0xff] %v8067_v3  ;;  %v1536_v57 = vadd.f32 %v1452_v5, %v7677_v35  ;;  %v310_v5 = vld [vmem:[%s7083_s14 + $0xf8] sm:$0xff] }
 0x1c3   : > { %10971 = vst [vmem:[#allocation30_spill] sm:$0xff] %v8094_v11 }
 0x1c4   : > { %v1846_v4 = vadd.f32 %v1762_v36, %v1536_v57  ;;  %6402 = vmatmul.msk.f32.gmra.mxu1 %vm311_vm1, %v1938_v30  ;;  %v309_v36 = vld [vmem:[%s7083_s14 + $0xf0] sm:$0xff]  ;;  %v2354_v46 = vpop.f32.mrf.mxu2 }
 0x1c5   : > { %v1771_v56 = vpop.f32.mrf.mxu0 }
 0x1c6   : > { %v2140_v3 = vadd.f32 %v2056_v8, %v1846_v4  ;;  %6332 = vmatmul.msk.f32.gmra.mxu3 %vm311_vm1, %v7988_v24  ;;  %v8100_v8 = vsel %vm975_vm4, %v2833_v39, %v8083_v45  ;;  %v397_v24 = vmax.f32 %v309_v36, 0.0  ;;  %v8109_v39 = vsel %vm531_vm2, %v2539_v19, %v8094_v11 }
 0x1c8   : > { %v8087_v35 = vadd.f32 %v2351_v15, %v2140_v3  ;;  %6368 = vmatmul.msk.f32.gmra.mxu0 %vm311_vm1, %v1644_v58  ;;  %6436 = vmatmul.msk.f32.gmra.mxu2 %vm311_vm1, %v8076_v37  ;;  %v398_v3 = vmax.f32 %v310_v5, 0.0  ;;  %v2059_v15 = vpop.f32.mrf.mxu1  ;;  %430 = vst.msk [vmem:[#allocation2 + $0x181] sm:$0xff] %vm311_vm1, %v397_v24  ;;  %v1309_v58 = vld [vmem:[#allocation2 + $0x160] sm:$0x3] }
 0x1c9   : > { %v1455_v30 = vpop.f32.mrf.mxu3  ;;  %v1942_v36 = vrot.slane %v1309_v58, 2  ;;  %v1648_v24 = vrot.slane %v1309_v58, 1 }
 0x1ca   : > { %10970 = vst [vmem:[#allocation39_spill] sm:$0xff] %v8087_v35  ;;  %v1537_v57 = vadd.f32 %v1455_v30, %v7695_v28  ;;  %v2206_v28 = vld [vmem:[#allocation2 + $0x168] sm:$0xff] }
 0x1cb   : > { %431 = vst.msk [vmem:[#allocation2 + $0x189] sm:$0xff] %vm311_vm1, %v398_v3  ;;  %v1943_v3 = vsel %vm975_vm4, %v8083_v45, %v1942_v36  ;;  %v2544_v36 = vrot.slane %v2206_v28, 1 }
 0x1cc   : > { %v1847_v4 = vadd.f32 %v1765_v40, %v1537_v57  ;;  %6403 = vmatmul.msk.f32.gmra.mxu1 %vm311_vm1, %v8100_v8 }
 0x1cd   : > { %v1774_v35 = vpop.f32.mrf.mxu0 }
 0x1ce   : > { %v2141_v5 = vadd.f32 %v2059_v15, %v1847_v4  ;;  %6333 = vmatmul.msk.f32.gmra.mxu3 %vm311_vm1, %v8021_v31  ;;  %v1311_v15 = vld [vmem:[#allocation2 + $0x170] sm:$0xff]  ;;  %v2838_v4 = vrot.slane %v2206_v28, 2 }
 0x1d0   : > { %v8113_v30 = vadd.f32 %v2354_v46, %v2141_v5  ;;  %6369 = vmatmul.msk.f32.gmra.mxu0 %vm311_vm1, %v8109_v39  ;;  %6437 = vmatmul.msk.f32.gmra.mxu2 %vm311_vm1, %v2206_v28  ;;  %v1649_v46 = vsel %vm531_vm2, %v8094_v11, %v1648_v24  ;;  %v8126_v5 = vrot.slane %v1311_v15, 2  ;;  %v2209_v11 = vld [vmem:[#allocation2 + $0x180] sm:$0xff] }
 0x1d1   : > { %v1458_v40 = vpop.f32.mrf.mxu3 }
 0x1d2   : > { %v1538_v19 = vadd.f32 %v1458_v40, %v7711_v12  ;;  %v8131_v12 = vrot.slane %v1311_v15, 1 }
 0x1d4   : > { %v8121_v57 = vadd.f32 %v1768_v26, %v1538_v19  ;;  %6404 = vmatmul.msk.f32.gmra.mxu1 %vm311_vm1, %v1943_v3  ;;  %10972 = vst [vmem:[#allocation35_spill] sm:$0xff] %v8131_v12  ;;  %v8136_v26 = vsel %vm975_vm4, %v2838_v4, %v8126_v5  ;;  %v1312_v3 = vld [vmem:[#allocation2 + $0x178] sm:$0x3]  ;;  %v8145_v19 = vsel %vm531_vm2, %v2544_v36, %v8131_v12  ;;  %v1314_v36 = vld [vmem:[#allocation2 + $0x188] sm:$0xff] }
 0x1d5   : > { %v1777_v31 = vpop.f32.mrf.mxu0  ;;  %10973 = vst [vmem:[#allocation37_spill] sm:$0xff] %v8136_v26 }
 0x1d6   : > { %6334 = vmatmul.msk.f32.gmra.mxu3 %vm311_vm1, %v8032_v41  ;;  %10975 = vst [vmem:[#allocation47_spill] sm:$0xff] %v8145_v19 }
 0x1d8   : > { %6370 = vmatmul.msk.f32.gmra.mxu0 %vm311_vm1, %v1649_v46  ;;  %6438 = vmatmul.msk.f32.gmra.mxu2 %vm311_vm1, %v1311_v15  ;;  %v1947_v46 = vrot.slane %v1312_v3, 2 }
 0x1d9   : > { %v1461_v58 = vpop.f32.mrf.mxu3 }
 0x1da   : > { %v1539_v40 = vadd.f32 %v1461_v58, %v7721_v52  ;;  %v1948_v4 = vsel %vm975_vm4, %v8126_v5, %v1947_v46  ;;  %v2549_v46 = vrot.slane %v2209_v11, 1 }
 0x1dc   : > { %v8139_v24 = vadd.f32 %v1771_v56, %v1539_v40  ;;  %6405 = vmatmul.msk.f32.gmra.mxu1 %vm311_vm1, %v8136_v26  ;;  %v1653_v56 = vrot.slane %v1312_v3, 1  ;;  %v2843_v26 = vrot.slane %v2209_v11, 2 }
 0x1dd   : > { %v1780_v41 = vpop.f32.mrf.mxu0 }
 0x1de   : > { %10974 = vst [vmem:[#allocation40_spill] sm:$0xff] %v8139_v24  ;;  %6335 = vmatmul.msk.f32.gmra.mxu3 %vm311_vm1, %v8065_v59  ;;  %v1654_v59 = vsel %vm531_vm2, %v8131_v12, %v1653_v56  ;;  %v8182_v12 = vld [vmem:[#allocation2 + $0x198] sm:$0xff] }
 0x1e0   : > { %6371 = vmatmul.msk.f32.gmra.mxu0 %vm311_vm1, %v8145_v19  ;;  %6439 = vmatmul.msk.f32.gmra.mxu2 %vm311_vm1, %v2209_v11  ;;  %v8160_v19 = vrot.slane %v1314_v36, 2 }
 0x1e1   : > { %v1464_v52 = vpop.f32.mrf.mxu3 }
 0x1e2   : > { %v1540_v58 = vadd.f32 %v1464_v52, %v7737_v55  ;;  %v8165_v55 = vrot.slane %v1314_v36, 1 }
 0x1e4   : > { %v8155_v40 = vadd.f32 %v1774_v35, %v1540_v58  ;;  %6406 = vmatmul.msk.f32.gmra.mxu1 %vm311_vm1, %v1948_v4  ;;  %10976 = vst [vmem:[#allocation48_spill] sm:$0xff] %v8165_v55  ;;  %v8170_v35 = vsel %vm975_vm4, %v2843_v26, %v8160_v19  ;;  %v1315_v4 = vld [vmem:[#allocation2 + $0x190] sm:$0x3]  ;;  %v8179_v58 = vsel %vm531_vm2, %v2549_v46, %v8165_v55 }
 0x1e5   : > { %v1783_v24 = vpop.f32.mrf.mxu0  ;;  %10977 = vst [vmem:[#allocation49_spill] sm:$0xff] %v8179_v58 }
 0x1e6   : > { %6336 = vmatmul.msk.f32.gmra.mxu3 %vm311_vm1, %v8076_v37 }
 0x1e8   : > { %6372 = vmatmul.msk.f32.gmra.mxu0 %vm311_vm1, %v1654_v59  ;;  %6440 = vmatmul.msk.f32.gmra.mxu2 %vm311_vm1, %v1314_v36  ;;  %v1952_v59 = vrot.slane %v1315_v4, 2 }
 0x1e9   : > { %v1467_v3 = vpop.f32.mrf.mxu3 }
 0x1ea   : > { %v1541_v52 = vadd.f32 %v1467_v3, %v7749_v1  ;;  %v1953_v26 = vsel %vm975_vm4, %v8160_v19, %v1952_v59 }
 0x1ec   : > { %v8173_v56 = vadd.f32 %v1777_v31, %v1541_v52  ;;  %6407 = vmatmul.msk.f32.gmra.mxu1 %vm311_vm1, %v8170_v35  ;;  %v1658_v31 = vrot.slane %v1315_v4, 1 }
 0x1ed   : > { %v1786_v37 = vpop.f32.mrf.mxu0 }
 0x1ee   : > { %6337 = vmatmul.msk.f32.gmra.mxu3 %vm311_vm1, %v2206_v28  ;;  %v1659_v52 = vsel %vm531_vm2, %v8165_v55, %v1658_v31 }
 0x1f0   : > { %6373 = vmatmul.msk.f32.gmra.mxu0 %vm311_vm1, %v8179_v58  ;;  %6441 = vmatmul.msk.f32.gmra.mxu2 %vm311_vm1, %v8182_v12  ;;  %v8197_v58 = vld [vmem:[#allocation2 + $0x1a0] sm:$0xff] }
 0x1f1   : > { %v1470_v1 = vpop.f32.mrf.mxu3 }
 0x1f2   : > { %v1542_v3 = vadd.f32 %v1470_v1, %v7765_v10  ;;  %v2169_v1 = vld [vmem:[#allocation2 + $0x40] sm:$0x3] }
 0x1f3   : > { %v2776_v31 = vrot.slane %v2169_v1, 2 }
 0x1f4   : > { %v8191_v46 = vadd.f32 %v1780_v41, %v1542_v3  ;;  %6408 = vmatmul.msk.f32.gmra.mxu1 %vm311_vm1, %v1953_v26 }
 0x1f5   : > { %v1789_v28 = vpop.f32.mrf.mxu0  ;;  %v2777_v55 = vsel %vm975_vm4, %v7206_v17, %v2776_v31 }
 0x1f6   : > { %6338 = vmatmul.msk.f32.gmra.mxu3 %vm311_vm1, %v1311_v15 }
 0x1f8   : > { %6374 = vmatmul.msk.f32.gmra.mxu0 %vm311_vm1, %v1659_v52  ;;  %6442 = vmatmul.msk.f32.gmra.mxu2 %vm311_vm1, %v8197_v58 }
 0x1f9   : > { %v1473_v4 = vpop.f32.mrf.mxu3 }
 0x1fa   : > { %v1543_v10 = vadd.f32 %v1473_v4, %v7777_v0 }
 0x1fc   : > { %v8203_v41 = vadd.f32 %v1783_v24, %v1543_v10 }
 0x1fd   : > { %v1792_v59 = vpop.f32.mrf.mxu0 }
 0x1fe   : > { %6339 = vmatmul.msk.f32.gmra.mxu3 %vm311_vm1, %v2209_v11 }
 0x200   : > { %6479 = vmatmul.msk.f32.vlgmr.msra.gmra.mxu0 %vm311_vm1, %v7222_v22 }
 0x201   : > { %v1476_v15 = vpop.f32.mrf.mxu3 }
 0x202   : > { %v1544_v26 = vadd.f32 %v1476_v15, %v7793_v54  ;;  %v2172_v54 = vld [vmem:[#allocation2 + $0x58] sm:$0x3] }
 0x203   : > { %v2781_v17 = vrot.slane %v2172_v54, 2 }
 0x204   : > { %v8209_v3 = vadd.f32 %v1786_v37, %v1544_v26  ;;  %v2482_v37 = vrot.slane %v2169_v1, 1  ;;  %v8239_v26 = vpop.f32.mrf.mxu2 }
 0x205   : > { %v1795_v52 = vpop.f32.mrf.mxu0 }
 0x206   : > { %6340 = vmatmul.msk.f32.gmra.mxu3 %vm311_vm1, %v1314_v36 }
 0x208   : > { %6480 = vmatmul.msk.f32.gmra.mxu0 %vm311_vm1, %v2777_v55  ;;  %v2483_v55 = vsel %vm531_vm2, %v7201_v13, %v2482_v37  ;;  %v2175_v13 = vld [vmem:[#allocation2 + $0x70] sm:$0x3] }
 0x209   : > { %v1479_v0 = vpop.f32.mrf.mxu3 }
 0x20a   : > { %v1545_v11 = vadd.f32 %v1479_v0, %v7805_v48 }
 0x20c   : > { %v8216_v24 = vadd.f32 %v1789_v28, %v1545_v11  ;;  %v2782_v28 = vsel %vm975_vm4, %v7257_v44, %v2781_v17  ;;  %v2786_v44 = vrot.slane %v2175_v13, 2  ;;  %v8248_v11 = vpop.f32.mrf.mxu1  ;;  %v8254_v37 = vpop.f32.mrf.mxu2 }
 0x20d   : > { %v1798_v22 = vpop.f32.mrf.mxu0 }
 0x20e   : > { %6445 = vmatmul.msk.f32.vlgmr.msra.gmra.mxu3 %vm311_vm1, %v7217_v20 }
 0x210   : > { %6481 = vmatmul.msk.f32.gmra.mxu0 %vm311_vm1, %v7273_v53 }
 0x211   : > { %v1482_v4 = vpop.f32.mrf.mxu3 }
 0x212   : > { %v1546_v36 = vadd.f32 %v1482_v4, %v7821_v32  ;;  %v2487_v32 = vrot.slane %v2172_v54, 1  ;;  %v2492_v4 = vrot.slane %v2175_v13, 1 }
 0x214   : > { %v8225_v10 = vadd.f32 %v1792_v59, %v1546_v36  ;;  %v8260_v36 = vpop.f32.mrf.mxu1 }
 0x215   : > { %v1801_v48 = vpop.f32.mrf.mxu0 }
 0x216   : > { %6446 = vmatmul.msk.f32.gmra.mxu3 %vm311_vm1, %v2483_v55 }
 0x218   : > { %6482 = vmatmul.msk.f32.gmra.mxu0 %vm311_vm1, %v2782_v28 }
 0x219   : > { %v1485_v20 = vpop.f32.mrf.mxu3 }
 0x21a   : > { %v1547_v53 = vadd.f32 %v1485_v20, %v7833_v33  ;;  %v2488_v33 = vsel %vm531_vm2, %v7252_v38, %v2487_v32  ;;  %v8270_v20 = vpop.f32.mrf.mxu2 }
 0x21c   : > { %v8232_v1 = vadd.f32 %v1795_v52, %v1547_v53  ;;  %v8274_v13 = vpop.f32.mrf.mxu1 }
 0x21d   : > { %v1804_v15 = vpop.f32.mrf.mxu0 }
 0x21e   : > { %6447 = vmatmul.msk.f32.gmra.mxu3 %vm311_vm1, %v7268_v50  ;;  %v2787_v50 = vsel %vm975_vm4, %v7308_v21, %v2786_v44 }
 0x220   : > { %6483 = vmatmul.msk.f32.gmra.mxu0 %vm311_vm1, %v7324_v29 }
 0x221   : > { %v1488_v59 = vpop.f32.mrf.mxu3 }
 0x222   : > { %v1548_v31 = vadd.f32 %v1488_v59, %v7849_v47 }
 0x224   : > { %v8243_v52 = vadd.f32 %v1798_v22, %v1548_v31  ;;  %v2178_v22 = vld [vmem:[#allocation2 + $0x88] sm:$0x3]  ;;  %v10982_v31 = vld [vmem:[#allocation43_spill] sm:$0xff] }
 0x225   : > { %v1807_v0 = vpop.f32.mrf.mxu0  ;;  %v2791_v17 = vrot.slane %v2178_v22, 2  ;;  %v2497_v32 = vrot.slane %v2178_v22, 1  ;;  %v10986_v22 = vld [vmem:[#allocation45_spill] sm:$0xff] }
 0x226   : > { %10978 = vst [vmem:[#allocation50_spill] sm:$0xff] %v8243_v52  ;;  %6448 = vmatmul.msk.f32.gmra.mxu3 %vm311_vm1, %v2488_v33  ;;  %v11018_v52 = vld [vmem:[#allocation25_spill] sm:$0xff] }
 0x228   : > { %6484 = vmatmul.msk.f32.gmra.mxu0 %vm311_vm1, %v2787_v50 }
 0x229   : > { %v1491_v29 = vpop.f32.mrf.mxu3 }
 0x22a   : > { %v1549_v47 = vadd.f32 %v1491_v29, %v7861_v43  ;;  %v2493_v43 = vsel %vm531_vm2, %v7303_v14, %v2492_v4  ;;  %v8291_v4 = vpop.f32.mrf.mxu1 }
 0x22c   : > { %v8252_v54 = vadd.f32 %v1801_v48, %v1549_v47  ;;  %v10985_v47 = vld [vmem:[#allocation6_spill] sm:$0xff] }
 0x22d   : > { %v1810_v38 = vpop.f32.mrf.mxu0 }
 0x22e   : > { %10979 = vst [vmem:[#allocation51_spill] sm:$0xff] %v8252_v54  ;;  %6449 = vmatmul.msk.f32.gmra.mxu3 %vm311_vm1, %v7319_v25  ;;  %v2792_v25 = vsel %vm975_vm4, %v7353_v63, %v2791_v17  ;;  %v8282_v63 = vpop.f32.mrf.mxu2  ;;  %v6642_v54 = vld [vmem:[%s10749_s3 + $0x20] sm:$0xff] }
 0x22f   : > { %4514 = vmatpush.msrb.mxu1 %v6642_v54 }
 0x230   : > { %6485 = vmatmul.msk.f32.gmra.mxu0 %vm311_vm1, %v7367_v9 }
 0x231   : > { %v1494_v21 = vpop.f32.mrf.mxu3 }
 0x232   : > { %v1550_v55 = vadd.f32 %v1494_v21, %v7877_v42 }
 0x234   : > { %v8265_v48 = vadd.f32 %v1804_v15, %v1550_v55  ;;  %v2181_v15 = vld [vmem:[#allocation2 + $0xa0] sm:$0x3] }
 0x235   : > { %v1813_v28 = vpop.f32.mrf.mxu0  ;;  %v2796_v44 = vrot.slane %v2181_v15, 2 }
 0x236   : > { %10980 = vst [vmem:[#allocation52_spill] sm:$0xff] %v8265_v48  ;;  %6450 = vmatmul.msk.f32.gmra.mxu3 %vm311_vm1, %v2493_v43  ;;  %v8296_v17 = vpop.f32.mrf.mxu2 }
 0x238   : > { %6486 = vmatmul.msk.f32.gmra.mxu0 %vm311_vm1, %v2792_v25  ;;  %v2184_v25 = vld [vmem:[#allocation2 + $0xb8] sm:$0x3] }
 0x239   : > { %v1497_v9 = vpop.f32.mrf.mxu3 }
 0x23a   : > { %v1551_v53 = vadd.f32 %v1497_v9, %v7889_v23  ;;  %v10983_v23 = vld [vmem:[#allocation4_spill] sm:$0xff]  ;;  %v2502_v9 = vrot.slane %v2181_v15, 1 }
 0x23b   : > { %v2498_v50 = vsel %vm531_vm2, %v10983_v23, %v2497_v32  ;;  %v10989_v32 = vld [vmem:[#allocation12_spill] sm:$0xff]  ;;  %v10991_v23 = vld [vmem:[#allocation5_spill] sm:$0xff] }
 0x23c   : > { %v8276_v42 = vadd.f32 %v1807_v0, %v1551_v53  ;;  %v8302_v53 = vpop.f32.mrf.mxu1 }
 0x23d   : > { %v1816_v14 = vpop.f32.mrf.mxu0 }
 0x23e   : > { %10981 = vst [vmem:[#allocation53_spill] sm:$0xff] %v8276_v42  ;;  %6451 = vmatmul.msk.f32.gmra.mxu3 %vm311_vm1, %v7361_v7  ;;  %v2797_v7 = vsel %vm975_vm4, %v10985_v47, %v2796_v44  ;;  %v2801_v44 = vrot.slane %v2184_v25, 2  ;;  %v8311_v47 = vpop.f32.mrf.mxu2 }
 0x240   : > { %6487 = vmatmul.msk.f32.gmra.mxu0 %vm311_vm1, %v7409_v51 }
 0x241   : > { %v1500_v59 = vpop.f32.mrf.mxu3 }
 0x242   : > { %v1552_v33 = vadd.f32 %v1500_v59, %v10982_v31  ;;  %v10990_v31 = vld [vmem:[#allocation42_spill] sm:$0xff] }
 0x244   : > { %v8287_v0 = vadd.f32 %v1810_v38, %v1552_v33  ;;  %v10988_v38 = vld [vmem:[#allocation7_spill] sm:$0xff] }
 0x245   : > { %v1819_v29 = vpop.f32.mrf.mxu0 }
 0x246   : > { %10984 = vst [vmem:[#allocation43_spill] sm:$0xff] %v8287_v0  ;;  %6452 = vmatmul.msk.f32.gmra.mxu3 %vm311_vm1, %v2498_v50  ;;  %v2503_v50 = vsel %vm531_vm2, %v10991_v23, %v2502_v9  ;;  %v2507_v23 = vrot.slane %v2184_v25, 1  ;;  %v11003_v0 = vmov 0.0  }
 0x247   : > { %3106 = vst.msk [vmem:[#allocation3 + $0x18] sm:$0xff] %vm3101_vm5, %v11003_v0 }
 0x248   : > { %6488 = vmatmul.msk.f32.gmra.mxu0 %vm311_vm1, %v2797_v7  ;;  %3107 = vst.msk [vmem:[#allocation3 + $0x20] sm:$0xff] %vm3101_vm5, %v11003_v0 }
 0x249   : > { %v1503_v51 = vpop.f32.mrf.mxu3  ;;  %3102 = vst.msk [vmem:[#allocation3] sm:$0xff] %vm3101_vm5, %v11003_v0 }
 0x24a   : > { %v1553_v21 = vadd.f32 %v1503_v51, %v10986_v22  ;;  %v10993_v51 = vld [vmem:[#allocation10_spill] sm:$0xff]  ;;  %3103 = vst.msk [vmem:[#allocation3 + $0x8] sm:$0xff] %vm3101_vm5, %v11003_v0 }
 0x24b   : > { %v2802_v15 = vsel %vm975_vm4, %v10993_v51, %v2801_v44  ;;  %v10997_v44 = vld [vmem:[#allocation20_spill] sm:$0xff]  ;;  %3109 = vst.msk [vmem:[#allocation3 + $0x30] sm:$0xff] %vm3101_vm5, %v11003_v0 }
 0x24c   : > { %v8298_v55 = vadd.f32 %v1813_v28, %v1553_v21  ;;  %v8317_v21 = vpop.f32.mrf.mxu1  ;;  %3110 = vst.msk [vmem:[#allocation3 + $0x38] sm:$0xff] %vm3101_vm5, %v11003_v0 }
 0x24d   : > { %v1822_v43 = vpop.f32.mrf.mxu0  ;;  %3112 = vst.msk [vmem:[#allocation3 + $0x48] sm:$0xff] %vm3101_vm5, %v11003_v0 }
 0x24e   : > { %10987 = vst [vmem:[#allocation4_spill] sm:$0xff] %v8298_v55  ;;  %6453 = vmatmul.msk.f32.gmra.mxu3 %vm311_vm1, %v10988_v38  ;;  %v10994_v38 = vld [vmem:[#allocation8_spill] sm:$0xff]  ;;  %v10999_v55 = vld [vmem:[#allocation9_spill] sm:$0xff] }
 0x24f   : > { %3113 = vst.msk [vmem:[#allocation3 + $0x50] sm:$0xff] %vm3101_vm5, %v11003_v0 }
 0x250   : > { %6489 = vmatmul.msk.f32.gmra.mxu0 %vm311_vm1, %v10989_v32  ;;  %3115 = vst.msk [vmem:[#allocation3 + $0x60] sm:$0xff] %vm3101_vm5, %v11003_v0 }
 0x251   : > { %v1506_v59 = vpop.f32.mrf.mxu3  ;;  %3116 = vst.msk [vmem:[#allocation3 + $0x68] sm:$0xff] %vm3101_vm5, %v11003_v0 }
 0x252   : > { %v1554_v33 = vadd.f32 %v1506_v59, %v10990_v31  ;;  %v2187_v31 = vld [vmem:[#allocation2 + $0xd0] sm:$0x3]  ;;  %3118 = vst.msk [vmem:[#allocation3 + $0x78] sm:$0xff] %vm3101_vm5, %v11003_v0 }
 0x253   : > { %v2806_v51 = vrot.slane %v2187_v31, 2  ;;  %3119 = vst.msk [vmem:[#allocation3 + $0x80] sm:$0xff] %vm3101_vm5, %v11003_v0 }
 0x254   : > { %v8309_v28 = vadd.f32 %v1816_v14, %v1554_v33  ;;  %v10996_v14 = vld [vmem:[#allocation11_spill] sm:$0xff]  ;;  %v8324_v33 = vpop.f32.mrf.mxu2  ;;  %3121 = vst.msk [vmem:[#allocation3 + $0x90] sm:$0xff] %vm3101_vm5, %v11003_v0 }
 0x255   : > { %v1825_v7 = vpop.f32.mrf.mxu0  ;;  %3122 = vst.msk [vmem:[#allocation3 + $0x98] sm:$0xff] %vm3101_vm5, %v11003_v0 }
 0x256   : > { %10992 = vst [vmem:[#allocation6_spill] sm:$0xff] %v8309_v28  ;;  %6454 = vmatmul.msk.f32.gmra.mxu3 %vm311_vm1, %v2503_v50 }
 0x257   : > { %3124 = vst.msk [vmem:[#allocation3 + $0xa8] sm:$0xff] %vm3101_vm5, %v11003_v0 }
 0x258   : > { %6490 = vmatmul.msk.f32.gmra.mxu0 %vm311_vm1, %v2802_v15  ;;  %v10998_v15 = vld [vmem:[#allocation14_spill] sm:$0xff]  ;;  %3125 = vst.msk [vmem:[#allocation3 + $0xb0] sm:$0xff] %vm3101_vm5, %v11003_v0 }
 0x259   : > { %v1509_v22 = vpop.f32.mrf.mxu3  ;;  %3127 = vst.msk [vmem:[#allocation3 + $0xc0] sm:$0xff] %vm3101_vm5, %v11003_v0 }
 0x25a   : > { %v1555_v32 = vadd.f32 %v1509_v22, %v10994_v38  ;;  %v2508_v22 = vsel %vm531_vm2, %v10999_v55, %v2507_v23  ;;  %v8358_v23 = vld [vmem:[#allocation2 + $0xe8] sm:$0x3]  ;;  %3128 = vst.msk [vmem:[#allocation3 + $0xc8] sm:$0xff] %vm3101_vm5, %v11003_v0 }
 0x25b   : > { %3130 = vst.msk [vmem:[#allocation3 + $0xd8] sm:$0xff] %vm3101_vm5, %v11003_v0 }
 0x25c   : > { %v8320_v59 = vadd.f32 %v1819_v29, %v1555_v32  ;;  %v8331_v29 = vpop.f32.mrf.mxu1  ;;  %v8339_v25 = vpop.f32.mrf.mxu2  ;;  %3131 = vst.msk [vmem:[#allocation3 + $0xe0] sm:$0xff] %vm3101_vm5, %v11003_v0 }
 0x25d   : > { %v1828_v9 = vpop.f32.mrf.mxu0  ;;  %3133 = vst.msk [vmem:[#allocation3 + $0xf0] sm:$0xff] %vm3101_vm5, %v11003_v0 }
 0x25e   : > { %10995 = vst [vmem:[#allocation45_spill] sm:$0xff] %v8320_v59  ;;  %6455 = vmatmul.msk.f32.gmra.mxu3 %vm311_vm1, %v10996_v14  ;;  %v11001_v14 = vld [vmem:[#allocation18_spill] sm:$0xff] }
 0x25f   : > { %v2807_v59 = vsel %vm975_vm4, %v11001_v14, %v2806_v51  ;;  %v11006_v51 = vld [vmem:[#allocation29_spill] sm:$0xff]  ;;  %v2811_v14 = vrot.slane %v8358_v23, 2  ;;  %3134 = vst.msk [vmem:[#allocation3 + $0xf8] sm:$0xff] %vm3101_vm5, %v11003_v0 }
 0x260   : > { %6491 = vmatmul.msk.f32.gmra.mxu0 %vm311_vm1, %v10997_v44  ;;  %3136 = vst.msk [vmem:[#allocation3 + $0x108] sm:$0xff] %vm3101_vm5, %v11003_v0 }
 0x261   : > { %v1512_v50 = vpop.f32.mrf.mxu3  ;;  %3137 = vst.msk [vmem:[#allocation3 + $0x110] sm:$0xff] %vm3101_vm5, %v11003_v0 }
 0x262   : > { %v1556_v28 = vadd.f32 %v1512_v50, %v10998_v15  ;;  %v11002_v50 = vld [vmem:[#allocation15_spill] sm:$0xff]  ;;  %3139 = vst.msk [vmem:[#allocation3 + $0x120] sm:$0xff] %vm3101_vm5, %v11003_v0 }
 0x263   : > { %3140 = vst.msk [vmem:[#allocation3 + $0x128] sm:$0xff] %vm3101_vm5, %v11003_v0 }
 0x264   : > { %v8333_v38 = vadd.f32 %v1822_v43, %v1556_v28  ;;  %v8354_v28 = vpop.f32.mrf.mxu1  ;;  %3142 = vst.msk [vmem:[#allocation3 + $0x138] sm:$0xff] %vm3101_vm5, %v11003_v0 }
 0x265   : > { %v1831_v32 = vpop.f32.mrf.mxu0  ;;  %3143 = vst.msk [vmem:[#allocation3 + $0x140] sm:$0xff] %vm3101_vm5, %v11003_v0 }
 0x266   : > { %11000 = vst [vmem:[#allocation7_spill] sm:$0xff] %v8333_v38  ;;  %6456 = vmatmul.msk.f32.gmra.mxu3 %vm311_vm1, %v2508_v22 }
 0x267   : > { %3145 = vst.msk [vmem:[#allocation3 + $0x150] sm:$0xff] %vm3101_vm5, %v11003_v0 }
 0x268   : > { %6492 = vmatmul.msk.f32.gmra.mxu0 %vm311_vm1, %v2807_v59  ;;  %v11005_v59 = vld [vmem:[#allocation19_spill] sm:$0xff]  ;;  %3146 = vst.msk [vmem:[#allocation3 + $0x158] sm:$0xff] %vm3101_vm5, %v11003_v0 }
 0x269   : > { %v1515_v44 = vpop.f32.mrf.mxu3  ;;  %3148 = vst.msk [vmem:[#allocation3 + $0x168] sm:$0xff] %vm3101_vm5, %v11003_v0 }
 0x26a   : > { %v1557_v15 = vadd.f32 %v1515_v44, %v11002_v50  ;;  %v11007_v44 = vld [vmem:[#allocation24_spill] sm:$0xff]  ;;  %3149 = vst.msk [vmem:[#allocation3 + $0x170] sm:$0xff] %vm3101_vm5, %v11003_v0 }
 0x26b   : > { %3151 = vst.msk [vmem:[#allocation3 + $0x180] sm:$0xff] %vm3101_vm5, %v11003_v0 }
 0x26c   : > { %v8346_v55 = vadd.f32 %v1825_v7, %v1557_v15  ;;  %v2512_v7 = vrot.slane %v2187_v31, 1  ;;  %v8374_v31 = vpop.f32.mrf.mxu2  ;;  %v11008_v15 = vld [vmem:[#allocation17_spill] sm:$0xff]  ;;  %3152 = vst.msk [vmem:[#allocation3 + $0x188] sm:$0xff] %vm3101_vm5, %v11003_v0 }
 0x26d   : > { %v8350_v43 = vpop.f32.mrf.mxu0  ;;  %3154 = vst.msk [vmem:[#allocation3 + $0x198] sm:$0xff] %vm3101_vm5, %v11003_v0 }
 0x26e   : > { %11004 = vst [vmem:[#allocation12_spill] sm:$0xff] %v8346_v55  ;;  %6457 = vmatmul.msk.f32.gmra.mxu3 %vm311_vm1, %v11005_v59  ;;  %v2513_v59 = vsel %vm531_vm2, %v11008_v15, %v2512_v7 }
 0x26f   : > { %3155 = vst.msk [vmem:[#allocation3 + $0x1a0] sm:$0xff] %vm3101_vm5, %v11003_v0 }
 0x270   : > { %6493 = vmatmul.msk.f32.gmra.mxu0 %vm311_vm1, %v11006_v51  ;;  %v8380_v51 = vld [vmem:[#allocation3] sm:$0xff]  ;;  %3108 = vst.msk [vmem:[#allocation3 + $0x28] sm:$0x3] %vm3104_vm6, %v11003_v0 }
 0x271   : > { %v1518_v22 = vpop.f32.mrf.mxu3  ;;  %6544 = vmatmul.msk.f32.vlgmr.msra.gmra.mxu2 %vm3101_vm5, %v8380_v51  ;;  %3105 = vst.msk [vmem:[#allocation3 + $0x10] sm:$0x3] %vm3104_vm6, %v11003_v0 }
 0x272   : > { %v1558_v50 = vadd.f32 %v1518_v22, %v11007_v44  ;;  %v11010_v44 = vld [vmem:[#allocation27_spill] sm:$0xff]  ;;  %3111 = vst.msk [vmem:[#allocation3 + $0x40] sm:$0x3] %vm3104_vm6, %v11003_v0 }
 0x273   : > { %v2812_v38 = vsel %vm975_vm4, %v11010_v44, %v2811_v14  ;;  %v8406_v14 = vld [vmem:[#allocation3 + $0x8] sm:$0xff]  ;;  %3114 = vst.msk [vmem:[#allocation3 + $0x58] sm:$0x3] %vm3104_vm6, %v11003_v0 }
 0x274   : > { %v8382_v55 = vadd.f32 %v1828_v9, %v1558_v50  ;;  %v8399_v9 = vpop.f32.mrf.mxu1  ;;  %v11011_v50 = vld [vmem:[#allocation44_spill] sm:$0xff]  ;;  %v10820_v44 = vrot.slane %v8406_v14, 1  ;;  %3117 = vst.msk [vmem:[#allocation3 + $0x70] sm:$0x3] %vm3104_vm6, %v11003_v0 }
 0x275   : > { %v8388_v22 = vpop.f32.mrf.mxu0  ;;  %3120 = vst.msk [vmem:[#allocation3 + $0x88] sm:$0x3] %vm3104_vm6, %v11003_v0 }
 0x276   : > { %11009 = vst [vmem:[#allocation42_spill] sm:$0xff] %v8382_v55  ;;  %6458 = vmatmul.msk.f32.gmra.mxu3 %vm311_vm1, %v2513_v59  ;;  %v3321_v59 = vrot.slane %v8380_v51, 1 }
 0x277   : > { %3123 = vst.msk [vmem:[#allocation3 + $0xa0] sm:$0x3] %vm3104_vm6, %v11003_v0 }
 0x278   : > { %6494 = vmatmul.msk.f32.gmra.mxu0 %vm311_vm1, %v2812_v38  ;;  %v6576_v38 = vld [vmem:[%s10749_s3 + $0x10] sm:$0xff]  ;;  %3126 = vst.msk [vmem:[#allocation3 + $0xb8] sm:$0x3] %vm3104_vm6, %v11003_v0 }
 0x279   : > { %v1521_v7 = vpop.f32.mrf.mxu3  ;;  %3916 = vmatpush.msrb.mxu3 %v6576_v38  ;;  %6545 = vmatmul.msk.f32.gmra.mxu2 %vm3101_vm5, %v8406_v14  ;;  %v2517_v38 = vrot.slane %v8358_v23, 1  ;;  %v6675_v23 = vld [vmem:[%s10749_s3 + $0x28] sm:$0xff]  ;;  %3129 = vst.msk [vmem:[#allocation3 + $0xd0] sm:$0x3] %vm3104_vm6, %v11003_v0 }
 0x27a   : > { %v1559_v15 = vadd.f32 %v1521_v7, %v11011_v50  ;;  %v3323_v7 = vsel %vm531_vm2, %v3321_v59, %v10820_v44  ;;  %v8427_v50 = vpop.f32.mrf.mxu2  ;;  %v11015_v59 = vld [vmem:[#allocation36_spill] sm:$0xff]  ;;  %4805 = vmatpush.msrb.mxu2 %v6675_v23  ;;  %3132 = vst.msk [vmem:[#allocation3 + $0xe8] sm:$0x3] %vm3104_vm6, %v11003_v0 }
 0x27b   : > { %11013 = vst [vmem:[#allocation10_spill] sm:$0xff] %v8427_v50  ;;  %6512 = vmatmul.msk.f32.vlgmr.msra.gmra.mxu1 %vm3101_vm5, %v3323_v7  ;;  %v2518_v50 = vsel %vm531_vm2, %v11018_v52, %v2517_v38 }
 0x27c   : > { %v8418_v55 = vadd.f32 %v1831_v32, %v1559_v15  ;;  %v11014_v32 = vld [vmem:[#allocation28_spill] sm:$0xff]  ;;  %3135 = vst.msk [vmem:[#allocation3 + $0x100] sm:$0x3] %vm3104_vm6, %v11003_v0 }
 0x27d   : > { %v2937_v42 = vpop.f32.mrf.mxu0  ;;  %v2193_v15 = vld [vmem:[#allocation2 + $0x100] sm:$0x3]  ;;  %3138 = vst.msk [vmem:[#allocation3 + $0x118] sm:$0x3] %vm3104_vm6, %v11003_v0 }
 0x27e   : > { %11012 = vst [vmem:[#allocation5_spill] sm:$0xff] %v8418_v55  ;;  %6459 = vmatmul.msk.f32.gmra.mxu3 %vm311_vm1, %v11014_v32  ;;  %v2816_v7 = vrot.slane %v2193_v15, 2  ;;  %v8445_v32 = vpop.f32.mrf.mxu1  ;;  %v11017_v55 = vld [vmem:[#allocation31_spill] sm:$0xff]  ;;  %v2522_v23 = vrot.slane %v2193_v15, 1  ;;  %v8516_v15 = vld [vmem:[%s10748_s2] ss:$0 sm:$0xff] }
 0x27f   : > { %11016 = vst [vmem:[#allocation8_spill] sm:$0xff] %v8445_v32 }
 0x280   : > { %6495 = vmatmul.msk.f32.gmra.mxu0 %vm311_vm1, %v11015_v59  ;;  %v6609_v59 = vld [vmem:[%s10749_s3 + $0x18] sm:$0xff]  ;;  %v2817_v32 = vsel %vm975_vm4, %v10950_v27, %v2816_v7  ;;  %v11020_v27 = vld [vmem:[#allocation46_spill] sm:$0xff]  ;;  %3141 = vst.msk [vmem:[#allocation3 + $0x130] sm:$0x3] %vm3104_vm6, %v11003_v0 }
 0x281   : > { %v1524_v44 = vpop.f32.mrf.mxu3  ;;  %4207 = vmatpush.msrb.mxu0 %v6609_v59  ;;  %v11022_v7 = vld [vmem:[#allocation34_spill] sm:$0xff]  ;;  %3144 = vst.msk [vmem:[#allocation3 + $0x148] sm:$0x3] %vm3104_vm6, %v11003_v0 }
 0x282   : > { %v1560_v48 = vadd.f32 %v1524_v44, %v11017_v55  ;;  %v8475_v52 = vpop.f32.mrf.mxu2  ;;  %3147 = vst.msk [vmem:[#allocation3 + $0x160] sm:$0x3] %vm3104_vm6, %v11003_v0 }
 0x283   : > { %3150 = vst.msk [vmem:[#allocation3 + $0x178] sm:$0x3] %vm3104_vm6, %v11003_v0 }
 0x284   : > { %v8464_v55 = vadd.f32 %v8350_v43, %v1560_v48  ;;  %3153 = vst.msk [vmem:[#allocation3 + $0x190] sm:$0x3] %vm3104_vm6, %v11003_v0 }
 0x285   : > { %v2940_v44 = vpop.f32.mrf.mxu0  ;;  %3156 = vst.msk [vmem:[#allocation3 + $0x1a8] sm:$0x3] %vm3104_vm6, %v11003_v0 }
 0x286   : > { %11019 = vst [vmem:[#allocation11_spill] sm:$0xff] %v8464_v55  ;;  %6460 = vmatmul.msk.f32.gmra.mxu3 %vm311_vm1, %v2518_v50  ;;  %v8489_v43 = vpop.f32.mrf.mxu1 }
 0x288   : > { %6496 = vmatmul.msk.f32.gmra.mxu0 %vm311_vm1, %v2817_v32  ;;  %v2196_v32 = vld [vmem:[#allocation2 + $0x118] sm:$0x3] }
 0x289   : > { %v1527_v54 = vpop.f32.mrf.mxu3 }
 0x28a   : > { %v1561_v48 = vadd.f32 %v1527_v54, %v11020_v27  ;;  %v2821_v54 = vrot.slane %v2196_v32, 2 }
 0x28c   : > { %v8492_v50 = vadd.f32 %v8388_v22, %v1561_v48  ;;  %v8508_v22 = vpop.f32.mrf.mxu2 }
 0x28d   : > { %v2943_v38 = vpop.f32.mrf.mxu0  ;;  %11023 = vst [vmem:[#allocation14_spill] sm:$0xff] %v8508_v22 }
 0x28e   : > { %11021 = vst [vmem:[#allocation20_spill] sm:$0xff] %v8492_v50  ;;  %6461 = vmatmul.msk.f32.gmra.mxu3 %vm311_vm1, %v11022_v7  ;;  %v2822_v7 = vsel %vm975_vm4, %v7645_v2, %v2821_v54  ;;  %v11025_v54 = vrot.slane %v8406_v14, 1 }
 0x290   : > { %6497 = vmatmul.msk.f32.gmra.mxu0 %vm311_vm1, %v10955_v62  ;;  %v2523_v62 = vsel %vm531_vm2, %v10953_v61, %v2522_v23  ;;  %v8536_v61 = vld [vmem:[#allocation3 + $0x10] sm:$0x3] }
 0x291   : > { %v2643_v59 = vpop.f32.mrf.mxu3 }
 0x292   : > { %v2739_v27 = vadd.f32 %v2643_v59, %v7968_v18  ;;  %v8530_v59 = vpop.f32.mrf.mxu1 }
 0x293   : > { %11024 = vst [vmem:[#allocation9_spill] sm:$0xff] %v8530_v59 }
 0x294   : > { %v3033_v48 = vadd.f32 %v2937_v42, %v2739_v27  ;;  %v3324_v42 = vrot.slane %v8536_v61, 1 }
 0x295   : > { %v2946_v18 = vpop.f32.mrf.mxu0 }
 0x296   : > { %v3069_v50 = vadd.f32 %v8516_v15, %v3033_v48  ;;  %6462 = vmatmul.msk.f32.gmra.mxu3 %vm311_vm1, %v2523_v62  ;;  %v3325_v27 = vsel %vm531_vm2, %v11025_v54, %v3324_v42 }
 0x297   : > { %6513 = vmatmul.msk.f32.gmra.mxu1 %vm3101_vm5, %v3325_v27 }
 0x298   : > { %v3157_v23 = vmax.f32 %v3069_v50, 0.0  ;;  %6498 = vmatmul.msk.f32.gmra.mxu0 %vm311_vm1, %v2822_v7  ;;  %v8552_v50 = vpop.f32.mrf.mxu2 }
 0x299   : > { %v2646_v2 = vpop.f32.mrf.mxu3  ;;  %11026 = vst [vmem:[#allocation18_spill] sm:$0xff] %v8552_v50 }
 0x29a   : > { %3190 = vst.msk [vmem:[#allocation3 + $0x19] sm:$0xff] %vm3101_vm5, %v3157_v23  ;;  %v2740_v62 = vadd.f32 %v2646_v2, %v7979_v60  ;;  %v2199_v60 = vld [vmem:[#allocation2 + $0x130] sm:$0x3]  ;;  %v8567_v23 = vpop.f32.mrf.mxu1 }
 0x29b   : > { %11027 = vst [vmem:[#allocation15_spill] sm:$0xff] %v8567_v23  ;;  %v11031_v23 = vld [vmem:[#allocation16_spill] sm:$0xff] }
 0x29c   : > { %v3034_v48 = vadd.f32 %v2940_v44, %v2740_v62  ;;  %v2527_v44 = vrot.slane %v2196_v32, 1  ;;  %v2826_v62 = vrot.slane %v2199_v60, 2  ;;  %v11029_v32 = vld [vmem:[#allocation38_spill] sm:$0xff] }
 0x29d   : > { %v2949_v7 = vpop.f32.mrf.mxu0 }
 0x29e   : > { %v3070_v42 = vadd.f32 %v8516_v15, %v3034_v48  ;;  %6463 = vmatmul.msk.f32.gmra.mxu3 %vm311_vm1, %v10956_v34  ;;  %v11028_v34 = vld [vmem:[#allocation13_spill] sm:$0xff] }
 0x2a0   : > { %v3158_v2 = vmax.f32 %v3070_v42, 0.0  ;;  %6499 = vmatmul.msk.f32.gmra.mxu0 %vm311_vm1, %v8010_v6  ;;  %v2528_v42 = vsel %vm531_vm2, %v11029_v32, %v2527_v44  ;;  %v8581_v50 = vpop.f32.mrf.mxu2  ;;  %v2827_v6 = vsel %vm975_vm4, %v11031_v23, %v2826_v62  ;;  %v11033_v44 = vld [vmem:[#allocation23_spill] sm:$0xff] }
 0x2a1   : > { %v2649_v54 = vpop.f32.mrf.mxu3  ;;  %v8573_v27 = vld [vmem:[#allocation3 + $0x18] sm:$0xff]  ;;  %11030 = vst [vmem:[#allocation19_spill] sm:$0xff] %v8581_v50 }
 0x2a2   : > { %3191 = vst.msk [vmem:[#allocation3 + $0x21] sm:$0xff] %vm3101_vm5, %v3158_v2  ;;  %v2741_v48 = vadd.f32 %v2649_v54, %v11028_v34  ;;  %6546 = vmatmul.msk.f32.gmra.mxu2 %vm3101_vm5, %v8573_v27  ;;  %v8590_v59 = vpop.f32.mrf.mxu1 }
 0x2a3   : > { %11032 = vst [vmem:[#allocation29_spill] sm:$0xff] %v8590_v59 }
 0x2a4   : > { %v3035_v55 = vadd.f32 %v2943_v38, %v2741_v48  ;;  %v3326_v38 = vrot.slane %v8573_v27, 1 }
 0x2a5   : > { %v2952_v0 = vpop.f32.mrf.mxu0 }
 0x2a6   : > { %v3071_v22 = vadd.f32 %v8516_v15, %v3035_v55  ;;  %6464 = vmatmul.msk.f32.gmra.mxu3 %vm311_vm1, %v2528_v42 }
 0x2a8   : > { %v3159_v2 = vmax.f32 %v3071_v22, 0.0  ;;  %6500 = vmatmul.msk.f32.gmra.mxu0 %vm311_vm1, %v2827_v6  ;;  %v11037_v6 = vld [vmem:[#allocation33_spill] sm:$0xff] }
 0x2a9   : > { %v2652_v54 = vpop.f32.mrf.mxu3  ;;  %v8588_v34 = vld [vmem:[#allocation3 + $0x20] sm:$0xff]  ;;  %v8606_v32 = vld [vmem:[#allocation3 + $0x28] sm:$0x3] }
 0x2aa   : > { %3192 = vst.msk [vmem:[#allocation3 + $0x31] sm:$0xff] %vm3101_vm5, %v3159_v2  ;;  %v2742_v48 = vadd.f32 %v2652_v54, %v11033_v44  ;;  %v8596_v23 = vrot.slane %v8588_v34, 1  ;;  %6547 = vmatmul.msk.f32.gmra.mxu2 %vm3101_vm5, %v8588_v34  ;;  %v2202_v2 = vld [vmem:[#allocation2 + $0x148] sm:$0x3]  ;;  %v8611_v54 = vpop.f32.mrf.mxu2  ;;  %v2532_v44 = vrot.slane %v2199_v60, 1 }
 0x2ab   : > { %11036 = vst [vmem:[#allocation27_spill] sm:$0xff] %v8606_v32  ;;  %v2831_v50 = vrot.slane %v2202_v2, 2 }
 0x2ac   : > { %11034 = vst [vmem:[#allocation24_spill] sm:$0xff] %v8596_v23  ;;  %v3036_v55 = vadd.f32 %v2946_v18, %v2742_v48  ;;  %v8602_v22 = vsel %vm531_vm2, %v3326_v38, %v8596_v23  ;;  %v3329_v48 = vrot.slane %v8606_v32, 1 }
 0x2ad   : > { %11035 = vst [vmem:[#allocation17_spill] sm:$0xff] %v8602_v22  ;;  %6514 = vmatmul.msk.f32.gmra.mxu1 %vm3101_vm5, %v8602_v22  ;;  %v2955_v62 = vpop.f32.mrf.mxu0 }
 0x2ae   : > { %v3072_v42 = vadd.f32 %v8516_v15, %v3036_v55  ;;  %6465 = vmatmul.msk.f32.gmra.mxu3 %vm311_vm1, %v11037_v6  ;;  %11038 = vst [vmem:[#allocation44_spill] sm:$0xff] %v8611_v54  ;;  %v11039_v55 = vld [vmem:[#allocation21_spill] sm:$0xff]  ;;  %v11040_v6 = vld [vmem:[#allocation22_spill] sm:$0xff] }
 0x2af   : > { %v2533_v60 = vsel %vm531_vm2, %v11040_v6, %v2532_v44 }
 0x2b0   : > { %v3160_v18 = vmax.f32 %v3072_v42, 0.0  ;;  %6501 = vmatmul.msk.f32.gmra.mxu0 %vm311_vm1, %v8054_v16  ;;  %v8624_v42 = vpop.f32.mrf.mxu1  ;;  %v3330_v16 = vsel %vm531_vm2, %v8596_v23, %v3329_v48  ;;  %v11043_v48 = vld [vmem:[#allocation41_spill] sm:$0xff]  ;;  %v2537_v23 = vrot.slane %v2202_v2, 1  ;;  %v11051_v2 = vld [vmem:[#allocation32_spill] sm:$0xff] }
 0x2b1   : > { %v2655_v38 = vpop.f32.mrf.mxu3  ;;  %v8616_v22 = vld [vmem:[#allocation3 + $0x30] sm:$0xff]  ;;  %11041 = vst [vmem:[#allocation28_spill] sm:$0xff] %v8624_v42 }
 0x2b2   : > { %3193 = vst.msk [vmem:[#allocation3 + $0x39] sm:$0xff] %vm3101_vm5, %v3160_v18  ;;  %v2743_v59 = vadd.f32 %v2655_v38, %v11039_v55  ;;  %6548 = vmatmul.msk.f32.gmra.mxu2 %vm3101_vm5, %v8616_v22  ;;  %v2832_v18 = vsel %vm975_vm4, %v8039_v49, %v2831_v50  ;;  %v8634_v44 = vpop.f32.mrf.mxu2 }
 0x2b3   : > { %11042 = vst [vmem:[#allocation36_spill] sm:$0xff] %v8634_v44 }
 0x2b4   : > { %v3037_v54 = vadd.f32 %v2949_v7, %v2743_v59  ;;  %v3331_v7 = vrot.slane %v8616_v22, 1 }
 0x2b5   : > { %6515 = vmatmul.msk.f32.gmra.mxu1 %vm3101_vm5, %v3330_v16  ;;  %v2958_v32 = vpop.f32.mrf.mxu0 }
 0x2b6   : > { %v3073_v38 = vadd.f32 %v8516_v15, %v3037_v54  ;;  %6466 = vmatmul.msk.f32.gmra.mxu3 %vm311_vm1, %v2533_v60 }
 0x2b8   : > { %v3161_v55 = vmax.f32 %v3073_v38, 0.0  ;;  %6502 = vmatmul.msk.f32.gmra.mxu0 %vm311_vm1, %v2832_v18  ;;  %v8654_v38 = vpop.f32.mrf.mxu1 }
 0x2b9   : > { %v2658_v6 = vpop.f32.mrf.mxu3  ;;  %v8636_v59 = vld [vmem:[#allocation3 + $0x38] sm:$0xff]  ;;  %v8652_v18 = vld [vmem:[#allocation3 + $0x40] sm:$0x3]  ;;  %11047 = vst [vmem:[#allocation34_spill] sm:$0xff] %v8654_v38  ;;  %v11049_v38 = vld [vmem:[#allocation39_spill] sm:$0xff] }
 0x2ba   : > { %3194 = vst.msk [vmem:[#allocation3 + $0x49] sm:$0xff] %vm3101_vm5, %v3161_v55  ;;  %v2744_v16 = vadd.f32 %v2658_v6, %v11043_v48  ;;  %v8642_v49 = vrot.slane %v8636_v59, 1  ;;  %6549 = vmatmul.msk.f32.gmra.mxu2 %vm3101_vm5, %v8636_v59  ;;  %v11048_v6 = vld [vmem:[#allocation26_spill] sm:$0xff]  ;;  %v2205_v48 = vld [vmem:[#allocation2 + $0x160] sm:$0x3] }
 0x2bb   : > { %11046 = vst [vmem:[#allocation46_spill] sm:$0xff] %v8652_v18  ;;  %v2836_v44 = vrot.slane %v2205_v48, 2 }
 0x2bc   : > { %11044 = vst [vmem:[#allocation31_spill] sm:$0xff] %v8642_v49  ;;  %v3038_v50 = vadd.f32 %v2952_v0, %v2744_v16  ;;  %v8648_v54 = vsel %vm531_vm2, %v3331_v7, %v8642_v49  ;;  %v3334_v16 = vrot.slane %v8652_v18, 1 }
 0x2bd   : > { %11045 = vst [vmem:[#allocation25_spill] sm:$0xff] %v8648_v54  ;;  %6516 = vmatmul.msk.f32.gmra.mxu1 %vm3101_vm5, %v8648_v54  ;;  %v2961_v60 = vpop.f32.mrf.mxu0 }
 0x2be   : > { %v3074_v55 = vadd.f32 %v8516_v15, %v3038_v50  ;;  %6467 = vmatmul.msk.f32.gmra.mxu3 %vm311_vm1, %v11048_v6  ;;  %v8668_v50 = vpop.f32.mrf.mxu2 }
 0x2bf   : > { %11050 = vst [vmem:[#allocation13_spill] sm:$0xff] %v8668_v50 }
 0x2c0   : > { %v3162_v0 = vmax.f32 %v3074_v55, 0.0  ;;  %6503 = vmatmul.msk.f32.gmra.mxu0 %vm311_vm1, %v8100_v8  ;;  %v2538_v55 = vsel %vm531_vm2, %v11051_v2, %v2537_v23  ;;  %v3335_v8 = vsel %vm531_vm2, %v8642_v49, %v3334_v16 }
 0x2c1   : > { %v2661_v7 = vpop.f32.mrf.mxu3  ;;  %v8662_v54 = vld [vmem:[#allocation3 + $0x48] sm:$0xff] }
 0x2c2   : > { %3195 = vst.msk [vmem:[#allocation3 + $0x51] sm:$0xff] %vm3101_vm5, %v3162_v0  ;;  %v2745_v42 = vadd.f32 %v2661_v7, %v11049_v38  ;;  %6550 = vmatmul.msk.f32.gmra.mxu2 %vm3101_vm5, %v8662_v54  ;;  %v2837_v0 = vsel %vm975_vm4, %v8083_v45, %v2836_v44  ;;  %v8681_v7 = vpop.f32.mrf.mxu1  ;;  %v2142_v44 = vadd.f32 %v8248_v11, %v8121_v57  ;;  %v8711_v57 = vld [vmem:[#allocation2 + $0x178] sm:$0x3]  ;;  %v2542_v11 = vrot.slane %v2205_v48, 1  ;;  %v11057_v48 = vld [vmem:[#allocation30_spill] sm:$0xff] }
 0x2c3   : > { %11052 = vst [vmem:[#allocation38_spill] sm:$0xff] %v8681_v7 }
 0x2c4   : > { %v3039_v6 = vadd.f32 %v2955_v62, %v2745_v42  ;;  %v3336_v42 = vrot.slane %v8662_v54, 1 }
 0x2c5   : > { %6517 = vmatmul.msk.f32.gmra.mxu1 %vm3101_vm5, %v3335_v8  ;;  %v8675_v18 = vpop.f32.mrf.mxu0 }
 0x2c6   : > { %v3075_v38 = vadd.f32 %v8516_v15, %v3039_v6  ;;  %6468 = vmatmul.msk.f32.gmra.mxu3 %vm311_vm1, %v2538_v55  ;;  %v8700_v6 = vpop.f32.mrf.mxu2 }
 0x2c7   : > { %11055 = vst [vmem:[#allocation33_spill] sm:$0xff] %v8700_v6 }
 0x2c8   : > { %v3163_v50 = vmax.f32 %v3075_v38, 0.0  ;;  %6504 = vmatmul.msk.f32.gmra.mxu0 %vm311_vm1, %v2837_v0 }
 0x2c9   : > { %v2664_v23 = vpop.f32.mrf.mxu3  ;;  %v8684_v62 = vld [vmem:[#allocation3 + $0x50] sm:$0xff] }
 0x2ca   : > { %3196 = vst.msk [vmem:[#allocation3 + $0x61] sm:$0xff] %vm3101_vm5, %v3163_v50  ;;  %v2746_v16 = vadd.f32 %v2664_v23, %v8113_v30  ;;  %v8690_v45 = vrot.slane %v8684_v62, 1  ;;  %6551 = vmatmul.msk.f32.gmra.mxu2 %vm3101_vm5, %v8684_v62  ;;  %v8706_v50 = vld [vmem:[#allocation3 + $0x58] sm:$0x3]  ;;  %v8722_v49 = vpop.f32.mrf.mxu1 }
 0x2cb   : > { %v3339_v38 = vrot.slane %v8706_v50, 1  ;;  %v11056_v23 = vld [vmem:[#allocation37_spill] sm:$0xff] }
 0x2cc   : > { %11053 = vst [vmem:[#allocation16_spill] sm:$0xff] %v8690_v45  ;;  %v3040_v2 = vadd.f32 %v2958_v32, %v2746_v16  ;;  %v8698_v55 = vsel %vm531_vm2, %v3336_v42, %v8690_v45  ;;  %v2437_v32 = vadd.f32 %v8239_v26, %v2142_v44  ;;  %v2848_v42 = vrot.slane %v8182_v12, 2 }
 0x2cd   : > { %11054 = vst [vmem:[#allocation23_spill] sm:$0xff] %v8698_v55  ;;  %6518 = vmatmul.msk.f32.gmra.mxu1 %vm3101_vm5, %v8698_v55  ;;  %v8704_v30 = vpop.f32.mrf.mxu0  ;;  %v2543_v44 = vsel %vm531_vm2, %v11057_v48, %v2542_v11  ;;  %v3340_v6 = vsel %vm531_vm2, %v8690_v45, %v3339_v38 }
 0x2ce   : > { %v3076_v8 = vadd.f32 %v8516_v15, %v3040_v2  ;;  %6469 = vmatmul.msk.f32.gmra.mxu3 %vm311_vm1, %v8109_v39  ;;  %v2841_v39 = vrot.slane %v8711_v57, 2 }
 0x2d0   : > { %v3164_v0 = vmax.f32 %v3076_v8, 0.0  ;;  %6505 = vmatmul.msk.f32.gmra.mxu0 %vm311_vm1, %v11056_v23  ;;  %v11058_v8 = vld [vmem:[#allocation40_spill] sm:$0xff] }
 0x2d1   : > { %v2667_v55 = vpop.f32.mrf.mxu3  ;;  %v8719_v2 = vld [vmem:[#allocation3 + $0x60] sm:$0xff]  ;;  %v2143_v23 = vadd.f32 %v8260_v36, %v11058_v8  ;;  %v8745_v36 = vpop.f32.mrf.mxu2 }
 0x2d2   : > { %3197 = vst.msk [vmem:[#allocation3 + $0x69] sm:$0xff] %vm3101_vm5, %v3164_v0  ;;  %v2747_v26 = vadd.f32 %v2667_v55, %v2437_v32  ;;  %6552 = vmatmul.msk.f32.gmra.mxu2 %vm3101_vm5, %v8719_v2  ;;  %v2842_v55 = vsel %vm975_vm4, %v8126_v5, %v2841_v39  ;;  %v11059_v32 = vrot.slane %v8197_v58, 2  ;;  %v10828_v5 = vrot.slane %v8197_v58, 1 }
 0x2d4   : > { %v3041_v16 = vadd.f32 %v2961_v60, %v2747_v26  ;;  %v8741_v0 = vsel %vm975_vm4, %v2848_v42, %v11059_v32  ;;  %v2438_v60 = vadd.f32 %v8254_v37, %v2143_v23  ;;  %v3341_v42 = vrot.slane %v8719_v2, 1 }
 0x2d5   : > { %6519 = vmatmul.msk.f32.gmra.mxu1 %vm3101_vm5, %v3340_v6  ;;  %v8734_v7 = vpop.f32.mrf.mxu0  ;;  %v2554_v6 = vrot.slane %v8182_v12, 1  ;;  %v2144_v37 = vadd.f32 %v8274_v13, %v8155_v40  ;;  %v8762_v12 = vpop.f32.mrf.mxu1  ;;  %v11062_v13 = vld [vmem:[#allocation47_spill] sm:$0xff] }
 0x2d6   : > { %v3077_v11 = vadd.f32 %v8516_v15, %v3041_v16  ;;  %6470 = vmatmul.msk.f32.gmra.mxu3 %vm311_vm1, %v2543_v44 }
 0x2d7   : > { %v8778_v32 = vsel %vm531_vm2, %v2554_v6, %v10828_v5 }
 0x2d8   : > { %v3165_v38 = vmax.f32 %v3077_v11, 0.0  ;;  %6506 = vmatmul.msk.f32.gmra.mxu0 %vm311_vm1, %v2842_v55  ;;  %v2547_v11 = vrot.slane %v8711_v57, 1  ;;  %v11063_v57 = vld [vmem:[#allocation35_spill] sm:$0xff] }
 0x2d9   : > { %v2670_v39 = vpop.f32.mrf.mxu3  ;;  %v8751_v26 = vld [vmem:[#allocation3 + $0x68] sm:$0xff]  ;;  %v8773_v55 = vld [vmem:[#allocation3 + $0x70] sm:$0x3] }
 0x2da   : > { %3198 = vst.msk [vmem:[#allocation3 + $0x79] sm:$0xff] %vm3101_vm5, %v3165_v38  ;;  %v2748_v16 = vadd.f32 %v2670_v39, %v2438_v60  ;;  %v8756_v48 = vrot.slane %v8751_v26, 1  ;;  %6553 = vmatmul.msk.f32.gmra.mxu2 %vm3101_vm5, %v8751_v26  ;;  %v2439_v60 = vadd.f32 %v8270_v20, %v2144_v37  ;;  %v3344_v39 = vrot.slane %v8773_v55, 1 }
 0x2db   : > { %v2548_v20 = vsel %vm531_vm2, %v11063_v57, %v2547_v11  ;;  %v2145_v37 = vadd.f32 %v8291_v4, %v8173_v56  ;;  %v3757_v4 = vrot.slane %v8380_v51, 2  ;;  %v2146_v51 = vadd.f32 %v8302_v53, %v8191_v46  ;;  %v11066_v46 = vld [vmem:[#allocation49_spill] sm:$0xff] }
 0x2dc   : > { %11060 = vst [vmem:[#allocation21_spill] sm:$0xff] %v8756_v48  ;;  %v3042_v44 = vadd.f32 %v8675_v18, %v2748_v16  ;;  %v8767_v8 = vsel %vm531_vm2, %v3341_v42, %v8756_v48  ;;  %v2211_v18 = vld [vmem:[#allocation2 + $0x190] sm:$0x3]  ;;  %v8788_v42 = vpop.f32.mrf.mxu2  ;;  %v2214_v53 = vld [vmem:[#allocation2 + $0x1a8] sm:$0x3] }
 0x2dd   : > { %11061 = vst [vmem:[#allocation22_spill] sm:$0xff] %v8767_v8  ;;  %6520 = vmatmul.msk.f32.gmra.mxu1 %vm3101_vm5, %v8767_v8  ;;  %v8771_v23 = vpop.f32.mrf.mxu0  ;;  %v2440_v11 = vadd.f32 %v8282_v63, %v2145_v37 }
 0x2de   : > { %v3078_v40 = vadd.f32 %v8516_v15, %v3042_v44  ;;  %6471 = vmatmul.msk.f32.gmra.mxu3 %vm311_vm1, %v11062_v13  ;;  %v2846_v44 = vrot.slane %v2211_v18, 2 }
 0x2e0   : > { %v3166_v38 = vmax.f32 %v3078_v40, 0.0  ;;  %6507 = vmatmul.msk.f32.gmra.mxu0 %vm311_vm1, %v8170_v35  ;;  %v3345_v40 = vsel %vm531_vm2, %v8756_v48, %v3344_v39 }
 0x2e1   : > { %v2673_v6 = vpop.f32.mrf.mxu3  ;;  %v8790_v16 = vld [vmem:[#allocation3 + $0x78] sm:$0xff] }
 0x2e2   : > { %3199 = vst.msk [vmem:[#allocation3 + $0x81] sm:$0xff] %vm3101_vm5, %v3166_v38  ;;  %v2749_v13 = vadd.f32 %v2673_v6, %v2439_v60  ;;  %6554 = vmatmul.msk.f32.gmra.mxu2 %vm3101_vm5, %v8790_v16  ;;  %v2847_v60 = vsel %vm975_vm4, %v8160_v19, %v2846_v44  ;;  %v8805_v38 = vpop.f32.mrf.mxu1  ;;  %v3346_v19 = vrot.slane %v8790_v16, 1 }
 0x2e4   : > { %v3043_v35 = vadd.f32 %v8704_v30, %v2749_v13  ;;  %v10829_v30 = vrot.slane %v8406_v14, 2  ;;  %v8822_v63 = vpop.f32.mrf.mxu2 }
 0x2e5   : > { %6521 = vmatmul.msk.f32.gmra.mxu1 %vm3101_vm5, %v3345_v40  ;;  %v2976_v5 = vpop.f32.mrf.mxu0 }
 0x2e6   : > { %v3079_v6 = vadd.f32 %v8516_v15, %v3043_v35  ;;  %6472 = vmatmul.msk.f32.gmra.mxu3 %vm311_vm1, %v2548_v20 }
 0x2e8   : > { %v3167_v56 = vmax.f32 %v3079_v6, 0.0  ;;  %6508 = vmatmul.msk.f32.gmra.mxu0 %vm311_vm1, %v2847_v60  ;;  %v8838_v60 = vsel %vm975_vm4, %v3757_v4, %v10829_v30  ;;  %v2851_v30 = vrot.slane %v2214_v53, 2 }
 0x2e9   : > { %v2676_v39 = vpop.f32.mrf.mxu3  ;;  %v8813_v13 = vld [vmem:[#allocation3 + $0x80] sm:$0xff]  ;;  %v8833_v40 = vld [vmem:[#allocation3 + $0x88] sm:$0x3] }
 0x2ea   : > { %3200 = vst.msk [vmem:[#allocation3 + $0x91] sm:$0xff] %vm3101_vm5, %v3167_v56  ;;  %v2750_v44 = vadd.f32 %v2676_v39, %v2440_v11  ;;  %v8818_v57 = vrot.slane %v8813_v13, 1  ;;  %6555 = vmatmul.msk.f32.gmra.mxu2 %vm3101_vm5, %v8813_v13  ;;  %v2441_v11 = vadd.f32 %v8296_v17, %v2146_v51  ;;  %v8844_v56 = vpop.f32.mrf.mxu1  ;;  %v2147_v51 = vadd.f32 %v8317_v21, %v8203_v41 }
 0x2ec   : > { %11064 = vst [vmem:[#allocation41_spill] sm:$0xff] %v8818_v57  ;;  %v3044_v20 = vadd.f32 %v8734_v7, %v2750_v44  ;;  %v8829_v37 = vsel %vm531_vm2, %v3346_v19, %v8818_v57  ;;  %v2552_v7 = vrot.slane %v2211_v18, 1  ;;  %v3349_v19 = vrot.slane %v8833_v40, 1  ;;  %v11067_v18 = vld [vmem:[#allocation48_spill] sm:$0xff] }
 0x2ed   : > { %11065 = vst [vmem:[#allocation26_spill] sm:$0xff] %v8829_v37  ;;  %6522 = vmatmul.msk.f32.gmra.mxu1 %vm3101_vm5, %v8829_v37  ;;  %v2979_v35 = vpop.f32.mrf.mxu0  ;;  %v2442_v41 = vadd.f32 %v8311_v47, %v2147_v51  ;;  %v2148_v47 = vadd.f32 %v8331_v29, %v8209_v3 }
 0x2ee   : > { %v3080_v6 = vadd.f32 %v8516_v15, %v3044_v20  ;;  %6473 = vmatmul.msk.f32.gmra.mxu3 %vm311_vm1, %v11066_v46  ;;  %v2553_v17 = vsel %vm531_vm2, %v11067_v18, %v2552_v7  ;;  %v8861_v46 = vpop.f32.mrf.mxu2 }
 0x2ef   : > { %v2443_v3 = vadd.f32 %v8324_v33, %v2148_v47  ;;  %v2149_v33 = vadd.f32 %v8354_v28, %v8216_v24 }
 0x2f0   : > { %v3168_v39 = vmax.f32 %v3080_v6, 0.0  ;;  %6509 = vmatmul.msk.f32.gmra.mxu0 %vm311_vm1, %v8741_v0  ;;  %v3350_v0 = vsel %vm531_vm2, %v8818_v57, %v3349_v19 }
 0x2f1   : > { %v2679_v44 = vpop.f32.mrf.mxu3  ;;  %v8849_v4 = vld [vmem:[#allocation3 + $0x90] sm:$0xff] }
 0x2f2   : > { %3201 = vst.msk [vmem:[#allocation3 + $0x99] sm:$0xff] %vm3101_vm5, %v3168_v39  ;;  %v2751_v20 = vadd.f32 %v2679_v44, %v2441_v11  ;;  %6556 = vmatmul.msk.f32.gmra.mxu2 %vm3101_vm5, %v8849_v4  ;;  %v11068_v11 = vrot.slane %v8197_v58, 2  ;;  %v8873_v19 = vpop.f32.mrf.mxu1 }
 0x2f4   : > { %v3045_v6 = vadd.f32 %v8771_v23, %v2751_v20  ;;  %v2852_v44 = vsel %vm975_vm4, %v11068_v11, %v2851_v30  ;;  %v3351_v20 = vrot.slane %v8849_v4, 1 }
 0x2f5   : > { %6523 = vmatmul.msk.f32.gmra.mxu1 %vm3101_vm5, %v3350_v0  ;;  %v2982_v39 = vpop.f32.mrf.mxu0 }
 0x2f6   : > { %v3081_v37 = vadd.f32 %v8516_v15, %v3045_v6  ;;  %6474 = vmatmul.msk.f32.gmra.mxu3 %vm311_vm1, %v2553_v17  ;;  %v8895_v11 = vpop.f32.mrf.mxu2 }
 0x2f8   : > { %v3169_v21 = vmax.f32 %v3081_v37, 0.0  ;;  %6510 = vmatmul.msk.f32.gmra.mxu0 %vm311_vm1, %v2852_v44  ;;  %v2557_v44 = vrot.slane %v2214_v53, 1 }
 0x2f9   : > { %v2682_v23 = vpop.f32.mrf.mxu3  ;;  %v8871_v7 = vld [vmem:[#allocation3 + $0x98] sm:$0xff]  ;;  %v8890_v6 = vld [vmem:[#allocation3 + $0xa0] sm:$0x3] }
 0x2fa   : > { %3202 = vst.msk [vmem:[#allocation3 + $0xa9] sm:$0xff] %vm3101_vm5, %v3169_v21  ;;  %v2752_v18 = vadd.f32 %v2682_v23, %v2442_v41  ;;  %v8878_v30 = vrot.slane %v8871_v7, 1  ;;  %6557 = vmatmul.msk.f32.gmra.mxu2 %vm3101_vm5, %v8871_v7 }
 0x2fc   : > { %11069 = vst [vmem:[#allocation39_spill] sm:$0xff] %v8878_v30  ;;  %v3046_v37 = vadd.f32 %v2976_v5, %v2752_v18  ;;  %v8886_v17 = vsel %vm531_vm2, %v3351_v20, %v8878_v30  ;;  %v3354_v5 = vrot.slane %v8890_v6, 1  ;;  %v8911_v20 = vpop.f32.mrf.mxu1 }
 0x2fd   : > { %11070 = vst [vmem:[#allocation32_spill] sm:$0xff] %v8886_v17  ;;  %6524 = vmatmul.msk.f32.gmra.mxu1 %vm3101_vm5, %v8886_v17  ;;  %v2985_v51 = vpop.f32.mrf.mxu0 }
 0x2fe   : > { %v3082_v0 = vadd.f32 %v8516_v15, %v3046_v37  ;;  %6475 = vmatmul.msk.f32.gmra.mxu3 %vm311_vm1, %v8778_v32  ;;  %v11071_v32 = vrot.slane %v8197_v58, 1  ;;  %v3355_v47 = vsel %vm531_vm2, %v8878_v30, %v3354_v5  ;;  %v2444_v58 = vadd.f32 %v8339_v25, %v2149_v33  ;;  %v8921_v24 = vpop.f32.mrf.mxu2 }
 0x2ff   : > { %v2150_v25 = vadd.f32 %v8399_v9, %v8225_v10  ;;  %v3760_v10 = vrot.slane %v8536_v61, 2  ;;  %v11074_v61 = vrot.slane %v8406_v14, 2 }
 0x300   : > { %v3170_v29 = vmax.f32 %v3082_v0, 0.0  ;;  %6610 = vmatmul.msk.f32.vlgmr.msrb.gmra.mxu0 %vm3101_vm5, %v8573_v27  ;;  %v2558_v53 = vsel %vm531_vm2, %v11071_v32, %v2557_v44 }
 0x301   : > { %v2685_v41 = vpop.f32.mrf.mxu3  ;;  %v8901_v21 = vld [vmem:[#allocation3 + $0xa8] sm:$0xff]  ;;  %v2445_v9 = vadd.f32 %v8374_v31, %v2150_v25  ;;  %v3761_v31 = vsel %vm975_vm4, %v11074_v61, %v3760_v10 }
 0x302   : > { %3203 = vst.msk [vmem:[#allocation3 + $0xb1] sm:$0xff] %vm3101_vm5, %v3170_v29  ;;  %v2753_v23 = vadd.f32 %v2685_v41, %v2443_v3  ;;  %6558 = vmatmul.msk.f32.gmra.mxu2 %vm3101_vm5, %v8901_v21  ;;  %v3356_v44 = vrot.slane %v8901_v21, 1 }
 0x304   : > { %v3047_v18 = vadd.f32 %v2979_v35, %v2753_v23  ;;  %v8942_v33 = vpop.f32.mrf.mxu1 }
 0x305   : > { %6525 = vmatmul.msk.f32.gmra.mxu1 %vm3101_vm5, %v3355_v47  ;;  %v2988_v37 = vpop.f32.mrf.mxu0 }
 0x306   : > { %v3083_v0 = vadd.f32 %v8516_v15, %v3047_v18  ;;  %6476 = vmatmul.msk.f32.gmra.mxu3 %vm311_vm1, %v2558_v53 }
 0x308   : > { %v3171_v3 = vmax.f32 %v3083_v0, 0.0  ;;  %6611 = vmatmul.msk.f32.gmra.mxu0 %vm3101_vm5, %v8588_v34 }
 0x309   : > { %v2688_v28 = vpop.f32.mrf.mxu3  ;;  %v8923_v35 = vld [vmem:[#allocation3 + $0xb0] sm:$0xff]  ;;  %v8940_v53 = vld [vmem:[#allocation3 + $0xb8] sm:$0x3] }
 0x30a   : > { %3204 = vst.msk [vmem:[#allocation3 + $0xc1] sm:$0xff] %vm3101_vm5, %v3171_v3  ;;  %v2754_v29 = vadd.f32 %v2688_v28, %v2444_v58  ;;  %v8928_v5 = vrot.slane %v8923_v35, 1  ;;  %6559 = vmatmul.msk.f32.gmra.mxu2 %vm3101_vm5, %v8923_v35  ;;  %v3359_v47 = vrot.slane %v8940_v53, 1  ;;  %v8954_v3 = vpop.f32.mrf.mxu2 }
 0x30c   : > { %11072 = vst [vmem:[#allocation37_spill] sm:$0xff] %v8928_v5  ;;  %v3048_v41 = vadd.f32 %v2982_v39, %v2754_v29  ;;  %v8936_v23 = vsel %vm531_vm2, %v3356_v44, %v8928_v5  ;;  %v3360_v25 = vsel %vm531_vm2, %v8928_v5, %v3359_v47 }
 0x30d   : > { %11073 = vst [vmem:[#allocation30_spill] sm:$0xff] %v8936_v23  ;;  %6526 = vmatmul.msk.f32.gmra.mxu1 %vm3101_vm5, %v8936_v23  ;;  %v2991_v32 = vpop.f32.mrf.mxu0 }
 0x30e   : > { %v3084_v18 = vadd.f32 %v8516_v15, %v3048_v41  ;;  %6577 = vmatmul.msk.f32.vlgmr.msrb.gmra.mxu3 %vm3101_vm5, %v8838_v60  ;;  %v11075_v60 = vld [vmem:[#allocation8_spill] sm:$0xff] }
 0x30f   : > { %v2151_v44 = vadd.f32 %v11075_v60, %v8232_v1  ;;  %v8975_v1 = vrot.slane %v8588_v34, 2  ;;  %v11078_v34 = vld [vmem:[#allocation50_spill] sm:$0xff] }
 0x310   : > { %v3172_v39 = vmax.f32 %v3084_v18, 0.0  ;;  %6612 = vmatmul.msk.f32.gmra.mxu0 %vm3101_vm5, %v8616_v22 }
 0x311   : > { %v2691_v0 = vpop.f32.mrf.mxu3  ;;  %v8952_v58 = vld [vmem:[#allocation3 + $0xc0] sm:$0xff] }
 0x312   : > { %3205 = vst.msk [vmem:[#allocation3 + $0xc9] sm:$0xff] %vm3101_vm5, %v3172_v39  ;;  %v2755_v28 = vadd.f32 %v2691_v0, %v2445_v9  ;;  %6560 = vmatmul.msk.f32.gmra.mxu2 %vm3101_vm5, %v8952_v58  ;;  %v8969_v9 = vpop.f32.mrf.mxu1  ;;  %v11076_v39 = vld [vmem:[#allocation10_spill] sm:$0xff]  ;;  %v3361_v47 = vrot.slane %v8952_v58, 1  ;;  %v8987_v60 = vpop.f32.mrf.mxu2 }
 0x313   : > { %v2446_v14 = vadd.f32 %v11076_v39, %v2151_v44  ;;  %v2152_v44 = vadd.f32 %v8489_v43, %v11078_v34 }
 0x314   : > { %v3049_v29 = vadd.f32 %v2985_v51, %v2755_v28 }
 0x315   : > { %6527 = vmatmul.msk.f32.gmra.mxu1 %vm3101_vm5, %v3360_v25  ;;  %v2994_v41 = vpop.f32.mrf.mxu0  ;;  %v2447_v43 = vadd.f32 %v8475_v52, %v2152_v44  ;;  %v11081_v52 = vld [vmem:[#allocation51_spill] sm:$0xff]  ;;  %v11082_v44 = vld [vmem:[#allocation9_spill] sm:$0xff] }
 0x316   : > { %v3085_v18 = vadd.f32 %v8516_v15, %v3049_v29  ;;  %6578 = vmatmul.msk.f32.gmra.mxu3 %vm3101_vm5, %v3761_v31  ;;  %v3762_v31 = vrot.slane %v8573_v27, 2 }
 0x318   : > { %v3173_v0 = vmax.f32 %v3085_v18, 0.0  ;;  %6613 = vmatmul.msk.f32.gmra.mxu0 %vm3101_vm5, %v8636_v59  ;;  %v8999_v18 = vsel %vm975_vm4, %v3762_v31, %v8975_v1  ;;  %v11080_v31 = vld [vmem:[#allocation27_spill] sm:$0xff] }
 0x319   : > { %v2694_v51 = vpop.f32.mrf.mxu3  ;;  %v8977_v10 = vld [vmem:[#allocation3 + $0xc8] sm:$0xff]  ;;  %v3765_v34 = vrot.slane %v11080_v31, 2 }
 0x31a   : > { %3206 = vst.msk [vmem:[#allocation3 + $0xd9] sm:$0xff] %vm3101_vm5, %v3173_v0  ;;  %v2756_v28 = vadd.f32 %v2694_v51, %v2446_v14  ;;  %v8982_v61 = vrot.slane %v8977_v10, 1  ;;  %6561 = vmatmul.msk.f32.gmra.mxu2 %vm3101_vm5, %v8977_v10  ;;  %v9001_v14 = vld [vmem:[#allocation3 + $0xd0] sm:$0x3]  ;;  %v9007_v0 = vpop.f32.mrf.mxu1 }
 0x31b   : > { %v3364_v51 = vrot.slane %v9001_v14, 1  ;;  %v3766_v31 = vsel %vm975_vm4, %v8975_v1, %v3765_v34 }
 0x31c   : > { %11077 = vst [vmem:[#allocation40_spill] sm:$0xff] %v8982_v61  ;;  %v3050_v29 = vadd.f32 %v2988_v37, %v2756_v28  ;;  %v8993_v25 = vsel %vm531_vm2, %v3361_v47, %v8982_v61 }
 0x31d   : > { %11079 = vst [vmem:[#allocation47_spill] sm:$0xff] %v8993_v25  ;;  %6528 = vmatmul.msk.f32.gmra.mxu1 %vm3101_vm5, %v8993_v25  ;;  %v2997_v39 = vpop.f32.mrf.mxu0  ;;  %v3365_v5 = vsel %vm531_vm2, %v8982_v61, %v3364_v51 }
 0x31e   : > { %v3086_v27 = vadd.f32 %v8516_v15, %v3050_v29  ;;  %6579 = vmatmul.msk.f32.gmra.mxu3 %vm3101_vm5, %v8999_v18 }
 0x320   : > { %v3174_v37 = vmax.f32 %v3086_v27, 0.0  ;;  %6614 = vmatmul.msk.f32.gmra.mxu0 %vm3101_vm5, %v8662_v54  ;;  %v2153_v27 = vadd.f32 %v11082_v44, %v11081_v52  ;;  %v3767_v44 = vrot.slane %v8616_v22, 2 }
 0x321   : > { %v2697_v47 = vpop.f32.mrf.mxu3  ;;  %v9012_v28 = vld [vmem:[#allocation3 + $0xd8] sm:$0xff] }
 0x322   : > { %3207 = vst.msk [vmem:[#allocation3 + $0xe1] sm:$0xff] %vm3101_vm5, %v3174_v37  ;;  %v2757_v29 = vadd.f32 %v2697_v47, %v2447_v43  ;;  %6562 = vmatmul.msk.f32.gmra.mxu2 %vm3101_vm5, %v9012_v28  ;;  %v11083_v37 = vld [vmem:[#allocation14_spill] sm:$0xff]  ;;  %v3366_v34 = vrot.slane %v9012_v28, 1 }
 0x323   : > { %v2448_v47 = vadd.f32 %v11083_v37, %v2153_v27  ;;  %v11086_v27 = vld [vmem:[#allocation15_spill] sm:$0xff] }
 0x324   : > { %v3051_v25 = vadd.f32 %v2991_v32, %v2757_v29  ;;  %v9033_v32 = vrot.slane %v8636_v59, 2  ;;  %v11085_v59 = vld [vmem:[#allocation52_spill] sm:$0xff] }
 0x325   : > { %6529 = vmatmul.msk.f32.gmra.mxu1 %vm3101_vm5, %v3365_v5  ;;  %v9023_v23 = vpop.f32.mrf.mxu2  ;;  %v3000_v30 = vpop.f32.mrf.mxu0 }
 0x326   : > { %v3087_v43 = vadd.f32 %v8516_v15, %v3051_v25  ;;  %6580 = vmatmul.msk.f32.gmra.mxu3 %vm3101_vm5, %v3766_v31  ;;  %v2154_v31 = vadd.f32 %v11086_v27, %v11085_v59 }
 0x328   : > { %v3175_v17 = vmax.f32 %v3087_v43, 0.0  ;;  %6615 = vmatmul.msk.f32.gmra.mxu0 %vm3101_vm5, %v8684_v62 }
 0x329   : > { %v2700_v5 = vpop.f32.mrf.mxu3  ;;  %v9035_v51 = vld [vmem:[#allocation3 + $0xe0] sm:$0xff]  ;;  %v9061_v61 = vld [vmem:[#allocation3 + $0xe8] sm:$0x3] }
 0x32a   : > { %3208 = vst.msk [vmem:[#allocation3 + $0xf1] sm:$0xff] %vm3101_vm5, %v3175_v17  ;;  %v2758_v29 = vadd.f32 %v2700_v5, %v2448_v47  ;;  %v9039_v25 = vpop.f32.mrf.mxu1  ;;  %v9042_v52 = vrot.slane %v9035_v51, 1  ;;  %6563 = vmatmul.msk.f32.gmra.mxu2 %vm3101_vm5, %v9035_v51  ;;  %v9059_v47 = vsel %vm975_vm4, %v3767_v44, %v9033_v32  ;;  %v3369_v59 = vrot.slane %v9061_v61, 1  ;;  %v11091_v44 = vld [vmem:[#allocation46_spill] sm:$0xff] }
 0x32b   : > { %11089 = vst [vmem:[#allocation8_spill] sm:$0xff] %v9059_v47  ;;  %v3770_v57 = vrot.slane %v11091_v44, 2  ;;  %v11096_v44 = vld [vmem:[#allocation19_spill] sm:$0xff] }
 0x32c   : > { %11084 = vst [vmem:[#allocation35_spill] sm:$0xff] %v9042_v52  ;;  %v3052_v43 = vadd.f32 %v2994_v41, %v2758_v29  ;;  %v9051_v17 = vsel %vm531_vm2, %v3366_v34, %v9042_v52  ;;  %v11090_v41 = vld [vmem:[#allocation18_spill] sm:$0xff]  ;;  %v3370_v45 = vsel %vm531_vm2, %v9042_v52, %v3369_v59 }
 0x32d   : > { %11087 = vst [vmem:[#allocation49_spill] sm:$0xff] %v9051_v17  ;;  %6530 = vmatmul.msk.f32.gmra.mxu1 %vm3101_vm5, %v9051_v17  ;;  %v9055_v37 = vpop.f32.mrf.mxu2  ;;  %v3003_v5 = vpop.f32.mrf.mxu0  ;;  %v2449_v34 = vadd.f32 %v11090_v41, %v2154_v31  ;;  %v11093_v31 = vld [vmem:[#allocation53_spill] sm:$0xff] }
 0x32e   : > { %11088 = vst [vmem:[#allocation48_spill] sm:$0xff] %v9055_v37  ;;  %v3088_v22 = vadd.f32 %v8516_v15, %v3052_v43  ;;  %6581 = vmatmul.msk.f32.gmra.mxu3 %vm3101_vm5, %v9059_v47 }
 0x330   : > { %v3176_v29 = vmax.f32 %v3088_v22, 0.0  ;;  %6616 = vmatmul.msk.f32.gmra.mxu0 %vm3101_vm5, %v8719_v2  ;;  %v11094_v22 = vld [vmem:[#allocation29_spill] sm:$0xff] }
 0x331   : > { %v2703_v27 = vpop.f32.mrf.mxu3  ;;  %v9070_v17 = vld [vmem:[#allocation3 + $0xf0] sm:$0xff]  ;;  %v2155_v41 = vadd.f32 %v11094_v22, %v11093_v31  ;;  %v3772_v22 = vrot.slane %v8662_v54, 2 }
 0x332   : > { %3209 = vst.msk [vmem:[#allocation3 + $0xf9] sm:$0xff] %vm3101_vm5, %v3176_v29  ;;  %v2759_v48 = vadd.f32 %v2703_v27, %v2449_v34  ;;  %v9074_v43 = vpop.f32.mrf.mxu1  ;;  %6564 = vmatmul.msk.f32.gmra.mxu2 %vm3101_vm5, %v9070_v17  ;;  %v3771_v29 = vsel %vm975_vm4, %v9033_v32, %v3770_v57  ;;  %v3371_v57 = vrot.slane %v9070_v17, 1 }
 0x333   : > { %11092 = vst [vmem:[#allocation10_spill] sm:$0xff] %v9074_v43  ;;  %v2450_v43 = vadd.f32 %v11096_v44, %v2155_v41  ;;  %v11100_v41 = vld [vmem:[#allocation28_spill] sm:$0xff] }
 0x334   : > { %v3053_v8 = vadd.f32 %v2997_v39, %v2759_v48  ;;  %v9093_v48 = vrot.slane %v8684_v62, 2  ;;  %v11099_v62 = vld [vmem:[#allocation43_spill] sm:$0xff] }
 0x335   : > { %6531 = vmatmul.msk.f32.gmra.mxu1 %vm3101_vm5, %v3370_v45  ;;  %v9083_v37 = vpop.f32.mrf.mxu2  ;;  %v3006_v34 = vpop.f32.mrf.mxu0 }
 0x336   : > { %11095 = vst [vmem:[#allocation50_spill] sm:$0xff] %v9083_v37  ;;  %v3089_v27 = vadd.f32 %v8516_v15, %v3053_v8  ;;  %6582 = vmatmul.msk.f32.gmra.mxu3 %vm3101_vm5, %v3771_v29  ;;  %v2156_v29 = vadd.f32 %v11100_v41, %v11099_v62  ;;  %v9119_v44 = vsel %vm975_vm4, %v3772_v22, %v9093_v48  ;;  %v3775_v22 = vrot.slane %v8706_v50, 2 }
 0x337   : > { %11103 = vst [vmem:[#allocation52_spill] sm:$0xff] %v9119_v44 }
 0x338   : > { %v3177_v47 = vmax.f32 %v3089_v27, 0.0  ;;  %6617 = vmatmul.msk.f32.gmra.mxu0 %vm3101_vm5, %v8751_v26  ;;  %v3776_v50 = vsel %vm975_vm4, %v9093_v48, %v3775_v22 }
 0x339   : > { %v2706_v45 = vpop.f32.mrf.mxu3  ;;  %v9095_v39 = vld [vmem:[#allocation3 + $0xf8] sm:$0xff]  ;;  %v9121_v52 = vld [vmem:[#allocation3 + $0x100] sm:$0x3] }
 0x33a   : > { %3210 = vst.msk [vmem:[#allocation3 + $0x109] sm:$0xff] %vm3101_vm5, %v3177_v47  ;;  %v2760_v59 = vadd.f32 %v2706_v45, %v2450_v43  ;;  %v9099_v8 = vpop.f32.mrf.mxu1  ;;  %v9102_v31 = vrot.slane %v9095_v39, 1  ;;  %6565 = vmatmul.msk.f32.gmra.mxu2 %vm3101_vm5, %v9095_v39  ;;  %v3374_v62 = vrot.slane %v9121_v52, 1 }
 0x33b   : > { %11097 = vst [vmem:[#allocation27_spill] sm:$0xff] %v9099_v8 }
 0x33c   : > { %11098 = vst [vmem:[#allocation51_spill] sm:$0xff] %v9102_v31  ;;  %v3054_v27 = vadd.f32 %v3000_v30, %v2760_v59  ;;  %v9111_v47 = vsel %vm531_vm2, %v3371_v57, %v9102_v31  ;;  %v11105_v30 = vld [vmem:[#allocation44_spill] sm:$0xff] }
 0x33d   : > { %11101 = vst [vmem:[#allocation9_spill] sm:$0xff] %v9111_v47  ;;  %6532 = vmatmul.msk.f32.gmra.mxu1 %vm3101_vm5, %v9111_v47  ;;  %v9115_v43 = vpop.f32.mrf.mxu2  ;;  %v3009_v45 = vpop.f32.mrf.mxu0  ;;  %v2451_v57 = vadd.f32 %v11105_v30, %v2156_v29  ;;  %v11107_v29 = vld [vmem:[#allocation4_spill] sm:$0xff] }
 0x33e   : > { %11102 = vst [vmem:[#allocation14_spill] sm:$0xff] %v9115_v43  ;;  %v3090_v54 = vadd.f32 %v8516_v15, %v3054_v27  ;;  %6583 = vmatmul.msk.f32.gmra.mxu3 %vm3101_vm5, %v9119_v44 }
 0x33f   : > { %11104 = vst [vmem:[#allocation15_spill] sm:$0xff] %v9121_v52  ;;  %v3375_v52 = vsel %vm531_vm2, %v9102_v31, %v3374_v62  ;;  %v3780_v31 = vrot.slane %v8773_v55, 2 }
 0x340   : > { %v3178_v59 = vmax.f32 %v3090_v54, 0.0  ;;  %6618 = vmatmul.msk.f32.gmra.mxu0 %vm3101_vm5, %v8790_v16  ;;  %v11108_v54 = vld [vmem:[#allocation34_spill] sm:$0xff] }
 0x341   : > { %v2709_v41 = vpop.f32.mrf.mxu3  ;;  %v9130_v47 = vld [vmem:[#allocation3 + $0x108] sm:$0xff]  ;;  %v2157_v30 = vadd.f32 %v11108_v54, %v11107_v29  ;;  %v3777_v29 = vrot.slane %v8719_v2, 2  ;;  %v11113_v54 = vld [vmem:[#allocation38_spill] sm:$0xff]  ;;  %v9186_v2 = vld [vmem:[%s10748_s2] ss:$0 sm:$0xff] }
 0x342   : > { %3211 = vst.msk [vmem:[#allocation3 + $0x111] sm:$0xff] %vm3101_vm5, %v3178_v59  ;;  %v2761_v43 = vadd.f32 %v2709_v41, %v2451_v57  ;;  %v9134_v27 = vpop.f32.mrf.mxu1  ;;  %6566 = vmatmul.msk.f32.gmra.mxu2 %vm3101_vm5, %v9130_v47  ;;  %v11110_v41 = vld [vmem:[#allocation36_spill] sm:$0xff]  ;;  %v3376_v62 = vrot.slane %v9130_v47, 1 }
 0x343   : > { %11106 = vst [vmem:[#allocation18_spill] sm:$0xff] %v9134_v27  ;;  %v2452_v27 = vadd.f32 %v11110_v41, %v2157_v30 }
 0x344   : > { %v3055_v44 = vadd.f32 %v3003_v5, %v2761_v43  ;;  %v9153_v5 = vrot.slane %v8751_v26, 2  ;;  %v11112_v26 = vld [vmem:[#allocation6_spill] sm:$0xff] }
 0x345   : > { %6533 = vmatmul.msk.f32.gmra.mxu1 %vm3101_vm5, %v3375_v52  ;;  %v9143_v37 = vpop.f32.mrf.mxu2  ;;  %v3012_v57 = vpop.f32.mrf.mxu0  ;;  %v2158_v30 = vadd.f32 %v11113_v54, %v11112_v26 }
 0x346   : > { %11109 = vst [vmem:[#allocation46_spill] sm:$0xff] %v9143_v37  ;;  %v3091_v59 = vadd.f32 %v8516_v15, %v3055_v44  ;;  %6584 = vmatmul.msk.f32.gmra.mxu3 %vm3101_vm5, %v3776_v50  ;;  %v3781_v55 = vsel %vm975_vm4, %v9153_v5, %v3780_v31 }
 0x348   : > { %v3179_v8 = vmax.f32 %v3091_v59, 0.0  ;;  %6619 = vmatmul.msk.f32.gmra.mxu0 %vm3101_vm5, %v8813_v13  ;;  %v9179_v59 = vsel %vm975_vm4, %v3777_v29, %v9153_v5 }
 0x349   : > { %v2712_v52 = vpop.f32.mrf.mxu3  ;;  %v9155_v43 = vld [vmem:[#allocation3 + $0x110] sm:$0xff]  ;;  %11116 = vst [vmem:[#allocation43_spill] sm:$0xff] %v9179_v59 }
 0x34a   : > { %3212 = vst.msk [vmem:[#allocation3 + $0x121] sm:$0xff] %vm3101_vm5, %v3179_v8  ;;  %v2762_v22 = vadd.f32 %v2712_v52, %v2452_v27  ;;  %v9159_v15 = vpop.f32.mrf.mxu1  ;;  %v9162_v44 = vrot.slane %v9155_v43, 1  ;;  %6567 = vmatmul.msk.f32.gmra.mxu2 %vm3101_vm5, %v9155_v43  ;;  %v9181_v52 = vld [vmem:[#allocation3 + $0x118] sm:$0x3] }
 0x34b   : > { %11117 = vst [vmem:[#allocation28_spill] sm:$0xff] %v9181_v52  ;;  %v3379_v54 = vrot.slane %v9181_v52, 1 }
 0x34c   : > { %11111 = vst [vmem:[#allocation53_spill] sm:$0xff] %v9162_v44  ;;  %v3056_v50 = vadd.f32 %v3006_v34, %v2762_v22  ;;  %v9171_v8 = vsel %vm531_vm2, %v3376_v62, %v9162_v44  ;;  %v11118_v62 = vld [vmem:[#allocation13_spill] sm:$0xff] }
 0x34d   : > { %11114 = vst [vmem:[#allocation29_spill] sm:$0xff] %v9171_v8  ;;  %6534 = vmatmul.msk.f32.gmra.mxu1 %vm3101_vm5, %v9171_v8  ;;  %v9175_v27 = vpop.f32.mrf.mxu2  ;;  %v3015_v41 = vpop.f32.mrf.mxu0  ;;  %v2453_v22 = vadd.f32 %v11118_v62, %v2158_v30  ;;  %v11120_v30 = vld [vmem:[#allocation45_spill] sm:$0xff] }
 0x34e   : > { %11115 = vst [vmem:[#allocation19_spill] sm:$0xff] %v9175_v27  ;;  %v3092_v34 = vadd.f32 %v9186_v2, %v3056_v50  ;;  %6585 = vmatmul.msk.f32.gmra.mxu3 %vm3101_vm5, %v9179_v59  ;;  %v3380_v59 = vsel %vm531_vm2, %v9162_v44, %v3379_v54 }
 0x350   : > { %v3180_v26 = vmax.f32 %v3092_v34, 0.0  ;;  %6620 = vmatmul.msk.f32.gmra.mxu0 %vm3101_vm5, %v8849_v4  ;;  %v2159_v34 = vadd.f32 %v8722_v49, %v11120_v30  ;;  %v9218_v49 = vrot.slane %v8813_v13, 2  ;;  %v11123_v13 = vld [vmem:[#allocation7_spill] sm:$0xff] }
 0x351   : > { %v2715_v29 = vpop.f32.mrf.mxu3  ;;  %v9195_v8 = vld [vmem:[#allocation3 + $0x120] sm:$0xff] }
 0x352   : > { %3213 = vst.msk [vmem:[#allocation3 + $0x129] sm:$0xff] %vm3101_vm5, %v3180_v26  ;;  %v2763_v27 = vadd.f32 %v2715_v29, %v2453_v22  ;;  %v9199_v50 = vpop.f32.mrf.mxu1  ;;  %6568 = vmatmul.msk.f32.gmra.mxu2 %vm3101_vm5, %v9195_v8  ;;  %v11121_v29 = vld [vmem:[#allocation33_spill] sm:$0xff]  ;;  %v3381_v31 = vrot.slane %v9195_v8, 1 }
 0x353   : > { %11119 = vst [vmem:[#allocation44_spill] sm:$0xff] %v9199_v50  ;;  %v2454_v50 = vadd.f32 %v11121_v29, %v2159_v34  ;;  %v3782_v34 = vrot.slane %v8790_v16, 2 }
 0x354   : > { %v3057_v62 = vadd.f32 %v3009_v45, %v2763_v27 }
 0x355   : > { %6535 = vmatmul.msk.f32.gmra.mxu1 %vm3101_vm5, %v3380_v59  ;;  %v9208_v52 = vpop.f32.mrf.mxu2  ;;  %v3018_v22 = vpop.f32.mrf.mxu0 }
 0x356   : > { %v3093_v26 = vadd.f32 %v9186_v2, %v3057_v62  ;;  %6586 = vmatmul.msk.f32.gmra.mxu3 %vm3101_vm5, %v3781_v55  ;;  %v2160_v62 = vadd.f32 %v8762_v12, %v11123_v13 }
 0x358   : > { %v3181_v37 = vmax.f32 %v3093_v26, 0.0  ;;  %6621 = vmatmul.msk.f32.gmra.mxu0 %vm3101_vm5, %v8871_v7  ;;  %v9244_v26 = vsel %vm975_vm4, %v3782_v34, %v9218_v49  ;;  %v2455_v12 = vadd.f32 %v8745_v36, %v2160_v62  ;;  %v3785_v34 = vrot.slane %v8833_v40, 2  ;;  %v11126_v36 = vld [vmem:[#allocation12_spill] sm:$0xff] }
 0x359   : > { %v2718_v45 = vpop.f32.mrf.mxu3  ;;  %v9220_v27 = vld [vmem:[#allocation3 + $0x128] sm:$0xff]  ;;  %v2161_v62 = vadd.f32 %v8805_v38, %v11126_v36 }
 0x35a   : > { %3214 = vst.msk [vmem:[#allocation3 + $0x139] sm:$0xff] %vm3101_vm5, %v3181_v37  ;;  %v2764_v59 = vadd.f32 %v2718_v45, %v2454_v50  ;;  %v9224_v54 = vpop.f32.mrf.mxu1  ;;  %v9227_v30 = vrot.slane %v9220_v27, 1  ;;  %6569 = vmatmul.msk.f32.gmra.mxu2 %vm3101_vm5, %v9220_v27  ;;  %v9246_v45 = vld [vmem:[#allocation3 + $0x130] sm:$0x3]  ;;  %v3786_v40 = vsel %vm975_vm4, %v9218_v49, %v3785_v34 }
 0x35c   : > { %11122 = vst [vmem:[#allocation4_spill] sm:$0xff] %v9227_v30  ;;  %v3058_v55 = vadd.f32 %v3012_v57, %v2764_v59  ;;  %v9236_v37 = vsel %vm531_vm2, %v3381_v31, %v9227_v30  ;;  %v3384_v31 = vrot.slane %v9246_v45, 1 }
 0x35d   : > { %11124 = vst [vmem:[#allocation34_spill] sm:$0xff] %v9236_v37  ;;  %6536 = vmatmul.msk.f32.gmra.mxu1 %vm3101_vm5, %v9236_v37  ;;  %v9240_v50 = vpop.f32.mrf.mxu2  ;;  %v3021_v29 = vpop.f32.mrf.mxu0 }
 0x35e   : > { %11125 = vst [vmem:[#allocation36_spill] sm:$0xff] %v9240_v50  ;;  %v3094_v16 = vadd.f32 %v9186_v2, %v3058_v55  ;;  %6587 = vmatmul.msk.f32.gmra.mxu3 %vm3101_vm5, %v9244_v26  ;;  %v3385_v44 = vsel %vm531_vm2, %v9227_v30, %v3384_v31 }
 0x360   : > { %v3182_v57 = vmax.f32 %v3094_v16, 0.0  ;;  %6622 = vmatmul.msk.f32.gmra.mxu0 %vm3101_vm5, %v8901_v21 }
 0x361   : > { %v2721_v59 = vpop.f32.mrf.mxu3  ;;  %v9255_v13 = vld [vmem:[#allocation3 + $0x138] sm:$0xff] }
 0x362   : > { %3215 = vst.msk [vmem:[#allocation3 + $0x141] sm:$0xff] %vm3101_vm5, %v3182_v57  ;;  %v2765_v37 = vadd.f32 %v2721_v59, %v2455_v12  ;;  %v9259_v55 = vpop.f32.mrf.mxu1  ;;  %6570 = vmatmul.msk.f32.gmra.mxu2 %vm3101_vm5, %v9255_v13  ;;  %v2456_v59 = vadd.f32 %v8788_v42, %v2161_v62  ;;  %v3386_v31 = vrot.slane %v9255_v13, 1  ;;  %v3787_v42 = vrot.slane %v8849_v4, 2 }
 0x364   : > { %v3059_v16 = vadd.f32 %v3015_v41, %v2765_v37  ;;  %v9280_v41 = vrot.slane %v8871_v7, 2  ;;  %v11128_v7 = vld [vmem:[#allocation42_spill] sm:$0xff] }
 0x365   : > { %6537 = vmatmul.msk.f32.gmra.mxu1 %vm3101_vm5, %v3385_v44  ;;  %v9268_v50 = vpop.f32.mrf.mxu2  ;;  %v9272_v12 = vpop.f32.mrf.mxu0  ;;  %v2162_v62 = vadd.f32 %v8844_v56, %v11128_v7 }
 0x366   : > { %v3095_v57 = vadd.f32 %v9186_v2, %v3059_v16  ;;  %6588 = vmatmul.msk.f32.gmra.mxu3 %vm3101_vm5, %v3786_v40 }
 0x368   : > { %v3183_v38 = vmax.f32 %v3095_v57, 0.0  ;;  %6623 = vmatmul.msk.f32.gmra.mxu0 %vm3101_vm5, %v8923_v35 }
 0x369   : > { %v2724_v44 = vpop.f32.mrf.mxu3  ;;  %v9282_v37 = vld [vmem:[#allocation3 + $0x140] sm:$0xff]  ;;  %v9310_v4 = vld [vmem:[#allocation3 + $0x148] sm:$0x3] }
 0x36a   : > { %3216 = vst.msk [vmem:[#allocation3 + $0x151] sm:$0xff] %vm3101_vm5, %v3183_v38  ;;  %v2766_v34 = vadd.f32 %v2724_v44, %v2456_v59  ;;  %v9286_v36 = vpop.f32.mrf.mxu1  ;;  %v9289_v16 = vrot.slane %v9282_v37, 1  ;;  %6571 = vmatmul.msk.f32.gmra.mxu2 %vm3101_vm5, %v9282_v37  ;;  %v9306_v38 = vsel %vm975_vm4, %v3787_v42, %v9280_v41 }
 0x36b   : > { %11131 = vst [vmem:[#allocation45_spill] sm:$0xff] %v9306_v38 }
 0x36c   : > { %11127 = vst [vmem:[#allocation6_spill] sm:$0xff] %v9289_v16  ;;  %v3060_v40 = vadd.f32 %v3018_v22, %v2766_v34  ;;  %v9298_v57 = vsel %vm531_vm2, %v3386_v31, %v9289_v16  ;;  %v2457_v22 = vadd.f32 %v8822_v63, %v2162_v62  ;;  %v3389_v34 = vrot.slane %v9310_v4, 1  ;;  %v6708_v63 = vld [vmem:[%s10749_s3 + $0x30] sm:$0xff]  ;;  %v11132_v62 = vld [vmem:[#allocation5_spill] sm:$0xff] }
 0x36d   : > { %11129 = vst [vmem:[#allocation38_spill] sm:$0xff] %v9298_v57  ;;  %6538 = vmatmul.msk.f32.gmra.mxu1 %vm3101_vm5, %v9298_v57  ;;  %v9302_v59 = vpop.f32.mrf.mxu2  ;;  %v9308_v44 = vpop.f32.mrf.mxu0  ;;  %v3790_v57 = vrot.slane %v8890_v6, 2  ;;  %5097 = vmatpush.msra.mxu3 %v6708_v63 }
 0x36e   : > { %11130 = vst [vmem:[#allocation13_spill] sm:$0xff] %v9302_v59  ;;  %v3096_v56 = vadd.f32 %v9186_v2, %v3060_v40  ;;  %6589 = vmatmul.msk.f32.gmra.mxu3 %vm3101_vm5, %v9306_v38  ;;  %v3390_v38 = vsel %vm531_vm2, %v9289_v16, %v3389_v34 }
 0x370   : > { %v3184_v31 = vmax.f32 %v3096_v56, 0.0  ;;  %6624 = vmatmul.msk.f32.gmra.mxu0 %vm3101_vm5, %v8952_v58  ;;  %v2163_v56 = vadd.f32 %v8873_v19, %v11132_v62 }
 0x371   : > { %v2727_v7 = vpop.f32.mrf.mxu3  ;;  %v9319_v42 = vld [vmem:[#allocation3 + $0x150] sm:$0xff] }
 0x372   : > { %3217 = vst.msk [vmem:[#allocation3 + $0x159] sm:$0xff] %vm3101_vm5, %v3184_v31  ;;  %v2767_v30 = vadd.f32 %v2727_v7, %v2457_v22  ;;  %v9323_v40 = vpop.f32.mrf.mxu1  ;;  %6572 = vmatmul.msk.f32.gmra.mxu2 %vm3101_vm5, %v9319_v42  ;;  %v3791_v22 = vsel %vm975_vm4, %v9280_v41, %v3790_v57  ;;  %v2458_v19 = vadd.f32 %v8861_v46, %v2163_v56  ;;  %v3391_v57 = vrot.slane %v9319_v42, 1  ;;  %v5861_v46 = vld [vmem:[%s10751_s5] sm:$0xf]  ;;  %v6741_v56 = vld [vmem:[%s10749_s3 + $0x38] sm:$0xff] }
 0x373   : > { %6807 = vmatpush.msk.msra.mxu2 %vm676_vm0, %v5861_v46  ;;  %5404 = vmatpush.msra.mxu0 %v6741_v56 }
 0x374   : > { %v3061_v59 = vadd.f32 %v3021_v29, %v2767_v30  ;;  %v9347_v29 = vrot.slane %v8923_v35, 2  ;;  %v3792_v35 = vrot.slane %v8901_v21, 2 }
 0x375   : > { %6539 = vmatmul.msk.f32.gmra.mxu1 %vm3101_vm5, %v3390_v38  ;;  %v9335_v6 = vpop.f32.mrf.mxu2  ;;  %v9339_v31 = vpop.f32.mrf.mxu0 }
 0x376   : > { %v3097_v7 = vadd.f32 %v9186_v2, %v3061_v59  ;;  %6590 = vmatmul.msk.f32.gmra.mxu3 %vm3101_vm5, %v3791_v22  ;;  %v11134_v22 = vld [vmem:[#allocation11_spill] sm:$0xff] }
 0x378   : > { %v3185_v30 = vmax.f32 %v3097_v7, 0.0  ;;  %6625 = vmatmul.msk.f32.gmra.mxu0 %vm3101_vm5, %v8977_v10  ;;  %v2164_v7 = vadd.f32 %v8911_v20, %v11134_v22  ;;  %v6774_v20 = vld [vmem:[%s10749_s3 + $0x40] sm:$0xff] }
 0x379   : > { %v2730_v38 = vpop.f32.mrf.mxu3  ;;  %v9349_v34 = vld [vmem:[#allocation3 + $0x158] sm:$0xff]  ;;  %v9383_v16 = vld [vmem:[#allocation3 + $0x160] sm:$0x3]  ;;  %5695 = vmatpush.msra.mxu1 %v6774_v20 }
 0x37a   : > { %3218 = vst.msk [vmem:[#allocation3 + $0x169] sm:$0xff] %vm3101_vm5, %v3185_v30  ;;  %v2768_v63 = vadd.f32 %v2730_v38, %v2458_v19  ;;  %v9353_v59 = vpop.f32.mrf.mxu1  ;;  %v9356_v62 = vrot.slane %v9349_v34, 1  ;;  %6573 = vmatmul.msk.f32.gmra.mxu2 %vm3101_vm5, %v9349_v34  ;;  %v9381_v38 = vsel %vm975_vm4, %v3792_v35, %v9347_v29  ;;  %v3394_v56 = vrot.slane %v9383_v16, 1 }
 0x37b   : > { %11137 = vst [vmem:[#allocation42_spill] sm:$0xff] %v9381_v38 }
 0x37c   : > { %11133 = vst [vmem:[#allocation33_spill] sm:$0xff] %v9356_v62  ;;  %v3062_v19 = vadd.f32 %v9272_v12, %v2768_v63  ;;  %v9373_v30 = vsel %vm531_vm2, %v3391_v57, %v9356_v62  ;;  %v2459_v57 = vadd.f32 %v8895_v11, %v2164_v7  ;;  %v11138_v11 = vld [vmem:[#allocation20_spill] sm:$0xff] }
 0x37d   : > { %11135 = vst [vmem:[#allocation7_spill] sm:$0xff] %v9373_v30  ;;  %6540 = vmatmul.msk.f32.gmra.mxu1 %vm3101_vm5, %v9373_v30  ;;  %v9377_v21 = vpop.f32.mrf.mxu2  ;;  %v4209_v46 = vpop.f32.mrf.mxu0  ;;  %v3795_v30 = vrot.slane %v8940_v53, 2  ;;  %v2165_v7 = vadd.f32 %v8942_v33, %v11138_v11 }
 0x37e   : > { %11136 = vst [vmem:[#allocation12_spill] sm:$0xff] %v9377_v21  ;;  %v3098_v12 = vadd.f32 %v9186_v2, %v3062_v19  ;;  %6591 = vmatmul.msk.f32.gmra.mxu3 %vm3101_vm5, %v9381_v38 }
 0x37f   : > { %v3796_v53 = vsel %vm975_vm4, %v9347_v29, %v3795_v30 }
 0x380   : > { %v3186_v63 = vmax.f32 %v3098_v12, 0.0  ;;  %6626 = vmatmul.msk.f32.gmra.mxu0 %vm3101_vm5, %v9012_v28  ;;  %v3395_v12 = vsel %vm531_vm2, %v9356_v62, %v3394_v56 }
 0x381   : > { %v2733_v35 = vpop.f32.mrf.mxu3  ;;  %v9395_v22 = vld [vmem:[#allocation3 + $0x168] sm:$0xff] }
 0x382   : > { %3219 = vst.msk [vmem:[#allocation3 + $0x171] sm:$0xff] %vm3101_vm5, %v3186_v63  ;;  %v2769_v19 = vadd.f32 %v2733_v35, %v2459_v57  ;;  %v9399_v21 = vpop.f32.mrf.mxu1  ;;  %6574 = vmatmul.msk.f32.gmra.mxu2 %vm3101_vm5, %v9395_v22  ;;  %v2460_v35 = vadd.f32 %v8921_v24, %v2165_v7  ;;  %v3396_v30 = vrot.slane %v9395_v22, 1  ;;  %v3797_v24 = vrot.slane %v8952_v58, 2 }
 0x384   : > { %v3063_v20 = vadd.f32 %v9308_v44, %v2769_v19  ;;  %v9419_v44 = vrot.slane %v8977_v10, 2 }
 0x385   : > { %6541 = vmatmul.msk.f32.gmra.mxu1 %vm3101_vm5, %v3395_v12  ;;  %v9409_v38 = vpop.f32.mrf.mxu2  ;;  %v4212_v57 = vpop.f32.mrf.mxu0 }
 0x386   : > { %v3099_v63 = vadd.f32 %v9186_v2, %v3063_v20  ;;  %6592 = vmatmul.msk.f32.gmra.mxu3 %vm3101_vm5, %v3796_v53 }
 0x388   : > { %v3187_v33 = vmax.f32 %v3099_v63, 0.0  ;;  %6627 = vmatmul.msk.f32.gmra.mxu0 %vm3101_vm5, %v9035_v51  ;;  %v9444_v63 = vsel %vm975_vm4, %v3797_v24, %v9419_v44  ;;  %v3800_v24 = vrot.slane %v9001_v14, 2 }
 0x389   : > { %v2736_v56 = vpop.f32.mrf.mxu3  ;;  %v9421_v19 = vld [vmem:[#allocation3 + $0x170] sm:$0xff] }
 0x38a   : > { %3220 = vst.msk [vmem:[#allocation3 + $0x181] sm:$0xff] %vm3101_vm5, %v3187_v33  ;;  %v2770_v11 = vadd.f32 %v2736_v56, %v2460_v35  ;;  %v9425_v20 = vpop.f32.mrf.mxu1  ;;  %v9428_v12 = vrot.slane %v9421_v19, 1  ;;  %6575 = vmatmul.msk.f32.gmra.mxu2 %vm3101_vm5, %v9421_v19  ;;  %v9446_v33 = vld [vmem:[#allocation3 + $0x178] sm:$0x3]  ;;  %v3801_v14 = vsel %vm975_vm4, %v9419_v44, %v3800_v24  ;;  %v3802_v24 = vrot.slane %v9012_v28, 2 }
 0x38c   : > { %11139 = vst [vmem:[#allocation5_spill] sm:$0xff] %v9428_v12  ;;  %v3064_v10 = vadd.f32 %v9339_v31, %v2770_v11  ;;  %v9436_v7 = vsel %vm531_vm2, %v3396_v30, %v9428_v12  ;;  %v3660_v31 = vadd.f32 %v8954_v3, %v8969_v9  ;;  %v3399_v30 = vrot.slane %v9446_v33, 1 }
 0x38d   : > { %11140 = vst [vmem:[#allocation11_spill] sm:$0xff] %v9436_v7  ;;  %6542 = vmatmul.msk.f32.gmra.mxu1 %vm3101_vm5, %v9436_v7  ;;  %v9440_v53 = vpop.f32.mrf.mxu2  ;;  %v4215_v35 = vpop.f32.mrf.mxu0 }
 0x38e   : > { %v3100_v58 = vadd.f32 %v9186_v2, %v3064_v10  ;;  %6593 = vmatmul.msk.f32.gmra.mxu3 %vm3101_vm5, %v9444_v63  ;;  %v4048_v2 = vld [vmem:[#allocation3 + $0x28] sm:$0x3]  ;;  %v3400_v3 = vsel %vm531_vm2, %v9428_v12, %v3399_v30 }
 0x390   : > { %v3188_v56 = vmax.f32 %v3100_v58, 0.0  ;;  %6628 = vmatmul.msk.f32.gmra.mxu0 %vm3101_vm5, %v9070_v17  ;;  %v4649_v58 = vrot.slane %v4048_v2, 2 }
 0x391   : > { %v3918_v11 = vpop.f32.mrf.mxu3 }
 0x392   : > { %3221 = vst.msk [vmem:[#allocation3 + $0x189] sm:$0xff] %vm3101_vm5, %v3188_v56  ;;  %v4014_v7 = vadd.f32 %v3918_v11, %v3660_v31  ;;  %v9458_v62 = vpop.f32.mrf.mxu1  ;;  %6676 = vmatmul.msk.f32.vlgmr.msrb.gmra.mxu2 %vm3101_vm5, %v8999_v18  ;;  %v3663_v18 = vadd.f32 %v8987_v60, %v9007_v0  ;;  %v4650_v56 = vsel %vm975_vm4, %v8975_v1, %v4649_v58  ;;  %v11142_v0 = vld [vmem:[#allocation17_spill] sm:$0xff]  ;;  %v4358_v58 = vrot.slane %v4048_v2, 1 }
 0x393   : > { %v3666_v1 = vadd.f32 %v9023_v23, %v9039_v25 }
 0x394   : > { %v9464_v9 = vadd.f32 %v4209_v46, %v4014_v7  ;;  %v9477_v46 = vrot.slane %v9035_v51, 2 }
 0x395   : > { %6543 = vmatmul.msk.f32.gmra.mxu1 %vm3101_vm5, %v3400_v3  ;;  %v9467_v10 = vpop.f32.mrf.mxu2  ;;  %v4218_v31 = vpop.f32.mrf.mxu0 }
 0x396   : > { %6594 = vmatmul.msk.f32.gmra.mxu3 %vm3101_vm5, %v3801_v14  ;;  %v9493_v51 = vsel %vm975_vm4, %v3802_v24, %v9477_v46  ;;  %v11144_v24 = vld [vmem:[#allocation24_spill] sm:$0xff] }
 0x398   : > { %6629 = vmatmul.msk.f32.gmra.mxu0 %vm3101_vm5, %v9095_v39 }
 0x399   : > { %v3921_v7 = vpop.f32.mrf.mxu3 }
 0x39a   : > { %v4015_v30 = vadd.f32 %v3921_v7, %v3663_v18  ;;  %v9481_v11 = vpop.f32.mrf.mxu1  ;;  %6677 = vmatmul.msk.f32.gmra.mxu2 %vm3101_vm5, %v4650_v56  ;;  %v11143_v56 = vld [vmem:[#allocation8_spill] sm:$0xff] }
 0x39c   : > { %v9485_v3 = vadd.f32 %v4212_v57, %v4015_v30  ;;  %v3805_v57 = vrot.slane %v9061_v61, 2  ;;  %v4051_v30 = vld [vmem:[#allocation3 + $0x40] sm:$0x3] }
 0x39d   : > { %v9487_v60 = vpop.f32.mrf.mxu2  ;;  %6643 = vmatmul.msk.f32.vlgmr.msrb.gmra.mxu1 %vm3101_vm5, %v11142_v0  ;;  %v4221_v14 = vpop.f32.mrf.mxu0  ;;  %v4359_v0 = vsel %vm531_vm2, %v11144_v24, %v4358_v58  ;;  %v4654_v61 = vrot.slane %v4051_v30, 2 }
 0x39e   : > { %11141 = vst [vmem:[#allocation20_spill] sm:$0xff] %v9485_v3  ;;  %6595 = vmatmul.msk.f32.gmra.mxu3 %vm3101_vm5, %v9493_v51  ;;  %v3806_v25 = vsel %vm975_vm4, %v9477_v46, %v3805_v57  ;;  %v3807_v57 = vrot.slane %v9070_v17, 2 }
 0x3a0   : > { %6630 = vmatmul.msk.f32.gmra.mxu0 %vm3101_vm5, %v9130_v47 }
 0x3a1   : > { %v3924_v28 = vpop.f32.mrf.mxu3 }
 0x3a2   : > { %v4016_v18 = vadd.f32 %v3924_v28, %v3666_v1  ;;  %v9502_v7 = vpop.f32.mrf.mxu1  ;;  %6678 = vmatmul.msk.f32.gmra.mxu2 %vm3101_vm5, %v11143_v56  ;;  %v11146_v1 = vld [vmem:[#allocation10_spill] sm:$0xff]  ;;  %v11147_v28 = vld [vmem:[#allocation48_spill] sm:$0xff] }
 0x3a3   : > { %v3669_v56 = vadd.f32 %v11147_v28, %v11146_v1  ;;  %v11150_v28 = vld [vmem:[#allocation25_spill] sm:$0xff] }
 0x3a4   : > { %v9508_v12 = vadd.f32 %v4215_v35, %v4016_v18  ;;  %v9521_v35 = vrot.slane %v9095_v39, 2  ;;  %v4655_v18 = vsel %vm975_vm4, %v9033_v32, %v4654_v61  ;;  %v11152_v32 = vld [vmem:[#allocation27_spill] sm:$0xff]  ;;  %v11153_v61 = vld [vmem:[#allocation50_spill] sm:$0xff] }
 0x3a5   : > { %v9510_v23 = vpop.f32.mrf.mxu2  ;;  %6644 = vmatmul.msk.f32.gmra.mxu1 %vm3101_vm5, %v4359_v0  ;;  %v4224_v2 = vpop.f32.mrf.mxu0 }
 0x3a6   : > { %11145 = vst [vmem:[#allocation17_spill] sm:$0xff] %v9508_v12  ;;  %6596 = vmatmul.msk.f32.gmra.mxu3 %vm3101_vm5, %v3806_v25  ;;  %v9537_v39 = vsel %vm975_vm4, %v3807_v57, %v9521_v35  ;;  %v4054_v57 = vld [vmem:[#allocation3 + $0x58] sm:$0x3] }
 0x3a7   : > { %11151 = vst [vmem:[#allocation10_spill] sm:$0xff] %v9537_v39 }
 0x3a8   : > { %6631 = vmatmul.msk.f32.gmra.mxu0 %vm3101_vm5, %v9155_v43 }
 0x3a9   : > { %v3927_v58 = vpop.f32.mrf.mxu3 }
 0x3aa   : > { %v4017_v24 = vadd.f32 %v3927_v58, %v3669_v56  ;;  %v9525_v0 = vpop.f32.mrf.mxu1  ;;  %6679 = vmatmul.msk.f32.gmra.mxu2 %vm3101_vm5, %v4655_v18  ;;  %v3672_v56 = vadd.f32 %v11153_v61, %v11152_v32  ;;  %v4363_v58 = vrot.slane %v4051_v30, 1  ;;  %v4659_v61 = vrot.slane %v4054_v57, 2 }
 0x3ac   : > { %v9529_v25 = vadd.f32 %v4218_v31, %v4017_v24  ;;  %v11154_v31 = vld [vmem:[#allocation15_spill] sm:$0xff] }
 0x3ad   : > { %v9531_v1 = vpop.f32.mrf.mxu2  ;;  %6645 = vmatmul.msk.f32.gmra.mxu1 %vm3101_vm5, %v11150_v28  ;;  %v4227_v12 = vpop.f32.mrf.mxu0  ;;  %v3810_v18 = vrot.slane %v11154_v31, 2  ;;  %v11159_v31 = vld [vmem:[#allocation14_spill] sm:$0xff] }
 0x3ae   : > { %11148 = vst [vmem:[#allocation8_spill] sm:$0xff] %v9529_v25  ;;  %6597 = vmatmul.msk.f32.gmra.mxu3 %vm3101_vm5, %v9537_v39  ;;  %v11155_v25 = vld [vmem:[#allocation52_spill] sm:$0xff] }
 0x3af   : > { %11149 = vst [vmem:[#allocation24_spill] sm:$0xff] %v9531_v1  ;;  %v11156_v1 = vld [vmem:[#allocation31_spill] sm:$0xff]  ;;  %v3811_v30 = vsel %vm975_vm4, %v9521_v35, %v3810_v18  ;;  %v3812_v18 = vrot.slane %v9130_v47, 2 }
 0x3b0   : > { %6632 = vmatmul.msk.f32.gmra.mxu0 %vm3101_vm5, %v9195_v8  ;;  %v4364_v3 = vsel %vm531_vm2, %v11156_v1, %v4363_v58 }
 0x3b1   : > { %v3930_v17 = vpop.f32.mrf.mxu3 }
 0x3b2   : > { %v4018_v24 = vadd.f32 %v3930_v17, %v3672_v56  ;;  %v9546_v28 = vpop.f32.mrf.mxu1  ;;  %6680 = vmatmul.msk.f32.gmra.mxu2 %vm3101_vm5, %v11155_v25  ;;  %v11158_v17 = vld [vmem:[#allocation18_spill] sm:$0xff] }
 0x3b3   : > { %v3675_v25 = vadd.f32 %v11159_v31, %v11158_v17  ;;  %v11162_v31 = vld [vmem:[#allocation23_spill] sm:$0xff] }
 0x3b4   : > { %v9552_v39 = vadd.f32 %v4221_v14, %v4018_v24  ;;  %v9565_v14 = vrot.slane %v9155_v43, 2 }
 0x3b5   : > { %v9554_v32 = vpop.f32.mrf.mxu2  ;;  %6646 = vmatmul.msk.f32.gmra.mxu1 %vm3101_vm5, %v4364_v3  ;;  %v4230_v56 = vpop.f32.mrf.mxu0  ;;  %v4660_v3 = vsel %vm975_vm4, %v9093_v48, %v4659_v61  ;;  %v11164_v48 = vld [vmem:[#allocation46_spill] sm:$0xff] }
 0x3b6   : > { %11157 = vst [vmem:[#allocation48_spill] sm:$0xff] %v9552_v39  ;;  %6598 = vmatmul.msk.f32.gmra.mxu3 %vm3101_vm5, %v3811_v30  ;;  %v9581_v43 = vsel %vm975_vm4, %v3812_v18, %v9565_v14  ;;  %v3678_v61 = vadd.f32 %v11164_v48, %v9159_v15  ;;  %v4057_v18 = vld [vmem:[#allocation3 + $0x70] sm:$0x3] }
 0x3b7   : > { %11163 = vst [vmem:[#allocation50_spill] sm:$0xff] %v9581_v43  ;;  %v4664_v48 = vrot.slane %v4057_v18, 2 }
 0x3b8   : > { %6633 = vmatmul.msk.f32.gmra.mxu0 %vm3101_vm5, %v9220_v27 }
 0x3b9   : > { %v3933_v1 = vpop.f32.mrf.mxu3 }
 0x3ba   : > { %v4019_v58 = vadd.f32 %v3933_v1, %v3675_v25  ;;  %v9569_v24 = vpop.f32.mrf.mxu1  ;;  %6681 = vmatmul.msk.f32.gmra.mxu2 %vm3101_vm5, %v4660_v3  ;;  %v4368_v25 = vrot.slane %v4054_v57, 1 }
 0x3bc   : > { %v9573_v30 = vadd.f32 %v4224_v2, %v4019_v58  ;;  %v11165_v2 = vld [vmem:[#allocation28_spill] sm:$0xff] }
 0x3bd   : > { %v9575_v17 = vpop.f32.mrf.mxu2  ;;  %6647 = vmatmul.msk.f32.gmra.mxu1 %vm3101_vm5, %v11162_v31  ;;  %v4233_v39 = vpop.f32.mrf.mxu0  ;;  %v3815_v1 = vrot.slane %v11165_v2, 2  ;;  %v11166_v31 = vld [vmem:[#allocation43_spill] sm:$0xff] }
 0x3be   : > { %11160 = vst [vmem:[#allocation25_spill] sm:$0xff] %v9573_v30  ;;  %6599 = vmatmul.msk.f32.gmra.mxu3 %vm3101_vm5, %v9581_v43  ;;  %v11167_v30 = vld [vmem:[#allocation16_spill] sm:$0xff]  ;;  %v11170_v2 = vld [vmem:[#allocation19_spill] sm:$0xff] }
 0x3bf   : > { %11161 = vst [vmem:[#allocation27_spill] sm:$0xff] %v9575_v17  ;;  %v4369_v17 = vsel %vm531_vm2, %v11167_v30, %v4368_v25  ;;  %v3816_v57 = vsel %vm975_vm4, %v9565_v14, %v3815_v1  ;;  %v3817_v1 = vrot.slane %v9195_v8, 2 }
 0x3c0   : > { %6634 = vmatmul.msk.f32.gmra.mxu0 %vm3101_vm5, %v9255_v13 }
 0x3c1   : > { %v3936_v47 = vpop.f32.mrf.mxu3 }
 0x3c2   : > { %v4020_v3 = vadd.f32 %v3936_v47, %v3678_v61  ;;  %v9590_v58 = vpop.f32.mrf.mxu1  ;;  %6682 = vmatmul.msk.f32.gmra.mxu2 %vm3101_vm5, %v11166_v31  ;;  %v11169_v47 = vld [vmem:[#allocation44_spill] sm:$0xff] }
 0x3c3   : > { %v3681_v31 = vadd.f32 %v11170_v2, %v11169_v47  ;;  %v11171_v2 = vld [vmem:[#allocation22_spill] sm:$0xff] }
 0x3c4   : > { %v9596_v43 = vadd.f32 %v4227_v12, %v4020_v3  ;;  %v9609_v12 = vrot.slane %v9220_v27, 2 }
 0x3c5   : > { %v9598_v15 = vpop.f32.mrf.mxu2  ;;  %6648 = vmatmul.msk.f32.gmra.mxu1 %vm3101_vm5, %v4369_v17  ;;  %v4236_v61 = vpop.f32.mrf.mxu0  ;;  %v4665_v17 = vsel %vm975_vm4, %v9153_v5, %v4664_v48  ;;  %v3684_v5 = vadd.f32 %v9208_v52, %v9224_v54  ;;  %v4373_v48 = vrot.slane %v4057_v18, 1 }
 0x3c6   : > { %11168 = vst [vmem:[#allocation15_spill] sm:$0xff] %v9596_v43  ;;  %6600 = vmatmul.msk.f32.gmra.mxu3 %vm3101_vm5, %v3816_v57  ;;  %v9625_v27 = vsel %vm975_vm4, %v3817_v1, %v9609_v12 }
 0x3c8   : > { %6635 = vmatmul.msk.f32.gmra.mxu0 %vm3101_vm5, %v9282_v37 }
 0x3c9   : > { %v3939_v30 = vpop.f32.mrf.mxu3 }
 0x3ca   : > { %v4021_v25 = vadd.f32 %v3939_v30, %v3681_v31  ;;  %v9613_v3 = vpop.f32.mrf.mxu1  ;;  %6683 = vmatmul.msk.f32.gmra.mxu2 %vm3101_vm5, %v4665_v17  ;;  %v4060_v17 = vld [vmem:[#allocation3 + $0x88] sm:$0x3] }
 0x3cc   : > { %v9617_v57 = vadd.f32 %v4230_v56, %v4021_v25  ;;  %v3820_v56 = vrot.slane %v9246_v45, 2  ;;  %v11172_v25 = vld [vmem:[#allocation21_spill] sm:$0xff]  ;;  %v4669_v45 = vrot.slane %v4060_v17, 2 }
 0x3cd   : > { %v9619_v47 = vpop.f32.mrf.mxu2  ;;  %6649 = vmatmul.msk.f32.gmra.mxu1 %vm3101_vm5, %v11171_v2  ;;  %v4239_v43 = vpop.f32.mrf.mxu0  ;;  %v4374_v1 = vsel %vm531_vm2, %v11172_v25, %v4373_v48 }
 0x3ce   : > { %6601 = vmatmul.msk.f32.gmra.mxu3 %vm3101_vm5, %v9625_v27  ;;  %v3821_v54 = vsel %vm975_vm4, %v9609_v12, %v3820_v56  ;;  %v3822_v56 = vrot.slane %v9255_v13, 2 }
 0x3d0   : > { %6636 = vmatmul.msk.f32.gmra.mxu0 %vm3101_vm5, %v9319_v42 }
 0x3d1   : > { %v3942_v8 = vpop.f32.mrf.mxu3 }
 0x3d2   : > { %v4022_v31 = vadd.f32 %v3942_v8, %v3684_v5  ;;  %v9634_v30 = vpop.f32.mrf.mxu1  ;;  %6684 = vmatmul.msk.f32.gmra.mxu2 %vm3101_vm5, %v9244_v26  ;;  %v11173_v5 = vld [vmem:[#allocation36_spill] sm:$0xff]  ;;  %v4670_v8 = vsel %vm975_vm4, %v9218_v49, %v4669_v45  ;;  %v3690_v49 = vadd.f32 %v9268_v50, %v9286_v36  ;;  %v4378_v45 = vrot.slane %v4060_v17, 1 }
 0x3d3   : > { %v3687_v26 = vadd.f32 %v11173_v5, %v9259_v55 }
 0x3d4   : > { %v9640_v2 = vadd.f32 %v4233_v39, %v4022_v31  ;;  %v9653_v39 = vrot.slane %v9282_v37, 2 }
 0x3d5   : > { %v9642_v52 = vpop.f32.mrf.mxu2  ;;  %6650 = vmatmul.msk.f32.gmra.mxu1 %vm3101_vm5, %v4374_v1  ;;  %v4242_v18 = vpop.f32.mrf.mxu0 }
 0x3d6   : > { %6602 = vmatmul.msk.f32.gmra.mxu3 %vm3101_vm5, %v3821_v54  ;;  %v11175_v54 = vld [vmem:[#allocation26_spill] sm:$0xff]  ;;  %v9669_v37 = vsel %vm975_vm4, %v3822_v56, %v9653_v39  ;;  %v11177_v56 = vld [vmem:[#allocation41_spill] sm:$0xff] }
 0x3d8   : > { %6637 = vmatmul.msk.f32.gmra.mxu0 %vm3101_vm5, %v9349_v34 }
 0x3d9   : > { %v3945_v48 = vpop.f32.mrf.mxu3 }
 0x3da   : > { %v4023_v31 = vadd.f32 %v3945_v48, %v3687_v26  ;;  %v9657_v25 = vpop.f32.mrf.mxu1  ;;  %6685 = vmatmul.msk.f32.gmra.mxu2 %vm3101_vm5, %v4670_v8  ;;  %v11176_v8 = vld [vmem:[#allocation45_spill] sm:$0xff] }
 0x3dc   : > { %v9661_v1 = vadd.f32 %v4236_v61, %v4023_v31  ;;  %v3825_v61 = vrot.slane %v9310_v4, 2  ;;  %v4063_v31 = vld [vmem:[#allocation3 + $0xa0] sm:$0x3] }
 0x3dd   : > { %v9663_v55 = vpop.f32.mrf.mxu2  ;;  %6651 = vmatmul.msk.f32.gmra.mxu1 %vm3101_vm5, %v11175_v54  ;;  %v4245_v5 = vpop.f32.mrf.mxu0  ;;  %v4379_v54 = vsel %vm531_vm2, %v11177_v56, %v4378_v45  ;;  %v4674_v4 = vrot.slane %v4063_v31, 2 }
 0x3de   : > { %11174 = vst [vmem:[#allocation52_spill] sm:$0xff] %v9661_v1  ;;  %6603 = vmatmul.msk.f32.gmra.mxu3 %vm3101_vm5, %v9669_v37  ;;  %v3826_v36 = vsel %vm975_vm4, %v9653_v39, %v3825_v61  ;;  %v3827_v61 = vrot.slane %v9319_v42, 2  ;;  %v3696_v42 = vadd.f32 %v9335_v6, %v9353_v59 }
 0x3e0   : > { %6638 = vmatmul.msk.f32.gmra.mxu0 %vm3101_vm5, %v9395_v22 }
 0x3e1   : > { %v3948_v13 = vpop.f32.mrf.mxu3 }
 0x3e2   : > { %v4024_v26 = vadd.f32 %v3948_v13, %v3690_v49  ;;  %v9678_v48 = vpop.f32.mrf.mxu1  ;;  %6686 = vmatmul.msk.f32.gmra.mxu2 %vm3101_vm5, %v11176_v8  ;;  %v11179_v49 = vld [vmem:[#allocation13_spill] sm:$0xff] }
 0x3e3   : > { %v3693_v13 = vadd.f32 %v11179_v49, %v9323_v40 }
 0x3e4   : > { %v9684_v1 = vadd.f32 %v4239_v43, %v4024_v26  ;;  %v9697_v43 = vrot.slane %v9349_v34, 2  ;;  %v4675_v26 = vsel %vm975_vm4, %v9280_v41, %v4674_v4  ;;  %v9717_v41 = vld [vmem:[#allocation3 + $0x180] sm:$0xff] }
 0x3e5   : > { %v9686_v50 = vpop.f32.mrf.mxu2  ;;  %6652 = vmatmul.msk.f32.gmra.mxu1 %vm3101_vm5, %v4379_v54  ;;  %v4248_v17 = vpop.f32.mrf.mxu0  ;;  %11182 = vst [vmem:[#allocation14_spill] sm:$0xff] %v9717_v41 }
 0x3e6   : > { %11178 = vst [vmem:[#allocation31_spill] sm:$0xff] %v9684_v1  ;;  %6604 = vmatmul.msk.f32.gmra.mxu3 %vm3101_vm5, %v3826_v36  ;;  %v11181_v36 = vld [vmem:[#allocation32_spill] sm:$0xff]  ;;  %v9713_v34 = vsel %vm975_vm4, %v3827_v61, %v9697_v43  ;;  %v4066_v61 = vld [vmem:[#allocation3 + $0xb8] sm:$0x3] }
 0x3e8   : > { %6639 = vmatmul.msk.f32.gmra.mxu0 %vm3101_vm5, %v9421_v19 }
 0x3e9   : > { %v3951_v45 = vpop.f32.mrf.mxu3 }
 0x3ea   : > { %v4025_v8 = vadd.f32 %v3951_v45, %v3693_v13  ;;  %v9701_v56 = vpop.f32.mrf.mxu1  ;;  %6687 = vmatmul.msk.f32.gmra.mxu2 %vm3101_vm5, %v4675_v26  ;;  %v3830_v13 = vrot.slane %v9383_v16, 2  ;;  %v4679_v16 = vrot.slane %v4066_v61, 2 }
 0x3ec   : > { %v9705_v54 = vadd.f32 %v4242_v18, %v4025_v8  ;;  %v4383_v18 = vrot.slane %v4063_v31, 1  ;;  %v11183_v8 = vld [vmem:[#allocation42_spill] sm:$0xff]  ;;  %v3831_v59 = vsel %vm975_vm4, %v9697_v43, %v3830_v13  ;;  %v4680_v13 = vsel %vm975_vm4, %v9347_v29, %v4679_v16 }
 0x3ed   : > { %v9707_v40 = vpop.f32.mrf.mxu2  ;;  %6653 = vmatmul.msk.f32.gmra.mxu1 %vm3101_vm5, %v11181_v36  ;;  %v4251_v49 = vpop.f32.mrf.mxu0  ;;  %v11184_v36 = vld [vmem:[#allocation39_spill] sm:$0xff] }
 0x3ee   : > { %11180 = vst [vmem:[#allocation18_spill] sm:$0xff] %v9705_v54  ;;  %6605 = vmatmul.msk.f32.gmra.mxu3 %vm3101_vm5, %v9713_v34  ;;  %v4384_v54 = vsel %vm531_vm2, %v11184_v36, %v4383_v18  ;;  %v9747_v18 = vrot.slane %v9421_v19, 2  ;;  %v11191_v19 = vld [vmem:[#allocation30_spill] sm:$0xff] }
 0x3f0   : > { %6640 = vmatmul.msk.f32.gmra.mxu0 %vm3101_vm5, %v9717_v41 }
 0x3f1   : > { %v3954_v4 = vpop.f32.mrf.mxu3 }
 0x3f2   : > { %v4026_v45 = vadd.f32 %v3954_v4, %v3696_v42  ;;  %v9724_v26 = vpop.f32.mrf.mxu1  ;;  %6688 = vmatmul.msk.f32.gmra.mxu2 %vm3101_vm5, %v11183_v8  ;;  %v9738_v42 = vld [vmem:[#allocation3 + $0x188] sm:$0xff]  ;;  %v11187_v4 = vld [vmem:[#allocation12_spill] sm:$0xff] }
 0x3f3   : > { %11186 = vst [vmem:[#allocation46_spill] sm:$0xff] %v9738_v42  ;;  %v3699_v8 = vadd.f32 %v11187_v4, %v9399_v21  ;;  %v3832_v21 = vrot.slane %v9395_v22, 2 }
 0x3f4   : > { %v9730_v1 = vadd.f32 %v4245_v5, %v4026_v45  ;;  %v9744_v5 = vld [vmem:[#allocation3 + $0x38] sm:$0xff] }
 0x3f5   : > { %v9732_v6 = vpop.f32.mrf.mxu2  ;;  %6654 = vmatmul.msk.f32.gmra.mxu1 %vm3101_vm5, %v4384_v54  ;;  %v4254_v31 = vpop.f32.mrf.mxu0  ;;  %v5246_v4 = vrot.slane %v9744_v5, 1  ;;  %v9766_v29 = vsel %vm975_vm4, %v3832_v21, %v9747_v18  ;;  %v3835_v21 = vrot.slane %v9446_v33, 2 }
 0x3f6   : > { %11185 = vst [vmem:[#allocation23_spill] sm:$0xff] %v9730_v1  ;;  %6606 = vmatmul.msk.f32.gmra.mxu3 %vm3101_vm5, %v3831_v59  ;;  %v9754_v59 = vld [vmem:[#allocation3 + $0x30] sm:$0xff] }
 0x3f7   : > { %11188 = vst [vmem:[#allocation28_spill] sm:$0xff] %v9754_v59  ;;  %v4069_v1 = vld [vmem:[#allocation3 + $0xd0] sm:$0x3]  ;;  %v3836_v33 = vsel %vm975_vm4, %v9747_v18, %v3835_v21  ;;  %v9804_v21 = vld [vmem:[#allocation3 + $0x48] sm:$0xff] }
 0x3f8   : > { %6641 = vmatmul.msk.f32.gmra.mxu0 %vm3101_vm5, %v9738_v42  ;;  %11194 = vst [vmem:[#allocation19_spill] sm:$0xff] %v9804_v21 }
 0x3f9   : > { %v3957_v54 = vpop.f32.mrf.mxu3 }
 0x3fa   : > { %v4027_v45 = vadd.f32 %v3957_v54, %v3699_v8  ;;  %v9751_v36 = vpop.f32.mrf.mxu1  ;;  %6689 = vmatmul.msk.f32.gmra.mxu2 %vm3101_vm5, %v4680_v13  ;;  %v5245_v8 = vrot.slane %v9754_v59, 1  ;;  %v4388_v54 = vrot.slane %v4066_v61, 1  ;;  %v9775_v13 = vld [vmem:[#allocation3 + $0x40] sm:$0x3] }
 0x3fb   : > { %11192 = vst [vmem:[#allocation44_spill] sm:$0xff] %v9775_v13 }
 0x3fc   : > { %v9758_v41 = vadd.f32 %v4248_v17, %v4027_v45  ;;  %v5247_v22 = vsel %vm531_vm2, %v5245_v8, %v5246_v4  ;;  %v3702_v17 = vadd.f32 %v9409_v38, %v9425_v20  ;;  %v5248_v8 = vrot.slane %v9775_v13, 1 }
 0x3fd   : > { %v9760_v42 = vpop.f32.mrf.mxu2  ;;  %6655 = vmatmul.msk.f32.gmra.mxu1 %vm3101_vm5, %v11191_v19  ;;  %v4257_v16 = vpop.f32.mrf.mxu0 }
 0x3fe   : > { %11189 = vst [vmem:[#allocation43_spill] sm:$0xff] %v9758_v41  ;;  %6607 = vmatmul.msk.f32.gmra.mxu3 %vm3101_vm5, %v9766_v29 }
 0x3ff   : > { %11190 = vst [vmem:[#allocation16_spill] sm:$0xff] %v9760_v42  ;;  %v11193_v42 = vld [vmem:[#allocation37_spill] sm:$0xff] }
 0x400   : > { %6742 = vmatmul.msk.f32.vlgmr.msra.gmra.mxu0 %vm3101_vm5, %v5247_v22  ;;  %v4389_v38 = vsel %vm531_vm2, %v11193_v42, %v4388_v54  ;;  %v4684_v22 = vrot.slane %v4069_v1, 2 }
 0x401   : > { %v3960_v45 = vpop.f32.mrf.mxu3 }
 0x402   : > { %v4028_v19 = vadd.f32 %v3960_v45, %v3702_v17  ;;  %v9778_v41 = vpop.f32.mrf.mxu1  ;;  %6690 = vmatmul.msk.f32.gmra.mxu2 %vm3101_vm5, %v9444_v63  ;;  %v5249_v63 = vsel %vm531_vm2, %v5246_v4, %v5248_v8  ;;  %v3705_v45 = vadd.f32 %v9440_v53, %v9458_v62  ;;  %v4685_v54 = vsel %vm975_vm4, %v9419_v44, %v4684_v22  ;;  %v11196_v53 = vld [vmem:[#allocation47_spill] sm:$0xff] }
 0x403   : > { %v3708_v22 = vadd.f32 %v9467_v10, %v9481_v11 }
 0x404   : > { %v9785_v20 = vadd.f32 %v4251_v49, %v4028_v19  ;;  %v9797_v49 = vld [vmem:[#allocation3 + $0x50] sm:$0xff] }
 0x405   : > { %v9787_v61 = vpop.f32.mrf.mxu2  ;;  %6656 = vmatmul.msk.f32.gmra.mxu1 %vm3101_vm5, %v4389_v38  ;;  %v4260_v17 = vpop.f32.mrf.mxu0  ;;  %v5251_v4 = vrot.slane %v9797_v49, 1 }
 0x406   : > { %6608 = vmatmul.msk.f32.gmra.mxu3 %vm3101_vm5, %v3836_v33 }
 0x408   : > { %6743 = vmatmul.msk.f32.gmra.mxu0 %vm3101_vm5, %v5249_v63  ;;  %v5250_v63 = vrot.slane %v9804_v21, 1 }
 0x409   : > { %v3963_v42 = vpop.f32.mrf.mxu3 }
 0x40a   : > { %v4029_v19 = vadd.f32 %v3963_v42, %v3705_v45  ;;  %v9801_v38 = vpop.f32.mrf.mxu1  ;;  %6691 = vmatmul.msk.f32.gmra.mxu2 %vm3101_vm5, %v4685_v54  ;;  %v5252_v44 = vsel %vm531_vm2, %v5250_v63, %v5251_v4  ;;  %v4393_v45 = vrot.slane %v4069_v1, 1 }
 0x40c   : > { %v9807_v8 = vadd.f32 %v4254_v31, %v4029_v19  ;;  %v9820_v31 = vld [vmem:[#allocation3 + $0x58] sm:$0x3] }
 0x40d   : > { %v9809_v62 = vpop.f32.mrf.mxu2  ;;  %6657 = vmatmul.msk.f32.gmra.mxu1 %vm3101_vm5, %v11196_v53  ;;  %v4263_v33 = vpop.f32.mrf.mxu0  ;;  %11197 = vst [vmem:[#allocation21_spill] sm:$0xff] %v9820_v31  ;;  %v4072_v53 = vld [vmem:[#allocation3 + $0xe8] sm:$0x3]  ;;  %v5253_v13 = vrot.slane %v9820_v31, 1 }
 0x40e   : > { %11195 = vst [vmem:[#allocation22_spill] sm:$0xff] %v9807_v8  ;;  %6709 = vmatmul.msk.f32.vlgmr.msra.gmra.mxu3 %vm3101_vm5, %v9754_v59  ;;  %v11198_v59 = vld [vmem:[#allocation40_spill] sm:$0xff]  ;;  %v4689_v11 = vrot.slane %v4072_v53, 2 }
 0x40f   : > { %v4394_v63 = vsel %vm531_vm2, %v11198_v59, %v4393_v45 }
 0x410   : > { %6744 = vmatmul.msk.f32.gmra.mxu0 %vm3101_vm5, %v5252_v44  ;;  %v5254_v44 = vsel %vm531_vm2, %v5251_v4, %v5253_v13 }
 0x411   : > { %v3966_v42 = vpop.f32.mrf.mxu3 }
 0x412   : > { %v4030_v54 = vadd.f32 %v3966_v42, %v3708_v22  ;;  %v9822_v19 = vpop.f32.mrf.mxu1  ;;  %6692 = vmatmul.msk.f32.gmra.mxu2 %vm3101_vm5, %v9493_v51  ;;  %v3711_v51 = vadd.f32 %v9487_v60, %v9502_v7  ;;  %v9838_v22 = vld [vmem:[#allocation3 + $0x68] sm:$0xff]  ;;  %v11201_v60 = vld [vmem:[#allocation49_spill] sm:$0xff] }
 0x413   : > { %v5256_v13 = vrot.slane %v9838_v22, 1 }
 0x414   : > { %v9829_v8 = vadd.f32 %v4257_v16, %v4030_v54  ;;  %v4690_v16 = vsel %vm975_vm4, %v9477_v46, %v4689_v11  ;;  %v9843_v54 = vld [vmem:[#allocation3 + $0x60] sm:$0xff] }
 0x415   : > { %6658 = vmatmul.msk.f32.gmra.mxu1 %vm3101_vm5, %v4394_v63  ;;  %v4807_v10 = vpop.f32.mrf.mxu2  ;;  %v4266_v1 = vpop.f32.mrf.mxu0  ;;  %11199 = vst [vmem:[#allocation36_spill] sm:$0xff] %v9843_v54  ;;  %v5255_v31 = vrot.slane %v9843_v54, 1 }
 0x416   : > { %6710 = vmatmul.msk.f32.gmra.mxu3 %vm3101_vm5, %v9744_v5 }
 0x417   : > { %v5257_v11 = vsel %vm531_vm2, %v5255_v31, %v5256_v13  ;;  %v11205_v31 = vld [vmem:[#allocation35_spill] sm:$0xff] }
 0x418   : > { %6745 = vmatmul.msk.f32.gmra.mxu0 %vm3101_vm5, %v5254_v44 }
 0x419   : > { %v3969_v59 = vpop.f32.mrf.mxu3 }
 0x41a   : > { %v4031_v45 = vadd.f32 %v3969_v59, %v3711_v51  ;;  %v4516_v42 = vpop.f32.mrf.mxu1  ;;  %6693 = vmatmul.msk.f32.gmra.mxu2 %vm3101_vm5, %v4690_v16  ;;  %v4398_v51 = vrot.slane %v4072_v53, 1 }
 0x41b   : > { %v4612_v63 = vadd.f32 %v4516_v42, %v9464_v9  ;;  %v3714_v9 = vadd.f32 %v9510_v23, %v9525_v0  ;;  %v11203_v42 = vld [vmem:[#allocation10_spill] sm:$0xff] }
 0x41c   : > { %v9847_v4 = vadd.f32 %v4260_v17, %v4031_v45  ;;  %v9860_v17 = vld [vmem:[#allocation3 + $0x70] sm:$0x3] }
 0x41d   : > { %6659 = vmatmul.msk.f32.gmra.mxu1 %vm3101_vm5, %v11201_v60  ;;  %v4810_v7 = vpop.f32.mrf.mxu2  ;;  %v4269_v44 = vpop.f32.mrf.mxu0  ;;  %v9852_v46 = vadd.f32 %v4807_v10, %v4612_v63  ;;  %11202 = vst [vmem:[#allocation45_spill] sm:$0xff] %v9860_v17  ;;  %v4075_v10 = vld [vmem:[#allocation3 + $0x100] sm:$0x3]  ;;  %v11204_v63 = vld [vmem:[#allocation20_spill] sm:$0xff] }
 0x41e   : > { %11200 = vst [vmem:[#allocation26_spill] sm:$0xff] %v9847_v4  ;;  %6711 = vmatmul.msk.f32.gmra.mxu3 %vm3101_vm5, %v9804_v21  ;;  %v5258_v21 = vrot.slane %v9860_v17, 1  ;;  %v4399_v4 = vsel %vm531_vm2, %v11205_v31, %v4398_v51  ;;  %v4694_v53 = vrot.slane %v4075_v10, 2  ;;  %v9879_v51 = vld [vmem:[#allocation3 + $0x80] sm:$0xff] }
 0x420   : > { %6746 = vmatmul.msk.f32.gmra.mxu0 %vm3101_vm5, %v5257_v11 }
 0x421   : > { %v3972_v59 = vpop.f32.mrf.mxu3 }
 0x422   : > { %v4032_v16 = vadd.f32 %v3972_v59, %v3714_v9  ;;  %v4519_v45 = vpop.f32.mrf.mxu1  ;;  %6694 = vmatmul.msk.f32.gmra.mxu2 %vm3101_vm5, %v11203_v42  ;;  %v5259_v59 = vsel %vm531_vm2, %v5256_v13, %v5258_v21  ;;  %v5261_v21 = vrot.slane %v9879_v51, 1 }
 0x423   : > { %v4613_v60 = vadd.f32 %v4519_v45, %v11204_v63  ;;  %v11206_v45 = vld [vmem:[#allocation24_spill] sm:$0xff] }
 0x424   : > { %v9868_v23 = vadd.f32 %v4263_v33, %v4032_v16  ;;  %v3717_v42 = vadd.f32 %v11206_v45, %v9546_v28  ;;  %v11210_v28 = vld [vmem:[#allocation9_spill] sm:$0xff] }
 0x425   : > { %6660 = vmatmul.msk.f32.gmra.mxu1 %vm3101_vm5, %v4399_v4  ;;  %v4813_v0 = vpop.f32.mrf.mxu2  ;;  %v4272_v11 = vpop.f32.mrf.mxu0  ;;  %v9871_v9 = vadd.f32 %v4810_v7, %v4613_v60  ;;  %v4695_v4 = vsel %vm975_vm4, %v9521_v35, %v4694_v53  ;;  %v9884_v7 = vld [vmem:[#allocation3 + $0x78] sm:$0xff] }
 0x426   : > { %6712 = vmatmul.msk.f32.gmra.mxu3 %vm3101_vm5, %v9797_v49  ;;  %11207 = vst [vmem:[#allocation41_spill] sm:$0xff] %v9884_v7  ;;  %v11208_v60 = vld [vmem:[#allocation17_spill] sm:$0xff]  ;;  %v5260_v17 = vrot.slane %v9884_v7, 1 }
 0x428   : > { %6747 = vmatmul.msk.f32.gmra.mxu0 %vm3101_vm5, %v5259_v59  ;;  %v5262_v53 = vsel %vm531_vm2, %v5260_v17, %v5261_v21  ;;  %v11214_v17 = vld [vmem:[#allocation51_spill] sm:$0xff] }
 0x429   : > { %v3975_v33 = vpop.f32.mrf.mxu3 }
 0x42a   : > { %v4033_v16 = vadd.f32 %v3975_v33, %v3717_v42  ;;  %v4522_v63 = vpop.f32.mrf.mxu1  ;;  %6695 = vmatmul.msk.f32.gmra.mxu2 %vm3101_vm5, %v4695_v4  ;;  %v3720_v42 = vadd.f32 %v9554_v32, %v9569_v24  ;;  %v4403_v33 = vrot.slane %v4075_v10, 1 }
 0x42b   : > { %v4614_v31 = vadd.f32 %v4522_v63, %v11208_v60  ;;  %v11212_v60 = vld [vmem:[#allocation50_spill] sm:$0xff] }
 0x42c   : > { %v9888_v13 = vadd.f32 %v4266_v1, %v4033_v16  ;;  %v9901_v1 = vld [vmem:[#allocation3 + $0x88] sm:$0x3] }
 0x42d   : > { %6661 = vmatmul.msk.f32.gmra.mxu1 %vm3101_vm5, %v11210_v28  ;;  %v4816_v59 = vpop.f32.mrf.mxu2  ;;  %v4275_v45 = vpop.f32.mrf.mxu0  ;;  %v9893_v35 = vadd.f32 %v4813_v0, %v4614_v31  ;;  %11211 = vst [vmem:[#allocation32_spill] sm:$0xff] %v9901_v1  ;;  %v4078_v0 = vld [vmem:[#allocation3 + $0x118] sm:$0x3]  ;;  %v11213_v31 = vld [vmem:[#allocation8_spill] sm:$0xff] }
 0x42e   : > { %11209 = vst [vmem:[#allocation13_spill] sm:$0xff] %v9888_v13  ;;  %6713 = vmatmul.msk.f32.gmra.mxu3 %vm3101_vm5, %v9843_v54  ;;  %v5263_v54 = vrot.slane %v9901_v1, 1  ;;  %v4404_v13 = vsel %vm531_vm2, %v11214_v17, %v4403_v33  ;;  %v4699_v10 = vrot.slane %v4078_v0, 2  ;;  %v9920_v33 = vld [vmem:[#allocation3 + $0x98] sm:$0xff] }
 0x430   : > { %6748 = vmatmul.msk.f32.gmra.mxu0 %vm3101_vm5, %v5262_v53 }
 0x431   : > { %v3978_v4 = vpop.f32.mrf.mxu3 }
 0x432   : > { %v4034_v16 = vadd.f32 %v3978_v4, %v3720_v42  ;;  %v4525_v63 = vpop.f32.mrf.mxu1  ;;  %6696 = vmatmul.msk.f32.gmra.mxu2 %vm3101_vm5, %v11212_v60  ;;  %v5264_v4 = vsel %vm531_vm2, %v5261_v21, %v5263_v54  ;;  %v5266_v54 = vrot.slane %v9920_v33, 1 }
 0x433   : > { %v4615_v28 = vadd.f32 %v4525_v63, %v11213_v31  ;;  %v11215_v63 = vld [vmem:[#allocation27_spill] sm:$0xff] }
 0x434   : > { %v9909_v32 = vadd.f32 %v4269_v44, %v4034_v16  ;;  %v3723_v60 = vadd.f32 %v11215_v63, %v9590_v58  ;;  %v11217_v58 = vld [vmem:[#allocation29_spill] sm:$0xff] }
 0x435   : > { %6662 = vmatmul.msk.f32.gmra.mxu1 %vm3101_vm5, %v4404_v13  ;;  %v4819_v24 = vpop.f32.mrf.mxu2  ;;  %v4278_v53 = vpop.f32.mrf.mxu0  ;;  %v9912_v42 = vadd.f32 %v4816_v59, %v4615_v28  ;;  %v4700_v13 = vsel %vm975_vm4, %v9565_v14, %v4699_v10  ;;  %v9925_v59 = vld [vmem:[#allocation3 + $0x90] sm:$0xff] }
 0x436   : > { %6714 = vmatmul.msk.f32.gmra.mxu3 %vm3101_vm5, %v9838_v22  ;;  %v11216_v28 = vld [vmem:[#allocation48_spill] sm:$0xff]  ;;  %v5265_v1 = vrot.slane %v9925_v59, 1 }
 0x438   : > { %6749 = vmatmul.msk.f32.gmra.mxu0 %vm3101_vm5, %v5264_v4  ;;  %v5267_v10 = vsel %vm531_vm2, %v5265_v1, %v5266_v54  ;;  %v11219_v1 = vld [vmem:[#allocation53_spill] sm:$0xff] }
 0x439   : > { %v3981_v44 = vpop.f32.mrf.mxu3 }
 0x43a   : > { %v4035_v16 = vadd.f32 %v3981_v44, %v3723_v60  ;;  %v4528_v31 = vpop.f32.mrf.mxu1  ;;  %6697 = vmatmul.msk.f32.gmra.mxu2 %vm3101_vm5, %v4700_v13  ;;  %v3726_v60 = vadd.f32 %v9598_v15, %v9613_v3  ;;  %v4408_v44 = vrot.slane %v4078_v0, 1 }
 0x43b   : > { %v4616_v17 = vadd.f32 %v4528_v31, %v11216_v28  ;;  %v11218_v28 = vld [vmem:[#allocation25_spill] sm:$0xff] }
 0x43c   : > { %v9929_v21 = vadd.f32 %v4272_v11, %v4035_v16  ;;  %v9942_v11 = vld [vmem:[#allocation3 + $0xa0] sm:$0x3] }
 0x43d   : > { %6663 = vmatmul.msk.f32.gmra.mxu1 %vm3101_vm5, %v11217_v58  ;;  %v4822_v4 = vpop.f32.mrf.mxu2  ;;  %v4281_v63 = vpop.f32.mrf.mxu0  ;;  %v9934_v14 = vadd.f32 %v4819_v24, %v4616_v17  ;;  %v4081_v24 = vld [vmem:[#allocation3 + $0x130] sm:$0x3]  ;;  %v5268_v58 = vrot.slane %v9942_v11, 1 }
 0x43e   : > { %6715 = vmatmul.msk.f32.gmra.mxu3 %vm3101_vm5, %v9884_v7  ;;  %v4409_v7 = vsel %vm531_vm2, %v11219_v1, %v4408_v44  ;;  %v4704_v0 = vrot.slane %v4081_v24, 2  ;;  %v9961_v44 = vld [vmem:[#allocation3 + $0xb0] sm:$0xff] }
 0x440   : > { %6750 = vmatmul.msk.f32.gmra.mxu0 %vm3101_vm5, %v5267_v10 }
 0x441   : > { %v3984_v13 = vpop.f32.mrf.mxu3 }
 0x442   : > { %v4036_v16 = vadd.f32 %v3984_v13, %v3726_v60  ;;  %v4531_v31 = vpop.f32.mrf.mxu1  ;;  %6698 = vmatmul.msk.f32.gmra.mxu2 %vm3101_vm5, %v9625_v27  ;;  %v5269_v27 = vsel %vm531_vm2, %v5266_v54, %v5268_v58  ;;  %v3729_v13 = vadd.f32 %v9619_v47, %v9634_v30  ;;  %v5271_v54 = vrot.slane %v9961_v44, 1  ;;  %v11221_v47 = vld [vmem:[#allocation34_spill] sm:$0xff] }
 0x443   : > { %v4617_v17 = vadd.f32 %v4531_v31, %v11218_v28  ;;  %v11220_v28 = vld [vmem:[#allocation15_spill] sm:$0xff] }
 0x444   : > { %v9950_v15 = vadd.f32 %v4275_v45, %v4036_v16 }
 0x445   : > { %6664 = vmatmul.msk.f32.gmra.mxu1 %vm3101_vm5, %v4409_v7  ;;  %v4825_v3 = vpop.f32.mrf.mxu2  ;;  %v4284_v10 = vpop.f32.mrf.mxu0  ;;  %v9953_v60 = vadd.f32 %v4822_v4, %v4617_v17  ;;  %v4705_v7 = vsel %vm975_vm4, %v9609_v12, %v4704_v0  ;;  %v9966_v4 = vld [vmem:[#allocation3 + $0xa8] sm:$0xff] }
 0x446   : > { %6716 = vmatmul.msk.f32.gmra.mxu3 %vm3101_vm5, %v9879_v51 }
 0x448   : > { %6751 = vmatmul.msk.f32.gmra.mxu0 %vm3101_vm5, %v5269_v27  ;;  %v5270_v27 = vrot.slane %v9966_v4, 1 }
 0x449   : > { %v3987_v45 = vpop.f32.mrf.mxu3 }
 0x44a   : > { %v4037_v16 = vadd.f32 %v3987_v45, %v3729_v13  ;;  %v4534_v31 = vpop.f32.mrf.mxu1  ;;  %6699 = vmatmul.msk.f32.gmra.mxu2 %vm3101_vm5, %v4705_v7  ;;  %v5272_v0 = vsel %vm531_vm2, %v5270_v27, %v5271_v54  ;;  %v3732_v13 = vadd.f32 %v9642_v52, %v9657_v25  ;;  %v4413_v45 = vrot.slane %v4081_v24, 1 }
 0x44b   : > { %v4618_v17 = vadd.f32 %v4534_v31, %v11220_v28 }
 0x44c   : > { %v9970_v58 = vadd.f32 %v4278_v53, %v4037_v16  ;;  %v9983_v53 = vld [vmem:[#allocation3 + $0xb8] sm:$0x3] }
 0x44d   : > { %6665 = vmatmul.msk.f32.gmra.mxu1 %vm3101_vm5, %v11221_v47  ;;  %v4828_v30 = vpop.f32.mrf.mxu2  ;;  %v4287_v1 = vpop.f32.mrf.mxu0  ;;  %v9975_v12 = vadd.f32 %v4825_v3, %v4618_v17  ;;  %v4084_v3 = vld [vmem:[#allocation3 + $0x148] sm:$0x3]  ;;  %v5273_v17 = vrot.slane %v9983_v53, 1  ;;  %v11222_v47 = vld [vmem:[#allocation4_spill] sm:$0xff] }
 0x44e   : > { %6717 = vmatmul.msk.f32.gmra.mxu3 %vm3101_vm5, %v9925_v59  ;;  %v4414_v27 = vsel %vm531_vm2, %v11222_v47, %v4413_v45  ;;  %v4709_v24 = vrot.slane %v4084_v3, 2  ;;  %v10002_v45 = vld [vmem:[#allocation3 + $0xc8] sm:$0xff] }
 0x450   : > { %6752 = vmatmul.msk.f32.gmra.mxu0 %vm3101_vm5, %v5272_v0 }
 0x451   : > { %v3990_v7 = vpop.f32.mrf.mxu3 }
 0x452   : > { %v4038_v16 = vadd.f32 %v3990_v7, %v3732_v13  ;;  %v4537_v31 = vpop.f32.mrf.mxu1  ;;  %6700 = vmatmul.msk.f32.gmra.mxu2 %vm3101_vm5, %v9669_v37  ;;  %v5274_v37 = vsel %vm531_vm2, %v5271_v54, %v5273_v17  ;;  %v4710_v7 = vsel %vm975_vm4, %v9653_v39, %v4709_v24  ;;  %v5276_v54 = vrot.slane %v10002_v45, 1 }
 0x453   : > { %v4619_v28 = vadd.f32 %v4537_v31, %v9617_v57  ;;  %v3735_v57 = vadd.f32 %v9663_v55, %v9678_v48  ;;  %v11223_v55 = vld [vmem:[#allocation38_spill] sm:$0xff] }
 0x454   : > { %v9991_v52 = vadd.f32 %v4281_v63, %v4038_v16 }
 0x455   : > { %6666 = vmatmul.msk.f32.gmra.mxu1 %vm3101_vm5, %v4414_v27  ;;  %v4831_v25 = vpop.f32.mrf.mxu2  ;;  %v4290_v0 = vpop.f32.mrf.mxu0  ;;  %v9994_v13 = vadd.f32 %v4828_v30, %v4619_v28  ;;  %v10007_v30 = vld [vmem:[#allocation3 + $0xc0] sm:$0xff] }
 0x456   : > { %6718 = vmatmul.msk.f32.gmra.mxu3 %vm3101_vm5, %v9920_v33  ;;  %v5275_v27 = vrot.slane %v10007_v30, 1 }
 0x458   : > { %6753 = vmatmul.msk.f32.gmra.mxu0 %vm3101_vm5, %v5274_v37  ;;  %v5277_v24 = vsel %vm531_vm2, %v5275_v27, %v5276_v54  ;;  %v4418_v37 = vrot.slane %v4084_v3, 1 }
 0x459   : > { %v3993_v63 = vpop.f32.mrf.mxu3 }
 0x45a   : > { %v4039_v16 = vadd.f32 %v3993_v63, %v3735_v57  ;;  %v4540_v31 = vpop.f32.mrf.mxu1  ;;  %6701 = vmatmul.msk.f32.gmra.mxu2 %vm3101_vm5, %v4710_v7 }
 0x45b   : > { %v4620_v28 = vadd.f32 %v4540_v31, %v9640_v2  ;;  %v3738_v2 = vadd.f32 %v9686_v50, %v9701_v56 }
 0x45c   : > { %v10011_v17 = vadd.f32 %v4284_v10, %v4039_v16  ;;  %v10024_v10 = vld [vmem:[#allocation3 + $0xd0] sm:$0x3] }
 0x45d   : > { %6667 = vmatmul.msk.f32.gmra.mxu1 %vm3101_vm5, %v11223_v55  ;;  %v4834_v48 = vpop.f32.mrf.mxu2  ;;  %v4293_v47 = vpop.f32.mrf.mxu0  ;;  %v10016_v39 = vadd.f32 %v4831_v25, %v4620_v28  ;;  %v4087_v25 = vld [vmem:[#allocation3 + $0x160] sm:$0x3]  ;;  %v11225_v16 = vld [vmem:[#allocation52_spill] sm:$0xff]  ;;  %v5278_v28 = vrot.slane %v10024_v10, 1 }
 0x45e   : > { %6719 = vmatmul.msk.f32.gmra.mxu3 %vm3101_vm5, %v9966_v4  ;;  %v11226_v55 = vld [vmem:[#allocation6_spill] sm:$0xff]  ;;  %v4714_v3 = vrot.slane %v4087_v25, 2 }
 0x45f   : > { %11224 = vst [vmem:[#allocation42_spill] sm:$0xff] %v10016_v39  ;;  %v4419_v27 = vsel %vm531_vm2, %v11226_v55, %v4418_v37  ;;  %v10043_v37 = vld [vmem:[#allocation3 + $0xe0] sm:$0xff] }
 0x460   : > { %6754 = vmatmul.msk.f32.gmra.mxu0 %vm3101_vm5, %v5277_v24 }
 0x461   : > { %v3996_v57 = vpop.f32.mrf.mxu3 }
 0x462   : > { %v4040_v63 = vadd.f32 %v3996_v57, %v3738_v2  ;;  %v4543_v7 = vpop.f32.mrf.mxu1  ;;  %6702 = vmatmul.msk.f32.gmra.mxu2 %vm3101_vm5, %v9713_v34  ;;  %v5279_v2 = vsel %vm531_vm2, %v5276_v54, %v5278_v28  ;;  %v3741_v57 = vadd.f32 %v9707_v40, %v9724_v26  ;;  %v5281_v54 = vrot.slane %v10043_v37, 1  ;;  %v11230_v40 = vld [vmem:[#allocation7_spill] sm:$0xff] }
 0x463   : > { %v4621_v31 = vadd.f32 %v4543_v7, %v11225_v16  ;;  %v10048_v16 = vld [vmem:[#allocation3 + $0xd8] sm:$0xff] }
 0x464   : > { %v10032_v50 = vadd.f32 %v4287_v1, %v4040_v63  ;;  %v4715_v63 = vsel %vm975_vm4, %v9697_v43, %v4714_v3  ;;  %11228 = vst [vmem:[#allocation12_spill] sm:$0xff] %v10048_v16  ;;  %v3744_v3 = vadd.f32 %v9732_v6, %v9751_v36 }
 0x465   : > { %6668 = vmatmul.msk.f32.gmra.mxu1 %vm3101_vm5, %v4419_v27  ;;  %v4837_v56 = vpop.f32.mrf.mxu2  ;;  %v10035_v24 = vadd.f32 %v4834_v48, %v4621_v31  ;;  %v4296_v34 = vpop.f32.mrf.mxu0  ;;  %v11229_v31 = vld [vmem:[#allocation31_spill] sm:$0xff]  ;;  %v5280_v27 = vrot.slane %v10048_v16, 1 }
 0x466   : > { %6720 = vmatmul.msk.f32.gmra.mxu3 %vm3101_vm5, %v9961_v44 }
 0x467   : > { %11227 = vst [vmem:[#allocation39_spill] sm:$0xff] %v10035_v24  ;;  %v5282_v43 = vsel %vm531_vm2, %v5280_v27, %v5281_v54  ;;  %v11234_v27 = vld [vmem:[#allocation33_spill] sm:$0xff]  ;;  %v11242_v24 = vld [vmem:[#allocation43_spill] sm:$0xff] }
 0x468   : > { %6755 = vmatmul.msk.f32.gmra.mxu0 %vm3101_vm5, %v5279_v2 }
 0x469   : > { %v3999_v1 = vpop.f32.mrf.mxu3 }
 0x46a   : > { %v4041_v7 = vadd.f32 %v3999_v1, %v3741_v57  ;;  %v4546_v48 = vpop.f32.mrf.mxu1  ;;  %6703 = vmatmul.msk.f32.gmra.mxu2 %vm3101_vm5, %v4715_v63  ;;  %v4423_v57 = vrot.slane %v4087_v25, 1 }
 0x46b   : > { %v4622_v55 = vadd.f32 %v4546_v48, %v11229_v31  ;;  %v11233_v31 = vld [vmem:[#allocation18_spill] sm:$0xff] }
 0x46c   : > { %v10052_v28 = vadd.f32 %v4290_v0, %v4041_v7  ;;  %v10065_v0 = vld [vmem:[#allocation3 + $0xe8] sm:$0x3]  ;;  %v4424_v6 = vsel %vm531_vm2, %v11234_v27, %v4423_v57 }
 0x46d   : > { %6669 = vmatmul.msk.f32.gmra.mxu1 %vm3101_vm5, %v11230_v40  ;;  %v4840_v26 = vpop.f32.mrf.mxu2  ;;  %v10057_v2 = vadd.f32 %v4837_v56, %v4622_v55  ;;  %11232 = vst [vmem:[#allocation37_spill] sm:$0xff] %v10065_v0  ;;  %v4299_v63 = vpop.f32.mrf.mxu0  ;;  %v4090_v56 = vld [vmem:[#allocation3 + $0x178] sm:$0x3]  ;;  %v5283_v40 = vrot.slane %v10065_v0, 1 }
 0x46e   : > { %6721 = vmatmul.msk.f32.gmra.mxu3 %vm3101_vm5, %v10007_v30  ;;  %v11243_v0 = vld [vmem:[#allocation5_spill] sm:$0xff] }
 0x46f   : > { %11231 = vst [vmem:[#allocation30_spill] sm:$0xff] %v10057_v2 }
 0x470   : > { %6756 = vmatmul.msk.f32.gmra.mxu0 %vm3101_vm5, %v5282_v43  ;;  %v4719_v43 = vrot.slane %v4090_v56, 2 }
 0x471   : > { %v4002_v1 = vpop.f32.mrf.mxu3 }
 0x472   : > { %v4042_v7 = vadd.f32 %v4002_v1, %v3744_v3  ;;  %v4549_v48 = vpop.f32.mrf.mxu1  ;;  %6704 = vmatmul.msk.f32.gmra.mxu2 %vm3101_vm5, %v9766_v29  ;;  %v5284_v29 = vsel %vm531_vm2, %v5281_v54, %v5283_v40  ;;  %v11236_v3 = vld [vmem:[#allocation16_spill] sm:$0xff]  ;;  %v4720_v57 = vsel %vm975_vm4, %v9747_v18, %v4719_v43 }
 0x473   : > { %v4623_v55 = vadd.f32 %v4549_v48, %v11233_v31  ;;  %v3747_v1 = vadd.f32 %v11236_v3, %v9778_v41  ;;  %v10084_v48 = vld [vmem:[#allocation3 + $0xf8] sm:$0xff]  ;;  %v11239_v3 = vld [vmem:[#allocation11_spill] sm:$0xff] }
 0x474   : > { %v10073_v36 = vadd.f32 %v4293_v47, %v4042_v7  ;;  %v5286_v40 = vrot.slane %v10084_v48, 1 }
 0x475   : > { %6670 = vmatmul.msk.f32.gmra.mxu1 %vm3101_vm5, %v4424_v6  ;;  %v4843_v25 = vpop.f32.mrf.mxu2  ;;  %v10076_v2 = vadd.f32 %v4840_v26, %v4623_v55  ;;  %v10089_v26 = vld [vmem:[#allocation3 + $0xf0] sm:$0xff]  ;;  %v11237_v55 = vld [vmem:[#allocation23_spill] sm:$0xff]  ;;  %v4302_v54 = vpop.f32.mrf.mxu0  ;;  %v11238_v6 = vld [vmem:[#allocation46_spill] sm:$0xff] }
 0x476   : > { %6722 = vmatmul.msk.f32.gmra.mxu3 %vm3101_vm5, %v10002_v45  ;;  %v5285_v18 = vrot.slane %v10089_v26, 1 }
 0x477   : > { %11235 = vst [vmem:[#allocation47_spill] sm:$0xff] %v10076_v2 }
 0x478   : > { %6757 = vmatmul.msk.f32.gmra.mxu0 %vm3101_vm5, %v5284_v29  ;;  %v4722_v29 = vrot.slane %v11238_v6, 2 }
 0x479   : > { %v4005_v47 = vpop.f32.mrf.mxu3 }
 0x47a   : > { %v4043_v7 = vadd.f32 %v4005_v47, %v3747_v1  ;;  %v4552_v31 = vpop.f32.mrf.mxu1  ;;  %6705 = vmatmul.msk.f32.gmra.mxu2 %vm3101_vm5, %v4720_v57  ;;  %v11241_v1 = vld [vmem:[#allocation14_spill] sm:$0xff]  ;;  %v5287_v57 = vsel %vm531_vm2, %v5285_v18, %v5286_v40 }
 0x47b   : > { %v4624_v27 = vadd.f32 %v4552_v31, %v11237_v55  ;;  %v4721_v47 = vrot.slane %v11241_v1, 2  ;;  %v10108_v31 = vld [vmem:[#allocation3 + $0x100] sm:$0x3] }
 0x47c   : > { %v10093_v41 = vadd.f32 %v4296_v34, %v4043_v7  ;;  %v3750_v34 = vadd.f32 %v9787_v61, %v9801_v38  ;;  %v4428_v7 = vrot.slane %v4090_v56, 1  ;;  %v5288_v18 = vrot.slane %v10108_v31, 1 }
 0x47d   : > { %6671 = vmatmul.msk.f32.gmra.mxu1 %vm3101_vm5, %v11239_v3  ;;  %v4846_v2 = vpop.f32.mrf.mxu2  ;;  %v10099_v43 = vadd.f32 %v4843_v25, %v4624_v27  ;;  %v4723_v3 = vsel %vm975_vm4, %v4721_v47, %v4722_v29  ;;  %v5406_v56 = vpop.f32.mrf.mxu0 }
 0x47e   : > { %6723 = vmatmul.msk.f32.gmra.mxu3 %vm3101_vm5, %v10048_v16  ;;  %v4429_v61 = vsel %vm531_vm2, %v11243_v0, %v4428_v7  ;;  %v10128_v0 = vld [vmem:[#allocation3 + $0x110] sm:$0xff] }
 0x47f   : > { %11240 = vst [vmem:[#allocation40_spill] sm:$0xff] %v10099_v43  ;;  %v4093_v43 = vld [vmem:[#allocation3 + $0x190] sm:$0x3] }
 0x480   : > { %6758 = vmatmul.msk.f32.gmra.mxu0 %vm3101_vm5, %v5287_v57  ;;  %v4724_v16 = vrot.slane %v4093_v43, 2 }
 0x481   : > { %v4008_v55 = vpop.f32.mrf.mxu3 }
 0x482   : > { %v4044_v25 = vadd.f32 %v4008_v55, %v3750_v34  ;;  %v4555_v27 = vpop.f32.mrf.mxu1  ;;  %6706 = vmatmul.msk.f32.gmra.mxu2 %vm3101_vm5, %v4723_v3  ;;  %v5289_v34 = vsel %vm531_vm2, %v5286_v40, %v5288_v18  ;;  %v3753_v55 = vadd.f32 %v9809_v62, %v9822_v19  ;;  %v4725_v7 = vsel %vm975_vm4, %v4722_v29, %v4724_v16 }
 0x483   : > { %v4625_v39 = vadd.f32 %v4555_v27, %v11242_v24  ;;  %v4431_v24 = vrot.slane %v11238_v6, 1  ;;  %v5291_v6 = vrot.slane %v10128_v0, 1  ;;  %v4433_v18 = vrot.slane %v4093_v43, 1 }
 0x484   : > { %v10116_v38 = vadd.f32 %v4299_v63, %v4044_v25  ;;  %v10133_v25 = vld [vmem:[#allocation3 + $0x108] sm:$0xff] }
 0x485   : > { %6672 = vmatmul.msk.f32.gmra.mxu1 %vm3101_vm5, %v4429_v61  ;;  %v4849_v57 = vpop.f32.mrf.mxu2  ;;  %v10119_v47 = vadd.f32 %v4846_v2, %v4625_v39  ;;  %v4430_v39 = vrot.slane %v11241_v1, 1  ;;  %v5290_v29 = vrot.slane %v10133_v25, 1  ;;  %v5409_v27 = vpop.f32.mrf.mxu0  ;;  %v10148_v61 = vld [vmem:[#allocation3 + $0x118] sm:$0x3] }
 0x486   : > { %6724 = vmatmul.msk.f32.gmra.mxu3 %vm3101_vm5, %v10043_v37 }
 0x487   : > { %v4432_v62 = vsel %vm531_vm2, %v4430_v39, %v4431_v24  ;;  %v5293_v39 = vrot.slane %v10148_v61, 1 }
 0x488   : > { %6759 = vmatmul.msk.f32.gmra.mxu0 %vm3101_vm5, %v5289_v34 }
 0x489   : > { %v4011_v63 = vpop.f32.mrf.mxu3 }
 0x48a   : > { %v4045_v2 = vadd.f32 %v4011_v63, %v3753_v55  ;;  %v4558_v3 = vpop.f32.mrf.mxu1  ;;  %6707 = vmatmul.msk.f32.gmra.mxu2 %vm3101_vm5, %v4725_v7  ;;  %v6860_v63 = vld [vmem:[%s7083_s14] sm:$0xff] }
 0x48b   : > { %v4626_v40 = vadd.f32 %v4558_v3, %v9785_v20  ;;  %v5292_v20 = vsel %vm531_vm2, %v5290_v29, %v5291_v6  ;;  %v10166_v29 = vld [vmem:[#allocation3 + $0x128] sm:$0xff] }
 0x48c   : > { %v10138_v19 = vadd.f32 %v4302_v54, %v4045_v2  ;;  %v4434_v2 = vsel %vm531_vm2, %v4431_v24, %v4433_v18 }
 0x48d   : > { %6673 = vmatmul.msk.f32.gmra.mxu1 %vm3101_vm5, %v4432_v62  ;;  %v4852_v16 = vpop.f32.mrf.mxu2  ;;  %v10142_v1 = vadd.f32 %v4849_v57, %v4626_v40  ;;  %v11244_v57 = vld [vmem:[#allocation22_spill] sm:$0xff]  ;;  %v5537_v62 = vrot.slane %v9744_v5, 2  ;;  %v5296_v5 = vrot.slane %v10166_v29, 1 }
 0x48e   : > { %6725 = vmatmul.msk.f32.gmra.mxu3 %vm3101_vm5, %v10089_v26 }
 0x490   : > { %6760 = vmatmul.msk.f32.gmra.mxu0 %vm3101_vm5, %v5292_v20  ;;  %v5412_v20 = vpop.f32.mrf.mxu0 }
 0x491   : > { %v5099_v54 = vpop.f32.mrf.mxu3 }
 0x492   : > { %v5195_v34 = vadd.f32 %v5099_v54, %v9852_v46  ;;  %v4561_v55 = vpop.f32.mrf.mxu1  ;;  %6808 = vmatmul.msk.f32.vlgmr.msra.gmra.mxu2 %vm311_vm1, %v6860_v63  ;;  %v5294_v46 = vsel %vm531_vm2, %v5291_v6, %v5293_v39  ;;  %v11245_v54 = vld [vmem:[#allocation28_spill] sm:$0xff] }
 0x493   : > { %v4627_v7 = vadd.f32 %v4561_v55, %v11244_v57  ;;  %v10172_v55 = vld [vmem:[#allocation3 + $0x120] sm:$0xff] }
 0x494   : > { %v10156_v3 = vadd.f32 %v5406_v56, %v5195_v34  ;;  %v5536_v34 = vrot.slane %v11245_v54, 2  ;;  %v6862_v54 = vld [vmem:[%s7083_s14 + $0x10] sm:$0xff] }
 0x495   : > { %6674 = vmatmul.msk.f32.gmra.mxu1 %vm3101_vm5, %v4434_v2  ;;  %v4855_v43 = vpop.f32.mrf.mxu2  ;;  %v10159_v40 = vadd.f32 %v4852_v16, %v4627_v7  ;;  %v6861_v16 = vld [vmem:[%s7083_s14 + $0x8] sm:$0xff] }
 0x496   : > { %6726 = vmatmul.msk.f32.gmra.mxu3 %vm3101_vm5, %v10084_v48  ;;  %v5538_v63 = vsel %vm975_vm4, %v5536_v34, %v5537_v62  ;;  %v11247_v34 = vld [vmem:[#allocation26_spill] sm:$0xff] }
 0x498   : > { %6761 = vmatmul.msk.f32.gmra.mxu0 %vm3101_vm5, %v5294_v46 }
 0x499   : > { %v5102_v24 = vpop.f32.mrf.mxu3 }
 0x49a   : > { %v5196_v56 = vadd.f32 %v5102_v24, %v9871_v9  ;;  %v4564_v18 = vpop.f32.mrf.mxu1  ;;  %6809 = vmatmul.msk.f32.gmra.mxu2 %vm311_vm1, %v6861_v16  ;;  %v5295_v9 = vrot.slane %v10172_v55, 1  ;;  %v10188_v24 = vld [vmem:[#allocation3 + $0x130] sm:$0x3] }
 0x49b   : > { %v4628_v6 = vadd.f32 %v4564_v18, %v9829_v8  ;;  %v11246_v8 = vld [vmem:[#allocation44_spill] sm:$0xff] }
 0x49c   : > { %v10177_v57 = vadd.f32 %v5409_v27, %v5196_v56  ;;  %v5297_v2 = vsel %vm531_vm2, %v5295_v9, %v5296_v5  ;;  %v5539_v46 = vrot.slane %v11246_v8, 2 }
 0x49d   : > { %v4858_v7 = vpop.f32.mrf.mxu2  ;;  %6775 = vmatmul.msk.f32.vlgmr.msra.gmra.mxu1 %vm3101_vm5, %v5538_v63  ;;  %v10181_v39 = vadd.f32 %v4855_v43, %v4628_v6  ;;  %v5415_v43 = vpop.f32.mrf.mxu0  ;;  %v5298_v6 = vrot.slane %v10188_v24, 1 }
 0x49e   : > { %6727 = vmatmul.msk.f32.gmra.mxu3 %vm3101_vm5, %v10133_v25  ;;  %v5540_v63 = vsel %vm975_vm4, %v5537_v62, %v5539_v46  ;;  %v11249_v46 = vld [vmem:[#allocation19_spill] sm:$0xff] }
 0x4a0   : > { %6762 = vmatmul.msk.f32.gmra.mxu0 %vm3101_vm5, %v5297_v2 }
 0x4a1   : > { %v5105_v27 = vpop.f32.mrf.mxu3 }
 0x4a2   : > { %v5197_v56 = vadd.f32 %v5105_v27, %v9893_v35  ;;  %v4567_v18 = vpop.f32.mrf.mxu1  ;;  %6810 = vmatmul.msk.f32.gmra.mxu2 %vm311_vm1, %v6862_v54  ;;  %v5299_v35 = vsel %vm531_vm2, %v5296_v5, %v5298_v6  ;;  %v5542_v27 = vrot.slane %v9797_v49, 2 }
 0x4a3   : > { %v4629_v16 = vadd.f32 %v4567_v18, %v11247_v34  ;;  %v10206_v18 = vld [vmem:[#allocation3 + $0x140] sm:$0xff]  ;;  %v6863_v34 = vld [vmem:[%s7083_s14 + $0x18] sm:$0xff] }
 0x4a4   : > { %v10196_v9 = vadd.f32 %v5412_v20, %v5197_v56  ;;  %v5541_v56 = vrot.slane %v11249_v46, 2  ;;  %v5301_v5 = vrot.slane %v10206_v18, 1 }
 0x4a5   : > { %v4861_v2 = vpop.f32.mrf.mxu2  ;;  %6776 = vmatmul.msk.f32.gmra.mxu1 %vm3101_vm5, %v5540_v63  ;;  %v10199_v8 = vadd.f32 %v4858_v7, %v4629_v16  ;;  %v10212_v7 = vld [vmem:[#allocation3 + $0x138] sm:$0xff]  ;;  %v5418_v63 = vpop.f32.mrf.mxu0 }
 0x4a6   : > { %6728 = vmatmul.msk.f32.gmra.mxu3 %vm3101_vm5, %v10128_v0  ;;  %v5543_v49 = vsel %vm975_vm4, %v5541_v56, %v5542_v27  ;;  %v10228_v56 = vld [vmem:[#allocation3 + $0x148] sm:$0x3] }
 0x4a7   : > { %11248 = vst [vmem:[#allocation49_spill] sm:$0xff] %v10199_v8 }
 0x4a8   : > { %6763 = vmatmul.msk.f32.gmra.mxu0 %vm3101_vm5, %v5299_v35 }
 0x4a9   : > { %v5108_v54 = vpop.f32.mrf.mxu3 }
 0x4aa   : > { %v5198_v62 = vadd.f32 %v5108_v54, %v9912_v42  ;;  %v4570_v20 = vpop.f32.mrf.mxu1  ;;  %6811 = vmatmul.msk.f32.gmra.mxu2 %vm311_vm1, %v6863_v34  ;;  %v5300_v42 = vrot.slane %v10212_v7, 1 }
 0x4ab   : > { %v4630_v16 = vadd.f32 %v4570_v20, %v9868_v23  ;;  %v11251_v20 = vld [vmem:[#allocation21_spill] sm:$0xff] }
 0x4ac   : > { %v10217_v6 = vadd.f32 %v5415_v43, %v5198_v62  ;;  %v5302_v23 = vsel %vm531_vm2, %v5300_v42, %v5301_v5  ;;  %v5544_v46 = vrot.slane %v11251_v20, 2 }
 0x4ad   : > { %v4864_v35 = vpop.f32.mrf.mxu2  ;;  %6777 = vmatmul.msk.f32.gmra.mxu1 %vm3101_vm5, %v5543_v49  ;;  %v10221_v54 = vadd.f32 %v4861_v2, %v4630_v16  ;;  %v6864_v49 = vld [vmem:[%s7083_s14 + $0x20] sm:$0xff]  ;;  %v11252_v2 = vld [vmem:[#allocation13_spill] sm:$0xff] }
 0x4ae   : > { %6729 = vmatmul.msk.f32.gmra.mxu3 %vm3101_vm5, %v10172_v55  ;;  %v5545_v42 = vsel %vm975_vm4, %v5542_v27, %v5544_v46 }
 0x4af   : > { %11250 = vst [vmem:[#allocation10_spill] sm:$0xff] %v10221_v54  ;;  %v5303_v54 = vrot.slane %v10228_v56, 1 }
 0x4b0   : > { %6764 = vmatmul.msk.f32.gmra.mxu0 %vm3101_vm5, %v5302_v23 }
 0x4b1   : > { %v5111_v43 = vpop.f32.mrf.mxu3 }
 0x4b2   : > { %v5199_v62 = vadd.f32 %v5111_v43, %v9934_v14  ;;  %v4573_v34 = vpop.f32.mrf.mxu1  ;;  %6812 = vmatmul.msk.f32.gmra.mxu2 %vm311_vm1, %v6864_v49  ;;  %v5421_v14 = vpop.f32.mrf.mxu0  ;;  %v5304_v43 = vsel %vm531_vm2, %v5301_v5, %v5303_v54  ;;  %v10246_v49 = vld [vmem:[#allocation3 + $0x158] sm:$0xff] }
 0x4b3   : > { %v4631_v16 = vadd.f32 %v4573_v34, %v11252_v2  ;;  %v5547_v34 = vrot.slane %v9838_v22, 2  ;;  %v5306_v5 = vrot.slane %v10246_v49, 1 }
 0x4b4   : > { %v10236_v8 = vadd.f32 %v5418_v63, %v5199_v62  ;;  %v11254_v62 = vld [vmem:[#allocation36_spill] sm:$0xff] }
 0x4b5   : > { %v4867_v20 = vpop.f32.mrf.mxu2  ;;  %6778 = vmatmul.msk.f32.gmra.mxu1 %vm3101_vm5, %v5545_v42  ;;  %v10239_v23 = vadd.f32 %v4864_v35, %v4631_v16  ;;  %v5546_v2 = vrot.slane %v11254_v62, 2  ;;  %v6865_v35 = vld [vmem:[%s7083_s14 + $0x28] sm:$0xff]  ;;  %v10252_v16 = vld [vmem:[#allocation3 + $0x150] sm:$0xff] }
 0x4b6   : > { %6730 = vmatmul.msk.f32.gmra.mxu3 %vm3101_vm5, %v10166_v29 }
 0x4b7   : > { %11253 = vst [vmem:[#allocation20_spill] sm:$0xff] %v10239_v23  ;;  %v5548_v22 = vsel %vm975_vm4, %v5546_v2, %v5547_v34  ;;  %v6866_v23 = vld [vmem:[%s7083_s14 + $0x30] sm:$0xff] }
 0x4b8   : > { %6765 = vmatmul.msk.f32.gmra.mxu0 %vm3101_vm5, %v5304_v43 }
 0x4b9   : > { %v5114_v27 = vpop.f32.mrf.mxu3 }
 0x4ba   : > { %v5200_v63 = vadd.f32 %v5114_v27, %v9953_v60  ;;  %v4576_v46 = vpop.f32.mrf.mxu1  ;;  %6813 = vmatmul.msk.f32.gmra.mxu2 %vm311_vm1, %v6865_v35  ;;  %v5305_v60 = vrot.slane %v10252_v16, 1  ;;  %v10268_v35 = vld [vmem:[#allocation3 + $0x160] sm:$0x3] }
 0x4bb   : > { %v4632_v42 = vadd.f32 %v4576_v46, %v9909_v32  ;;  %v11256_v32 = vld [vmem:[#allocation45_spill] sm:$0xff] }
 0x4bc   : > { %v10257_v54 = vadd.f32 %v5421_v14, %v5200_v63  ;;  %v5307_v62 = vsel %vm531_vm2, %v5305_v60, %v5306_v5  ;;  %v5549_v46 = vrot.slane %v11256_v32, 2  ;;  %v5424_v14 = vpop.f32.mrf.mxu0 }
 0x4bd   : > { %v4870_v43 = vpop.f32.mrf.mxu2  ;;  %6779 = vmatmul.msk.f32.gmra.mxu1 %vm3101_vm5, %v5548_v22  ;;  %v10261_v27 = vadd.f32 %v4867_v20, %v4632_v42  ;;  %v5308_v42 = vrot.slane %v10268_v35, 1 }
 0x4be   : > { %6731 = vmatmul.msk.f32.gmra.mxu3 %vm3101_vm5, %v10212_v7  ;;  %v5550_v60 = vsel %vm975_vm4, %v5547_v34, %v5549_v46 }
 0x4bf   : > { %11255 = vst [vmem:[#allocation35_spill] sm:$0xff] %v10261_v27 }
 0x4c0   : > { %6766 = vmatmul.msk.f32.gmra.mxu0 %vm3101_vm5, %v5307_v62 }
 0x4c1   : > { %v5117_v63 = vpop.f32.mrf.mxu3 }
 0x4c2   : > { %v5201_v2 = vadd.f32 %v5117_v63, %v9975_v12  ;;  %v4579_v22 = vpop.f32.mrf.mxu1  ;;  %6814 = vmatmul.msk.f32.gmra.mxu2 %vm311_vm1, %v6866_v23  ;;  %v5309_v12 = vsel %vm531_vm2, %v5306_v5, %v5308_v42  ;;  %v5552_v23 = vrot.slane %v9879_v51, 2 }
 0x4c3   : > { %v4633_v20 = vadd.f32 %v4579_v22, %v9929_v21  ;;  %v10286_v21 = vld [vmem:[#allocation3 + $0x170] sm:$0xff]  ;;  %v6867_v22 = vld [vmem:[%s7083_s14 + $0x38] sm:$0xff] }
 0x4c4   : > { %v10276_v32 = vadd.f32 %v5424_v14, %v5201_v2  ;;  %v11257_v14 = vld [vmem:[#allocation41_spill] sm:$0xff]  ;;  %v5311_v51 = vrot.slane %v10286_v21, 1 }
 0x4c5   : > { %v4873_v62 = vpop.f32.mrf.mxu2  ;;  %6780 = vmatmul.msk.f32.gmra.mxu1 %vm3101_vm5, %v5550_v60  ;;  %v10279_v27 = vadd.f32 %v4870_v43, %v4633_v20  ;;  %v5551_v2 = vrot.slane %v11257_v14, 2  ;;  %v10292_v43 = vld [vmem:[#allocation3 + $0x168] sm:$0xff]  ;;  %v5427_v20 = vpop.f32.mrf.mxu0 }
 0x4c6   : > { %6732 = vmatmul.msk.f32.gmra.mxu3 %vm3101_vm5, %v10206_v18 }
 0x4c7   : > { %v5553_v42 = vsel %vm975_vm4, %v5551_v2, %v5552_v23  ;;  %v6868_v2 = vld [vmem:[%s7083_s14 + $0x40] sm:$0xff] }
 0x4c8   : > { %6767 = vmatmul.msk.f32.gmra.mxu0 %vm3101_vm5, %v5309_v12 }
 0x4c9   : > { %v5120_v63 = vpop.f32.mrf.mxu3 }
 0x4ca   : > { %v5202_v34 = vadd.f32 %v5120_v63, %v9994_v13  ;;  %v4582_v46 = vpop.f32.mrf.mxu1  ;;  %6815 = vmatmul.msk.f32.gmra.mxu2 %vm311_vm1, %v6867_v22  ;;  %v5310_v13 = vrot.slane %v10292_v43, 1  ;;  %v11258_v22 = vld [vmem:[#allocation32_spill] sm:$0xff] }
 0x4cb   : > { %v4634_v5 = vadd.f32 %v4582_v46, %v9950_v15  ;;  %v5554_v15 = vrot.slane %v11258_v22, 2  ;;  %v10308_v46 = vld [vmem:[#allocation3 + $0x178] sm:$0x3]  ;;  %v5557_v22 = vrot.slane %v9920_v33, 2 }
 0x4cc   : > { %v10297_v60 = vadd.f32 %v5427_v20, %v5202_v34  ;;  %v5312_v14 = vsel %vm531_vm2, %v5310_v13, %v5311_v51 }
 0x4cd   : > { %v4876_v12 = vpop.f32.mrf.mxu2  ;;  %6781 = vmatmul.msk.f32.gmra.mxu1 %vm3101_vm5, %v5553_v42  ;;  %v10301_v63 = vadd.f32 %v4873_v62, %v4634_v5  ;;  %v5313_v62 = vrot.slane %v10308_v46, 1  ;;  %v5555_v5 = vsel %vm975_vm4, %v5552_v23, %v5554_v15  ;;  %v6869_v23 = vld [vmem:[%s7083_s14 + $0x48] sm:$0xff] }
 0x4ce   : > { %6733 = vmatmul.msk.f32.gmra.mxu3 %vm3101_vm5, %v10252_v16 }
 0x4d0   : > { %6768 = vmatmul.msk.f32.gmra.mxu0 %vm3101_vm5, %v5312_v14  ;;  %v5314_v14 = vsel %vm531_vm2, %v5311_v51, %v5313_v62 }
 0x4d2   : > { %v4585_v34 = vpop.f32.mrf.mxu1  ;;  %6816 = vmatmul.msk.f32.gmra.mxu2 %vm311_vm1, %v6868_v2  ;;  %v10323_v2 = vld [vmem:[#allocation3 + $0x188] sm:$0xff] }
 0x4d3   : > { %v4635_v20 = vadd.f32 %v4585_v34, %v9970_v58  ;;  %v5556_v34 = vrot.slane %v9925_v59, 2 }
 0x4d5   : > { %v4879_v42 = vpop.f32.mrf.mxu2  ;;  %6782 = vmatmul.msk.f32.gmra.mxu1 %vm3101_vm5, %v5555_v5  ;;  %v10316_v13 = vadd.f32 %v4876_v12, %v4635_v20  ;;  %v10328_v12 = vld [vmem:[#allocation3 + $0x180] sm:$0xff]  ;;  %v5316_v20 = vrot.slane %v10323_v2, 1  ;;  %v5558_v51 = vsel %vm975_vm4, %v5556_v34, %v5557_v22 }
 0x4d6   : > { %6734 = vmatmul.msk.f32.gmra.mxu3 %vm3101_vm5, %v10246_v49  ;;  %v5315_v62 = vrot.slane %v10328_v12, 1  ;;  %v6870_v34 = vld [vmem:[%s7083_s14 + $0x50] sm:$0xff] }
 0x4d8   : > { %6769 = vmatmul.msk.f32.gmra.mxu0 %vm3101_vm5, %v5314_v14  ;;  %v5317_v59 = vsel %vm531_vm2, %v5315_v62, %v5316_v20  ;;  %v5559_v14 = vrot.slane %v9942_v11, 2  ;;  %v10354_v11 = vld [vmem:[#allocation3 + $0x1a0] sm:$0xff] }
 0x4da   : > { %v4588_v58 = vpop.f32.mrf.mxu1  ;;  %6817 = vmatmul.msk.f32.gmra.mxu2 %vm311_vm1, %v6869_v23 }
 0x4db   : > { %v4636_v15 = vadd.f32 %v4588_v58, %v9991_v52  ;;  %v10342_v52 = vld [vmem:[#allocation3 + $0x190] sm:$0x3] }
 0x4dd   : > { %v4882_v33 = vpop.f32.mrf.mxu2  ;;  %6783 = vmatmul.msk.f32.gmra.mxu1 %vm3101_vm5, %v5558_v51  ;;  %v10335_v5 = vadd.f32 %v4879_v42, %v4636_v15  ;;  %v5318_v42 = vrot.slane %v10342_v52, 1  ;;  %v5560_v15 = vsel %vm975_vm4, %v5557_v22, %v5559_v14  ;;  %v5321_v14 = vrot.slane %v10354_v11, 1 }
 0x4de   : > { %6735 = vmatmul.msk.f32.gmra.mxu3 %vm3101_vm5, %v10292_v43 }
 0x4e0   : > { %6770 = vmatmul.msk.f32.gmra.mxu0 %vm3101_vm5, %v5317_v59  ;;  %v5319_v59 = vsel %vm531_vm2, %v5316_v20, %v5318_v42 }
 0x4e2   : > { %v4591_v58 = vpop.f32.mrf.mxu1  ;;  %6818 = vmatmul.msk.f32.gmra.mxu2 %vm311_vm1, %v6870_v34  ;;  %v5562_v34 = vrot.slane %v9961_v44, 2 }
 0x4e3   : > { %v4637_v23 = vadd.f32 %v4591_v58, %v10011_v17  ;;  %v10359_v17 = vld [vmem:[#allocation3 + $0x198] sm:$0xff] }
 0x4e4   : > { %v5320_v22 = vrot.slane %v10359_v17, 1 }
 0x4e5   : > { %v4885_v51 = vpop.f32.mrf.mxu2  ;;  %6784 = vmatmul.msk.f32.gmra.mxu1 %vm3101_vm5, %v5560_v15  ;;  %v10350_v62 = vadd.f32 %v4882_v33, %v4637_v23  ;;  %v5561_v33 = vrot.slane %v9966_v4, 2  ;;  %v6871_v23 = vld [vmem:[%s7083_s14 + $0x58] sm:$0xff]  ;;  %v5564_v4 = vrot.slane %v9983_v53, 2  ;;  %v5567_v53 = vrot.slane %v10002_v45, 2 }
 0x4e6   : > { %6736 = vmatmul.msk.f32.gmra.mxu3 %vm3101_vm5, %v10286_v21  ;;  %v5322_v42 = vsel %vm531_vm2, %v5320_v22, %v5321_v14  ;;  %v5569_v45 = vrot.slane %v10024_v10, 2 }
 0x4e7   : > { %11259 = vst [vmem:[#allocation24_spill] sm:$0xff] %v10350_v62  ;;  %v5563_v20 = vsel %vm975_vm4, %v5561_v33, %v5562_v34  ;;  %v10374_v62 = vld [vmem:[#allocation3 + $0x1a8] sm:$0x3]  ;;  %v6872_v33 = vld [vmem:[%s7083_s14 + $0x60] sm:$0xff] }
 0x4e8   : > { %6771 = vmatmul.msk.f32.gmra.mxu0 %vm3101_vm5, %v5319_v59 }
 0x4ea   : > { %v4594_v58 = vpop.f32.mrf.mxu1  ;;  %6819 = vmatmul.msk.f32.gmra.mxu2 %vm311_vm1, %v6871_v23 }
 0x4eb   : > { %v4638_v15 = vadd.f32 %v4594_v58, %v10032_v50  ;;  %v5323_v50 = vrot.slane %v10374_v62, 1 }
 0x4ed   : > { %v4888_v44 = vpop.f32.mrf.mxu2  ;;  %6785 = vmatmul.msk.f32.gmra.mxu1 %vm3101_vm5, %v5563_v20  ;;  %v10370_v59 = vadd.f32 %v4885_v51, %v4638_v15  ;;  %v5565_v51 = vsel %vm975_vm4, %v5562_v34, %v5564_v4  ;;  %v5324_v15 = vsel %vm531_vm2, %v5321_v14, %v5323_v50 }
 0x4ee   : > { %6737 = vmatmul.msk.f32.gmra.mxu3 %vm3101_vm5, %v10328_v12 }
 0x4f0   : > { %6772 = vmatmul.msk.f32.gmra.mxu0 %vm3101_vm5, %v5322_v42 }
 0x4f2   : > { %v4597_v58 = vpop.f32.mrf.mxu1  ;;  %6820 = vmatmul.msk.f32.gmra.mxu2 %vm311_vm1, %v6872_v33 }
 0x4f3   : > { %v4639_v22 = vadd.f32 %v4597_v58, %v10052_v28  ;;  %v5566_v28 = vrot.slane %v10007_v30, 2  ;;  %v6873_v58 = vld [vmem:[%s7083_s14 + $0x68] sm:$0xff]  ;;  %v6874_v30 = vld [vmem:[%s7083_s14 + $0x70] sm:$0xff] }
 0x4f5   : > { %v4891_v23 = vpop.f32.mrf.mxu2  ;;  %6786 = vmatmul.msk.f32.gmra.mxu1 %vm3101_vm5, %v5565_v51  ;;  %v10385_v20 = vadd.f32 %v4888_v44, %v4639_v22  ;;  %v5568_v14 = vsel %vm975_vm4, %v5566_v28, %v5567_v53  ;;  %v6875_v28 = vld [vmem:[%s7083_s14 + $0x78] sm:$0xff] }
 0x4f6   : > { %6738 = vmatmul.msk.f32.gmra.mxu3 %vm3101_vm5, %v10323_v2 }
 0x4f8   : > { %6773 = vmatmul.msk.f32.gmra.mxu0 %vm3101_vm5, %v5324_v15  ;;  %v11260_v15 = vld [vmem:[#allocation12_spill] sm:$0xff] }
 0x4fa   : > { %v4600_v42 = vpop.f32.mrf.mxu1  ;;  %6821 = vmatmul.msk.f32.gmra.mxu2 %vm311_vm1, %v6873_v58 }
 0x4fb   : > { %v4640_v34 = vadd.f32 %v4600_v42, %v10073_v36  ;;  %v5570_v36 = vsel %vm975_vm4, %v5567_v53, %v5569_v45  ;;  %v5571_v42 = vrot.slane %v11260_v15, 2  ;;  %v6877_v15 = vld [vmem:[%s7083_s14 + $0x88] sm:$0xff] }
 0x4fd   : > { %v4894_v44 = vpop.f32.mrf.mxu2  ;;  %6787 = vmatmul.msk.f32.gmra.mxu1 %vm3101_vm5, %v5568_v14  ;;  %v10397_v4 = vadd.f32 %v4891_v23, %v4640_v34  ;;  %v5572_v23 = vrot.slane %v10043_v37, 2  ;;  %v11261_v14 = vld [vmem:[#allocation37_spill] sm:$0xff]  ;;  %v6876_v37 = vld [vmem:[%s7083_s14 + $0x80] sm:$0xff] }
 0x4fe   : > { %6739 = vmatmul.msk.f32.gmra.mxu3 %vm3101_vm5, %v10359_v17 }
 0x4ff   : > { %v5573_v53 = vsel %vm975_vm4, %v5571_v42, %v5572_v23 }
 0x502   : > { %v4603_v50 = vpop.f32.mrf.mxu1  ;;  %6822 = vmatmul.msk.f32.gmra.mxu2 %vm311_vm1, %v6874_v30 }
 0x503   : > { %v4641_v33 = vadd.f32 %v4603_v50, %v10093_v41 }
 0x505   : > { %v4897_v22 = vpop.f32.mrf.mxu2  ;;  %6788 = vmatmul.msk.f32.gmra.mxu1 %vm3101_vm5, %v5570_v36  ;;  %v10407_v51 = vadd.f32 %v4894_v44, %v4641_v33  ;;  %v5574_v44 = vrot.slane %v11261_v14, 2  ;;  %v10431_v36 = vld [vmem:[%s10752_s6] ss:$0 sm:$0xff]  ;;  %v6878_v14 = vld [vmem:[%s7083_s14 + $0x90] sm:$0xff] }
 0x506   : > { %6740 = vmatmul.msk.f32.gmra.mxu3 %vm3101_vm5, %v10354_v11 }
 0x507   : > { %v5575_v30 = vsel %vm975_vm4, %v5572_v23, %v5574_v44  ;;  %v5576_v23 = vrot.slane %v10089_v26, 2 }
 0x50a   : > { %v4606_v10 = vpop.f32.mrf.mxu1  ;;  %6823 = vmatmul.msk.f32.gmra.mxu2 %vm311_vm1, %v6875_v28 }
 0x50b   : > { %v4642_v41 = vadd.f32 %v4606_v10, %v10116_v38  ;;  %v10437_v10 = vld [vmem:[%s10750_s4] ss:$0 sm:$0xff] }
 0x50d   : > { %v4900_v58 = vpop.f32.mrf.mxu2  ;;  %6789 = vmatmul.msk.f32.gmra.mxu1 %vm3101_vm5, %v5573_v53  ;;  %v10418_v34 = vadd.f32 %v4897_v22, %v4642_v41  ;;  %v5577_v22 = vrot.slane %v10084_v48, 2 }
 0x50f   : > { %v5578_v41 = vsel %vm975_vm4, %v5576_v23, %v5577_v22  ;;  %v10469_v23 = vpop.f32.mrf.mxu0 }
 0x512   : > { %v4609_v45 = vpop.f32.mrf.mxu1  ;;  %6824 = vmatmul.msk.f32.gmra.mxu2 %vm311_vm1, %v6876_v37  ;;  %v10461_v37 = vpop.f32.mrf.mxu3 }
 0x513   : > { %v4643_v50 = vadd.f32 %v4609_v45, %v10138_v19 }
 0x515   : > { %6790 = vmatmul.msk.f32.gmra.mxu1 %vm3101_vm5, %v5575_v30  ;;  %v5982_v38 = vpop.f32.mrf.mxu2  ;;  %v10426_v33 = vadd.f32 %v4900_v58, %v4643_v50 }
 0x516   : > { %v5983_v28 = vadd.f32 %v10431_v36, %v5982_v38 }
 0x51a   : > { %v5697_v19 = vpop.f32.mrf.mxu1  ;;  %6825 = vmatmul.msk.f32.gmra.mxu2 %vm311_vm1, %v6877_v15  ;;  %v5581_v15 = vrot.slane %v10133_v25, 2  ;;  %v5584_v25 = vrot.slane %v10148_v61, 2 }
 0x51b   : > { %v5793_v42 = vadd.f32 %v5697_v19, %v10156_v3  ;;  %v5579_v3 = vrot.slane %v10108_v31, 2  ;;  %v5582_v19 = vrot.slane %v10128_v0, 2 }
 0x51d   : > { %v5829_v48 = vadd.f32 %v10437_v10, %v5793_v42  ;;  %6791 = vmatmul.msk.f32.gmra.mxu1 %vm3101_vm5, %v5578_v41  ;;  %v5985_v53 = vpop.f32.mrf.mxu2  ;;  %v5580_v50 = vsel %vm975_vm4, %v5577_v22, %v5579_v3  ;;  %v6879_v42 = vld [vmem:[%s7083_s14 + $0x98] sm:$0xff]  ;;  %v5583_v41 = vsel %vm975_vm4, %v5581_v15, %v5582_v19  ;;  %v6881_v15 = vld [vmem:[%s7083_s14 + $0xa8] sm:$0xff] }
 0x51e   : > { %v5986_v45 = vadd.f32 %v10431_v36, %v5985_v53  ;;  %v10479_v53 = vpop.f32.mrf.mxu3 }
 0x51f   : > { %v6078_v26 = vadd.f32 %v5983_v28, %v5829_v48 }
 0x521   : > { %6110 = vst.msk [vmem:[%s10452_s17] sm:$0xff] %vm3101_vm5, %v6078_v26 }
 0x522   : > { %v5700_v58 = vpop.f32.mrf.mxu1  ;;  %6826 = vmatmul.msk.f32.gmra.mxu2 %vm311_vm1, %v6878_v14 }
 0x523   : > { %v5794_v44 = vadd.f32 %v5700_v58, %v10177_v57 }
 0x525   : > { %v5830_v30 = vadd.f32 %v10437_v10, %v5794_v44  ;;  %6792 = vmatmul.msk.f32.gmra.mxu1 %vm3101_vm5, %v5580_v50  ;;  %v5988_v31 = vpop.f32.mrf.mxu2  ;;  %v10488_v44 = vpop.f32.mrf.mxu0 }
 0x526   : > { %v5989_v28 = vadd.f32 %v10431_v36, %v5988_v31  ;;  %v10493_v31 = vpop.f32.mrf.mxu3 }
 0x527   : > { %v6079_v38 = vadd.f32 %v5986_v45, %v5830_v30  ;;  %v5585_v45 = vsel %vm975_vm4, %v5582_v19, %v5584_v25 }
 0x529   : > { %6111 = vst.msk [vmem:[%s10452_s17 + $0x8] sm:$0xff] %vm3101_vm5, %v6079_v38  ;;  %v5587_v38 = vrot.slane %v10166_v29, 2 }
 0x52a   : > { %v5703_v57 = vpop.f32.mrf.mxu1  ;;  %6827 = vmatmul.msk.f32.gmra.mxu2 %vm311_vm1, %v6879_v42 }
 0x52b   : > { %v5795_v22 = vadd.f32 %v5703_v57, %v10196_v9  ;;  %v6880_v9 = vld [vmem:[%s7083_s14 + $0xa0] sm:$0xff]  ;;  %v5586_v57 = vrot.slane %v10172_v55, 2  ;;  %v5589_v55 = vrot.slane %v10188_v24, 2 }
 0x52d   : > { %v5831_v0 = vadd.f32 %v10437_v10, %v5795_v22  ;;  %6793 = vmatmul.msk.f32.gmra.mxu1 %vm3101_vm5, %v5583_v41  ;;  %v5991_v48 = vpop.f32.mrf.mxu2  ;;  %v5588_v22 = vsel %vm975_vm4, %v5586_v57, %v5587_v38  ;;  %v10506_v41 = vpop.f32.mrf.mxu0 }
 0x52e   : > { %v5992_v14 = vadd.f32 %v10431_v36, %v5991_v48  ;;  %v10511_v48 = vpop.f32.mrf.mxu3 }
 0x52f   : > { %v6080_v26 = vadd.f32 %v5989_v28, %v5831_v0 }
 0x531   : > { %6112 = vst.msk [vmem:[%s10452_s17 + $0x10] sm:$0xff] %vm3101_vm5, %v6080_v26  ;;  %v6882_v26 = vld [vmem:[%s7083_s14 + $0xb0] sm:$0xff] }
 0x532   : > { %v5706_v3 = vpop.f32.mrf.mxu1  ;;  %6828 = vmatmul.msk.f32.gmra.mxu2 %vm311_vm1, %v6880_v9  ;;  %v5590_v9 = vsel %vm975_vm4, %v5587_v38, %v5589_v55 }
 0x533   : > { %v5796_v58 = vadd.f32 %v5706_v3, %v10217_v6 }
 0x535   : > { %v5832_v50 = vadd.f32 %v10437_v10, %v5796_v58  ;;  %6794 = vmatmul.msk.f32.gmra.mxu1 %vm3101_vm5, %v5585_v45  ;;  %v5994_v61 = vpop.f32.mrf.mxu2  ;;  %v10520_v45 = vpop.f32.mrf.mxu0 }
 0x536   : > { %v5995_v42 = vadd.f32 %v10431_v36, %v5994_v61  ;;  %v10530_v57 = vpop.f32.mrf.mxu3 }
 0x537   : > { %v6081_v30 = vadd.f32 %v5992_v14, %v5832_v50  ;;  %v5592_v50 = vrot.slane %v10206_v18, 2 }
 0x539   : > { %6113 = vst.msk [vmem:[%s10452_s17 + $0x18] sm:$0xff] %vm3101_vm5, %v6081_v30  ;;  %v6883_v30 = vld [vmem:[%s7083_s14 + $0xb8] sm:$0xff] }
 0x53a   : > { %v5709_v6 = vpop.f32.mrf.mxu1  ;;  %6829 = vmatmul.msk.f32.gmra.mxu2 %vm311_vm1, %v6881_v15 }
 0x53b   : > { %v5797_v19 = vadd.f32 %v5709_v6, %v10236_v8 }
 0x53d   : > { %v5833_v28 = vadd.f32 %v10437_v10, %v5797_v19  ;;  %6795 = vmatmul.msk.f32.gmra.mxu1 %vm3101_vm5, %v5588_v22  ;;  %v5997_v29 = vpop.f32.mrf.mxu2  ;;  %v5594_v22 = vrot.slane %v10228_v56, 2 }
 0x53e   : > { %v5998_v3 = vadd.f32 %v10431_v36, %v5997_v29 }
 0x53f   : > { %v6082_v0 = vadd.f32 %v5995_v42, %v5833_v28  ;;  %v6884_v28 = vld [vmem:[%s7083_s14 + $0xc0] sm:$0xff]  ;;  %v5595_v55 = vsel %vm975_vm4, %v5592_v50, %v5594_v22  ;;  %v6886_v22 = vld [vmem:[%s7083_s14 + $0xd0] sm:$0xff] }
 0x541   : > { %6114 = vst.msk [vmem:[%s10452_s17 + $0x20] sm:$0xff] %vm3101_vm5, %v6082_v0 }
 0x542   : > { %v5712_v8 = vpop.f32.mrf.mxu1  ;;  %6830 = vmatmul.msk.f32.gmra.mxu2 %vm311_vm1, %v6882_v26 }
 0x543   : > { %v5798_v25 = vadd.f32 %v5712_v8, %v10257_v54  ;;  %v5591_v54 = vrot.slane %v10212_v7, 2  ;;  %v10538_v7 = vpop.f32.mrf.mxu0  ;;  %v11262_v8 = vld [vmem:[#allocation42_spill] sm:$0xff] }
 0x544   : > { %v5203_v26 = vadd.f32 %v10461_v37, %v11262_v8 }
 0x545   : > { %v5834_v58 = vadd.f32 %v10437_v10, %v5798_v25  ;;  %6796 = vmatmul.msk.f32.gmra.mxu1 %vm3101_vm5, %v5590_v9  ;;  %v6000_v24 = vpop.f32.mrf.mxu2  ;;  %v5593_v15 = vsel %vm975_vm4, %v5591_v54, %v5592_v50  ;;  %v6885_v50 = vld [vmem:[%s7083_s14 + $0xc8] sm:$0xff] }
 0x546   : > { %v6001_v6 = vadd.f32 %v10431_v36, %v6000_v24 }
 0x547   : > { %v6083_v14 = vadd.f32 %v5998_v3, %v5834_v58  ;;  %v10549_v3 = vpop.f32.mrf.mxu3  ;;  %v5597_v58 = vrot.slane %v10246_v49, 2  ;;  %v11263_v49 = vld [vmem:[#allocation39_spill] sm:$0xff] }
 0x549   : > { %6115 = vst.msk [vmem:[%s10452_s17 + $0x28] sm:$0xff] %vm3101_vm5, %v6083_v14  ;;  %v5596_v14 = vrot.slane %v10252_v16, 2 }
 0x54a   : > { %v5715_v61 = vpop.f32.mrf.mxu1  ;;  %6831 = vmatmul.msk.f32.gmra.mxu2 %vm311_vm1, %v6883_v30 }
 0x54b   : > { %v5799_v38 = vadd.f32 %v5715_v61, %v10276_v32  ;;  %v10559_v54 = vpop.f32.mrf.mxu0  ;;  %v5598_v30 = vsel %vm975_vm4, %v5596_v14, %v5597_v58 }
 0x54d   : > { %v5835_v19 = vadd.f32 %v10437_v10, %v5799_v38  ;;  %6797 = vmatmul.msk.f32.gmra.mxu1 %vm3101_vm5, %v5593_v15  ;;  %v6003_v18 = vpop.f32.mrf.mxu2  ;;  %v5204_v38 = vadd.f32 %v10479_v53, %v11263_v49 }
 0x54e   : > { %v6004_v0 = vadd.f32 %v10431_v36, %v6003_v18 }
 0x54f   : > { %v6084_v42 = vadd.f32 %v6001_v6, %v5835_v19  ;;  %v10566_v15 = vpop.f32.mrf.mxu3  ;;  %v5599_v19 = vrot.slane %v10268_v35, 2  ;;  %v5511_v18 = vadd.f32 %v10488_v44, %v5204_v38  ;;  %v5604_v38 = vrot.slane %v10308_v46, 2 }
 0x551   : > { %6116 = vst.msk [vmem:[%s10452_s17 + $0x30] sm:$0xff] %vm3101_vm5, %v6084_v42 }
 0x552   : > { %v5718_v32 = vpop.f32.mrf.mxu1  ;;  %6832 = vmatmul.msk.f32.gmra.mxu2 %vm311_vm1, %v6884_v28  ;;  %v5600_v28 = vsel %vm975_vm4, %v5597_v58, %v5599_v19  ;;  %v6887_v58 = vld [vmem:[%s7083_s14 + $0xd8] sm:$0xff] }
 0x553   : > { %v5800_v29 = vadd.f32 %v5718_v32, %v10297_v60  ;;  %v5510_v60 = vadd.f32 %v10469_v23, %v5203_v26  ;;  %v10580_v8 = vpop.f32.mrf.mxu0  ;;  %v5602_v26 = vrot.slane %v10286_v21, 2  ;;  %v11265_v21 = vld [vmem:[#allocation47_spill] sm:$0xff] }
 0x555   : > { %v5836_v56 = vadd.f32 %v10437_v10, %v5800_v29  ;;  %6798 = vmatmul.msk.f32.gmra.mxu1 %vm3101_vm5, %v5595_v55  ;;  %v6006_v25 = vpop.f32.mrf.mxu2  ;;  %v11264_v29 = vld [vmem:[#allocation30_spill] sm:$0xff]  ;;  %v5605_v46 = vsel %vm975_vm4, %v5602_v26, %v5604_v38 }
 0x556   : > { %v6007_v61 = vadd.f32 %v10431_v36, %v6006_v25 }
 0x557   : > { %v6085_v9 = vadd.f32 %v6004_v0, %v5836_v56  ;;  %v5205_v0 = vadd.f32 %v10493_v31, %v11264_v29  ;;  %v10586_v25 = vpop.f32.mrf.mxu3  ;;  %v5601_v31 = vrot.slane %v10292_v43, 2 }
 0x559   : > { %6117 = vst.msk [vmem:[%s10452_s17 + $0x38] sm:$0xff] %vm3101_vm5, %v6085_v9  ;;  %v5512_v56 = vadd.f32 %v10506_v41, %v5205_v0  ;;  %v5603_v14 = vsel %vm975_vm4, %v5601_v31, %v5602_v26  ;;  %v5611_v41 = vrot.slane %v10359_v17, 2 }
 0x55a   : > { %v5721_v24 = vpop.f32.mrf.mxu1  ;;  %6833 = vmatmul.msk.f32.gmra.mxu2 %vm311_vm1, %v6885_v50  ;;  %v5206_v50 = vadd.f32 %v10511_v48, %v11265_v21 }
 0x55b   : > { %v5801_v37 = vadd.f32 %v5721_v24, %v5510_v60  ;;  %v10599_v49 = vpop.f32.mrf.mxu0 }
 0x55d   : > { %v5837_v23 = vadd.f32 %v10437_v10, %v5801_v37  ;;  %6799 = vmatmul.msk.f32.gmra.mxu1 %vm3101_vm5, %v5598_v30  ;;  %v6009_v6 = vpop.f32.mrf.mxu2  ;;  %v5612_v37 = vrot.slane %v10354_v11, 2 }
 0x55e   : > { %v6010_v32 = vadd.f32 %v10431_v36, %v6009_v6  ;;  %v6888_v6 = vld [vmem:[%s7083_s14 + $0xe0] sm:$0xff] }
 0x55f   : > { %v6086_v16 = vadd.f32 %v6007_v61, %v5837_v23  ;;  %v5513_v23 = vadd.f32 %v10520_v45, %v5206_v50  ;;  %v5613_v17 = vsel %vm975_vm4, %v5611_v41, %v5612_v37  ;;  %v5209_v41 = vadd.f32 %v10566_v15, %v10142_v1 }
 0x560   : > { %v5210_v1 = vadd.f32 %v10586_v25, %v10159_v40 }
 0x561   : > { %6118 = vst.msk [vmem:[%s10452_s17 + $0x40] sm:$0xff] %vm3101_vm5, %v6086_v16 }
 0x562   : > { %v5724_v42 = vpop.f32.mrf.mxu1  ;;  %6834 = vmatmul.msk.f32.gmra.mxu2 %vm311_vm1, %v6886_v22 }
 0x563   : > { %v5802_v53 = vadd.f32 %v5724_v42, %v5511_v18  ;;  %v5147_v18 = vpop.f32.mrf.mxu3  ;;  %v11266_v42 = vld [vmem:[#allocation40_spill] sm:$0xff]  ;;  %v5454_v0 = vpop.f32.mrf.mxu0 }
 0x564   : > { %v5207_v22 = vadd.f32 %v10530_v57, %v11266_v42  ;;  %v5517_v42 = vadd.f32 %v10599_v49, %v5210_v1 }
 0x565   : > { %v5838_v35 = vadd.f32 %v10437_v10, %v5802_v53  ;;  %6800 = vmatmul.msk.f32.gmra.mxu1 %vm3101_vm5, %v5600_v28  ;;  %v6012_v55 = vpop.f32.mrf.mxu2  ;;  %v5607_v28 = vrot.slane %v10323_v2, 2  ;;  %v5208_v2 = vadd.f32 %v10549_v3, %v10119_v47 }
 0x566   : > { %v6013_v24 = vadd.f32 %v10431_v36, %v6012_v55  ;;  %v5514_v29 = vadd.f32 %v10538_v7, %v5207_v22  ;;  %v5606_v55 = vrot.slane %v10328_v12, 2  ;;  %v5609_v12 = vrot.slane %v10342_v52, 2 }
 0x567   : > { %v6087_v44 = vadd.f32 %v6010_v32, %v5838_v35 }
 0x568   : > { %v5610_v50 = vsel %vm975_vm4, %v5607_v28, %v5609_v12 }
 0x569   : > { %6119 = vst.msk [vmem:[%s10452_s17 + $0x48] sm:$0xff] %vm3101_vm5, %v6087_v44  ;;  %v6889_v44 = vld [vmem:[%s7083_s14 + $0xe8] sm:$0xff] }
 0x56a   : > { %v5727_v9 = vpop.f32.mrf.mxu1  ;;  %6835 = vmatmul.msk.f32.gmra.mxu2 %vm311_vm1, %v6887_v58 }
 0x56b   : > { %v5803_v60 = vadd.f32 %v5727_v9, %v5512_v56  ;;  %v5608_v56 = vsel %vm975_vm4, %v5606_v55, %v5607_v28  ;;  %v5150_v31 = vpop.f32.mrf.mxu3  ;;  %v5457_v21 = vpop.f32.mrf.mxu0 }
 0x56d   : > { %v5839_v61 = vadd.f32 %v10437_v10, %v5803_v60  ;;  %6801 = vmatmul.msk.f32.gmra.mxu1 %vm3101_vm5, %v5603_v14  ;;  %v6015_v43 = vpop.f32.mrf.mxu2  ;;  %v5515_v60 = vadd.f32 %v10559_v54, %v5208_v2  ;;  %v6890_v14 = vld [vmem:[%s7083_s14 + $0xf0] sm:$0xff] }
 0x56e   : > { %v6016_v19 = vadd.f32 %v10431_v36, %v6015_v43 }
 0x56f   : > { %v6088_v30 = vadd.f32 %v6013_v24, %v5839_v61 }
 0x571   : > { %6120 = vst.msk [vmem:[%s10452_s17 + $0x50] sm:$0xff] %vm3101_vm5, %v6088_v30  ;;  %v5516_v30 = vadd.f32 %v10580_v8, %v5209_v41 }
 0x572   : > { %v5730_v48 = vpop.f32.mrf.mxu1  ;;  %6836 = vmatmul.msk.f32.gmra.mxu2 %vm311_vm1, %v6888_v6 }
 0x573   : > { %v5804_v16 = vadd.f32 %v5730_v48, %v5513_v23  ;;  %v5153_v43 = vpop.f32.mrf.mxu3  ;;  %v6891_v23 = vld [vmem:[%s7083_s14 + $0xf8] sm:$0xff] }
 0x575   : > { %v5840_v45 = vadd.f32 %v10437_v10, %v5804_v16  ;;  %6802 = vmatmul.msk.f32.gmra.mxu1 %vm3101_vm5, %v5605_v46  ;;  %v6018_v53 = vpop.f32.mrf.mxu2  ;;  %v5614_v46 = vrot.slane %v10374_v62, 2 }
 0x576   : > { %v6019_v26 = vadd.f32 %v10431_v36, %v6018_v53 }
 0x577   : > { %v6089_v32 = vadd.f32 %v6016_v19, %v5840_v45  ;;  %v5460_v19 = vpop.f32.mrf.mxu0  ;;  %v5615_v40 = vsel %vm975_vm4, %v5612_v37, %v5614_v46 }
 0x579   : > { %6121 = vst.msk [vmem:[%s10452_s17 + $0x58] sm:$0xff] %vm3101_vm5, %v6089_v32 }
 0x57a   : > { %v5733_v35 = vpop.f32.mrf.mxu1  ;;  %6837 = vmatmul.msk.f32.gmra.mxu2 %vm311_vm1, %v6889_v44  ;;  %v11267_v44 = vld [vmem:[#allocation49_spill] sm:$0xff] }
 0x57b   : > { %v5805_v57 = vadd.f32 %v5733_v35, %v5514_v29  ;;  %v5156_v22 = vpop.f32.mrf.mxu3 }
 0x57d   : > { %v5841_v9 = vadd.f32 %v10437_v10, %v5805_v57  ;;  %6803 = vmatmul.msk.f32.gmra.mxu1 %vm3101_vm5, %v5608_v56  ;;  %v6021_v7 = vpop.f32.mrf.mxu2  ;;  %v5212_v57 = vadd.f32 %v5150_v31, %v11267_v44 }
 0x57e   : > { %v6022_v3 = vadd.f32 %v10431_v36, %v6021_v7 }
 0x57f   : > { %v6090_v58 = vadd.f32 %v6019_v26, %v5841_v9  ;;  %v5463_v29 = vpop.f32.mrf.mxu0  ;;  %v5519_v56 = vadd.f32 %v5457_v21, %v5212_v57 }
 0x581   : > { %6122 = vst.msk [vmem:[%s10452_s17 + $0x60] sm:$0xff] %vm3101_vm5, %v6090_v58  ;;  %v11268_v58 = vld [vmem:[#allocation10_spill] sm:$0xff] }
 0x582   : > { %v5736_v24 = vpop.f32.mrf.mxu1  ;;  %6838 = vmatmul.msk.f32.gmra.mxu2 %vm311_vm1, %v6890_v14  ;;  %v5213_v12 = vadd.f32 %v5153_v43, %v11268_v58 }
 0x583   : > { %v5806_v47 = vadd.f32 %v5736_v24, %v5515_v60  ;;  %v5159_v55 = vpop.f32.mrf.mxu3 }
 0x585   : > { %v5842_v52 = vadd.f32 %v10437_v10, %v5806_v47  ;;  %6804 = vmatmul.msk.f32.gmra.mxu1 %vm3101_vm5, %v5610_v50  ;;  %v6024_v61 = vpop.f32.mrf.mxu2  ;;  %v5520_v47 = vadd.f32 %v5460_v19, %v5213_v12 }
 0x586   : > { %v6025_v6 = vadd.f32 %v10431_v36, %v6024_v61 }
 0x587   : > { %v6091_v54 = vadd.f32 %v6022_v3, %v5842_v52  ;;  %v5466_v2 = vpop.f32.mrf.mxu0  ;;  %v11269_v52 = vld [vmem:[#allocation20_spill] sm:$0xff] }
 0x588   : > { %v5214_v61 = vadd.f32 %v5156_v22, %v11269_v52 }
 0x589   : > { %6123 = vst.msk [vmem:[%s10452_s17 + $0x68] sm:$0xff] %vm3101_vm5, %v6091_v54 }
 0x58a   : > { %v5739_v38 = vpop.f32.mrf.mxu1  ;;  %6839 = vmatmul.msk.f32.gmra.mxu2 %vm311_vm1, %v6891_v23  ;;  %v5521_v23 = vadd.f32 %v5463_v29, %v5214_v61 }
 0x58b   : > { %v5807_v48 = vadd.f32 %v5739_v38, %v5516_v30  ;;  %v5162_v14 = vpop.f32.mrf.mxu3 }
 0x58d   : > { %v5843_v15 = vadd.f32 %v10437_v10, %v5807_v48  ;;  %6805 = vmatmul.msk.f32.gmra.mxu1 %vm3101_vm5, %v5613_v17  ;;  %v6027_v16 = vpop.f32.mrf.mxu2  ;;  %v5211_v17 = vadd.f32 %v5147_v18, %v10181_v39 }
 0x58e   : > { %v6028_v53 = vadd.f32 %v10431_v36, %v6027_v16 }
 0x58f   : > { %v6092_v8 = vadd.f32 %v6025_v6, %v5843_v15  ;;  %v5518_v49 = vadd.f32 %v5454_v0, %v5211_v17  ;;  %v5469_v41 = vpop.f32.mrf.mxu0  ;;  %v11270_v15 = vld [vmem:[#allocation35_spill] sm:$0xff]  ;;  %v5216_v17 = vadd.f32 %v5162_v14, %v10279_v27 }
 0x590   : > { %v5215_v16 = vadd.f32 %v5159_v55, %v11270_v15 }
 0x591   : > { %6124 = vst.msk [vmem:[%s10452_s17 + $0x70] sm:$0xff] %vm3101_vm5, %v6092_v8 }
 0x592   : > { %v5742_v45 = vpop.f32.mrf.mxu1  ;;  %v5522_v22 = vadd.f32 %v5466_v2, %v5215_v16 }
 0x593   : > { %v5808_v25 = vadd.f32 %v5742_v45, %v5517_v42  ;;  %v5165_v38 = vpop.f32.mrf.mxu3 }
 0x594   : > { %v5217_v44 = vadd.f32 %v5165_v38, %v10301_v63 }
 0x595   : > { %v5844_v32 = vadd.f32 %v10437_v10, %v5808_v25  ;;  %6806 = vmatmul.msk.f32.gmra.mxu1 %vm3101_vm5, %v5615_v40  ;;  %v6030_v62 = vpop.f32.mrf.mxu2 }
 0x596   : > { %v6031_v37 = vadd.f32 %v10431_v36, %v6030_v62 }
 0x597   : > { %v6093_v28 = vadd.f32 %v6028_v53, %v5844_v32  ;;  %v5472_v8 = vpop.f32.mrf.mxu0 }
 0x599   : > { %6125 = vst.msk [vmem:[%s10452_s17 + $0x78] sm:$0xff] %vm3101_vm5, %v6093_v28 }
 0x59a   : > { %v5745_v35 = vpop.f32.mrf.mxu1 }
 0x59b   : > { %v5809_v11 = vadd.f32 %v5745_v35, %v5518_v49  ;;  %v5168_v45 = vpop.f32.mrf.mxu3  ;;  %v5523_v49 = vadd.f32 %v5469_v41, %v5216_v17 }
 0x59d   : > { %v5845_v39 = vadd.f32 %v10437_v10, %v5809_v11  ;;  %v6033_v18 = vpop.f32.mrf.mxu2 }
 0x59e   : > { %v6034_v0 = vadd.f32 %v10431_v36, %v6033_v18  ;;  %v5524_v18 = vadd.f32 %v5472_v8, %v5217_v44 }
 0x59f   : > { %v6094_v26 = vadd.f32 %v6031_v37, %v5845_v39  ;;  %v5475_v29 = vpop.f32.mrf.mxu0 }
 0x5a1   : > { %6126 = vst.msk [vmem:[%s10452_s17 + $0x80] sm:$0xff] %vm3101_vm5, %v6094_v26 }
 0x5a2   : > { %v5748_v9 = vpop.f32.mrf.mxu1 }
 0x5a3   : > { %v5810_v7 = vadd.f32 %v5748_v9, %v5519_v56  ;;  %v5171_v55 = vpop.f32.mrf.mxu3 }
 0x5a5   : > { %v5846_v60 = vadd.f32 %v10437_v10, %v5810_v7  ;;  %v6036_v24 = vpop.f32.mrf.mxu2  ;;  %v5218_v7 = vadd.f32 %v5168_v45, %v10316_v13 }
 0x5a6   : > { %v6037_v21 = vadd.f32 %v10431_v36, %v6036_v24 }
 0x5a7   : > { %v6095_v31 = vadd.f32 %v6034_v0, %v5846_v60  ;;  %v5478_v26 = vpop.f32.mrf.mxu0  ;;  %v5525_v60 = vadd.f32 %v5475_v29, %v5218_v7 }
 0x5a9   : > { %6127 = vst.msk [vmem:[%s10452_s17 + $0x88] sm:$0xff] %vm3101_vm5, %v6095_v31 }
 0x5aa   : > { %v5751_v3 = vpop.f32.mrf.mxu1 }
 0x5ab   : > { %v5811_v50 = vadd.f32 %v5751_v3, %v5520_v47  ;;  %v5174_v12 = vpop.f32.mrf.mxu3  ;;  %v5219_v3 = vadd.f32 %v5171_v55, %v10335_v5 }
 0x5ad   : > { %v5847_v54 = vadd.f32 %v10437_v10, %v5811_v50  ;;  %v6039_v43 = vpop.f32.mrf.mxu2  ;;  %v5526_v52 = vadd.f32 %v5478_v26, %v5219_v3 }
 0x5ae   : > { %v6040_v1 = vadd.f32 %v10431_v36, %v6039_v43 }
 0x5af   : > { %v6096_v30 = vadd.f32 %v6037_v21, %v5847_v54  ;;  %v5481_v47 = vpop.f32.mrf.mxu0 }
 0x5b1   : > { %6128 = vst.msk [vmem:[%s10452_s17 + $0x90] sm:$0xff] %vm3101_vm5, %v6096_v30  ;;  %v11271_v30 = vld [vmem:[#allocation24_spill] sm:$0xff] }
 0x5b2   : > { %v5754_v48 = vpop.f32.mrf.mxu1  ;;  %v5220_v38 = vadd.f32 %v5174_v12, %v11271_v30 }
 0x5b3   : > { %v5812_v6 = vadd.f32 %v5754_v48, %v5521_v23  ;;  %v5177_v41 = vpop.f32.mrf.mxu3 }
 0x5b4   : > { %v5221_v8 = vadd.f32 %v5177_v41, %v10370_v59 }
 0x5b5   : > { %v5848_v19 = vadd.f32 %v10437_v10, %v5812_v6  ;;  %v6042_v46 = vpop.f32.mrf.mxu2 }
 0x5b6   : > { %v6043_v53 = vadd.f32 %v10431_v36, %v6042_v46 }
 0x5b7   : > { %v6097_v42 = vadd.f32 %v6040_v1, %v5848_v19  ;;  %v5484_v6 = vpop.f32.mrf.mxu0  ;;  %v5527_v1 = vadd.f32 %v5481_v47, %v5220_v38 }
 0x5b9   : > { %6129 = vst.msk [vmem:[%s10452_s17 + $0x98] sm:$0xff] %vm3101_vm5, %v6097_v42 }
 0x5ba   : > { %v5757_v40 = vpop.f32.mrf.mxu1 }
 0x5bb   : > { %v5813_v25 = vadd.f32 %v5757_v40, %v5522_v22  ;;  %v5180_v15 = vpop.f32.mrf.mxu3 }
 0x5bd   : > { %v5849_v32 = vadd.f32 %v10437_v10, %v5813_v25  ;;  %v6045_v62 = vpop.f32.mrf.mxu2  ;;  %v5528_v25 = vadd.f32 %v5484_v6, %v5221_v8 }
 0x5be   : > { %v6046_v37 = vadd.f32 %v10431_v36, %v6045_v62 }
 0x5bf   : > { %v6098_v28 = vadd.f32 %v6043_v53, %v5849_v32  ;;  %v5487_v40 = vpop.f32.mrf.mxu0 }
 0x5c1   : > { %6130 = vst.msk [vmem:[%s10452_s17 + $0xa0] sm:$0xff] %vm3101_vm5, %v6098_v28  ;;  %v5222_v28 = vadd.f32 %v5180_v15, %v10385_v20 }
 0x5c2   : > { %v5760_v35 = vpop.f32.mrf.mxu1 }
 0x5c3   : > { %v5814_v11 = vadd.f32 %v5760_v35, %v5523_v49  ;;  %v5183_v62 = vpop.f32.mrf.mxu3  ;;  %v5529_v35 = vadd.f32 %v5487_v40, %v5222_v28 }
 0x5c5   : > { %v5850_v57 = vadd.f32 %v10437_v10, %v5814_v11  ;;  %v6048_v39 = vpop.f32.mrf.mxu2 }
 0x5c6   : > { %v6049_v9 = vadd.f32 %v10431_v36, %v6048_v39 }
 0x5c7   : > { %v6099_v27 = vadd.f32 %v6046_v37, %v5850_v57  ;;  %v5490_v11 = vpop.f32.mrf.mxu0  ;;  %v5223_v57 = vadd.f32 %v5183_v62, %v10397_v4 }
 0x5c9   : > { %6131 = vst.msk [vmem:[%s10452_s17 + $0xa8] sm:$0xff] %vm3101_vm5, %v6099_v27  ;;  %v5530_v26 = vadd.f32 %v5490_v11, %v5223_v57 }
 0x5ca   : > { %v5763_v56 = vpop.f32.mrf.mxu1 }
 0x5cb   : > { %v5815_v2 = vadd.f32 %v5763_v56, %v5524_v18  ;;  %v5186_v18 = vpop.f32.mrf.mxu3 }
 0x5cd   : > { %v5851_v0 = vadd.f32 %v10437_v10, %v5815_v2  ;;  %v6051_v58 = vpop.f32.mrf.mxu2 }
 0x5ce   : > { %v6052_v31 = vadd.f32 %v10431_v36, %v6051_v58 }
 0x5cf   : > { %v6100_v63 = vadd.f32 %v6049_v9, %v5851_v0  ;;  %v5493_v7 = vpop.f32.mrf.mxu0  ;;  %v5224_v0 = vadd.f32 %v5186_v18, %v10407_v51 }
 0x5d1   : > { %6132 = vst.msk [vmem:[%s10452_s17 + $0xb0] sm:$0xff] %vm3101_vm5, %v6100_v63 }
 0x5d2   : > { %v5766_v24 = vpop.f32.mrf.mxu1 }
 0x5d3   : > { %v5816_v14 = vadd.f32 %v5766_v24, %v5525_v60  ;;  %v5189_v63 = vpop.f32.mrf.mxu3  ;;  %v5531_v60 = vadd.f32 %v5493_v7, %v5224_v0 }
 0x5d4   : > { %v5225_v3 = vadd.f32 %v5189_v63, %v10418_v34 }
 0x5d5   : > { %v5852_v50 = vadd.f32 %v10437_v10, %v5816_v14  ;;  %v6054_v13 = vpop.f32.mrf.mxu2 }
 0x5d6   : > { %v6055_v43 = vadd.f32 %v10431_v36, %v6054_v13 }
 0x5d7   : > { %v6101_v21 = vadd.f32 %v6052_v31, %v5852_v50  ;;  %v5496_v47 = vpop.f32.mrf.mxu0 }
 0x5d9   : > { %6133 = vst.msk [vmem:[%s10452_s17 + $0xb8] sm:$0xff] %vm3101_vm5, %v6101_v21  ;;  %v5532_v21 = vadd.f32 %v5496_v47, %v5225_v3 }
 0x5da   : > { %v5769_v61 = vpop.f32.mrf.mxu1 }
 0x5db   : > { %v5817_v54 = vadd.f32 %v5769_v61, %v5526_v52  ;;  %v5192_v41 = vpop.f32.mrf.mxu3 }
 0x5dd   : > { %v5853_v23 = vadd.f32 %v10437_v10, %v5817_v54  ;;  %v6057_v48 = vpop.f32.mrf.mxu2 }
 0x5de   : > { %v6058_v46 = vadd.f32 %v10431_v36, %v6057_v48 }
 0x5df   : > { %v6102_v5 = vadd.f32 %v6055_v43, %v5853_v23  ;;  %v5226_v43 = vadd.f32 %v5192_v41, %v10426_v33  ;;  %v5499_v38 = vpop.f32.mrf.mxu0 }
 0x5e1   : > { %6134 = vst.msk [vmem:[%s10452_s17 + $0xc0] sm:$0xff] %vm3101_vm5, %v6102_v5  ;;  %v5533_v48 = vadd.f32 %v5499_v38, %v5226_v43 }
 0x5e2   : > { %v5772_v16 = vpop.f32.mrf.mxu1 }
 0x5e3   : > { %v5818_v19 = vadd.f32 %v5772_v16, %v5527_v1 }
 0x5e5   : > { %v5854_v42 = vadd.f32 %v10437_v10, %v5818_v19  ;;  %v6060_v22 = vpop.f32.mrf.mxu2 }
 0x5e6   : > { %v6061_v32 = vadd.f32 %v10431_v36, %v6060_v22 }
 0x5e7   : > { %v6103_v45 = vadd.f32 %v6058_v46, %v5854_v42 }
 0x5e9   : > { %6135 = vst.msk [vmem:[%s10452_s17 + $0xc8] sm:$0xff] %vm3101_vm5, %v6103_v45 }
 0x5ea   : > { %v5775_v53 = vpop.f32.mrf.mxu1 }
 0x5eb   : > { %v5819_v17 = vadd.f32 %v5775_v53, %v5528_v25 }
 0x5ed   : > { %v5855_v29 = vadd.f32 %v10437_v10, %v5819_v17  ;;  %v6063_v49 = vpop.f32.mrf.mxu2 }
 0x5ee   : > { %v6064_v44 = vadd.f32 %v10431_v36, %v6063_v49 }
 0x5ef   : > { %v6104_v59 = vadd.f32 %v6061_v32, %v5855_v29 }
 0x5f1   : > { %6136 = vst.msk [vmem:[%s10452_s17 + $0xd0] sm:$0xff] %vm3101_vm5, %v6104_v59 }
 0x5f2   : > { %v5778_v37 = vpop.f32.mrf.mxu1 }
 0x5f3   : > { %v5820_v55 = vadd.f32 %v5778_v37, %v5529_v35 }
 0x5f5   : > { %v5856_v39 = vadd.f32 %v10437_v10, %v5820_v55  ;;  %v6066_v27 = vpop.f32.mrf.mxu2 }
 0x5f6   : > { %v6067_v9 = vadd.f32 %v10431_v36, %v6066_v27 }
 0x5f7   : > { %v6105_v20 = vadd.f32 %v6064_v44, %v5856_v39 }
 0x5f9   : > { %6137 = vst.msk [vmem:[%s10452_s17 + $0xd8] sm:$0xff] %vm3101_vm5, %v6105_v20 }
 0x5fa   : > { %v5781_v56 = vpop.f32.mrf.mxu1 }
 0x5fb   : > { %v5821_v2 = vadd.f32 %v5781_v56, %v5530_v26 }
 0x5fd   : > { %v5857_v58 = vadd.f32 %v10437_v10, %v5821_v2  ;;  %v6069_v4 = vpop.f32.mrf.mxu2 }
 0x5fe   : > { %v6070_v31 = vadd.f32 %v10431_v36, %v6069_v4 }
 0x5ff   : > { %v6106_v12 = vadd.f32 %v6067_v9, %v5857_v58 }
 0x601   : > { %6138 = vst.msk [vmem:[%s10452_s17 + $0xe0] sm:$0xff] %vm3101_vm5, %v6106_v12 }
 0x602   : > { %v5784_v24 = vpop.f32.mrf.mxu1 }
 0x603   : > { %v5822_v14 = vadd.f32 %v5784_v24, %v5531_v60 }
 0x605   : > { %v5858_v50 = vadd.f32 %v10437_v10, %v5822_v14  ;;  %v6072_v51 = vpop.f32.mrf.mxu2 }
 0x606   : > { %v6073_v54 = vadd.f32 %v10431_v36, %v6072_v51 }
 0x607   : > { %v6107_v13 = vadd.f32 %v6070_v31, %v5858_v50 }
 0x609   : > { %6139 = vst.msk [vmem:[%s10452_s17 + $0xe8] sm:$0xff] %vm3101_vm5, %v6107_v13 }
 0x60a   : > { %v5787_v52 = vpop.f32.mrf.mxu1 }
 0x60b   : > { %v5823_v61 = vadd.f32 %v5787_v52, %v5532_v21 }
 0x60d   : > { %v5859_v30 = vadd.f32 %v10437_v10, %v5823_v61  ;;  %v6075_v23 = vpop.f32.mrf.mxu2 }
 0x60e   : > { %v6076_v1 = vadd.f32 %v10431_v36, %v6075_v23 }
 0x60f   : > { %v6108_v34 = vadd.f32 %v6073_v54, %v5859_v30 }
 0x611   : > { %6140 = vst.msk [vmem:[%s10452_s17 + $0xf0] sm:$0xff] %vm3101_vm5, %v6108_v34 }
 0x612   : > { %v5790_v6 = vpop.f32.mrf.mxu1 }
 0x613   : > { %v5824_v5 = vadd.f32 %v5790_v6, %v5533_v48 }
 0x615   : > { %v5860_v15 = vadd.f32 %v10437_v10, %v5824_v5 }
 0x617   : > { %v6109_v16 = vadd.f32 %v6076_v1, %v5860_v15 }
 0x619   : > { %6141 = vst.msk [vmem:[%s10452_s17 + $0xf8] sm:$0xff] %vm3101_vm5, %v6109_v16 }
 0x61a PF: > { %s17_s24 = sadd.s32 1, %s6898_s24  }
 0x61b   : > { %p14_p4 = scmp.ge.s32.totalorder %s17_s24, 4  }
 0x61d   :  { %16 = sbr.rel (!%p14_p4) target bundleno = 1 (0x1), region = 98 }

</bundles_post_ra>
